<compile_context>
chip_gen: v7x
topology: tpu7x:2x2x1
jax: 0.10.0
libtpu: 0.0.40
codegen_flags: <defaults>
</compile_context>

<pallas_src>
import functools

import jax
import jax.numpy as jnp
from jax.experimental import pallas as pl
from jax.experimental.pallas import tpu as pltpu


_VMEM_LIMIT_BYTES = 48 * 1024 * 1024  # > v5e 16MiB default scoped, < v7x 64MiB physical


def _compiler_params():
    return pltpu.CompilerParams(
        dimension_semantics=("parallel",),
        vmem_limit_bytes=_VMEM_LIMIT_BYTES)


# ---------------------------------------------------------------------------
# Kernel bodies
# ---------------------------------------------------------------------------

def _conv_s1_kernel(x_ref, w_ref, b_ref, o_ref, xpad_ref, *, ksize, pad,
                    relu_out):
    """Stride-1 conv: in-kernel halo (VMEM scratch) + KH*KW shifted-window dots."""
    _, h, w, cin = x_ref.shape
    _, oh, ow, cout = o_ref.shape
    # Zero the halo scratch every step (no cross-step state, so the grid axis
    # stays safe under megacore "parallel" sharding), then drop the tile in.
    xpad_ref[...] = jnp.zeros(xpad_ref.shape, xpad_ref.dtype)
    xpad_ref[pad:pad + h, pad:pad + w, :] = x_ref[0]
    acc = jnp.zeros((oh * ow, cout), jnp.float32)
    for kh in range(ksize):
        for kw in range(ksize):
            tap = xpad_ref[kh:kh + oh, kw:kw + ow, :]        # (oh, ow, cin) bf16
            acc = acc + jnp.dot(tap.reshape(oh * ow, cin),
                                w_ref[kh * ksize + kw],
                                preferred_element_type=jnp.float32)
    y = acc + b_ref[...].astype(jnp.float32)
    if relu_out:
        y = jnp.maximum(y, 0.0)
    o_ref[0] = y.reshape(oh, ow, cout).astype(o_ref.dtype)


def _conv_s2_kernel(x_ref, w_ref, b_ref, o_ref, *, ksize, relu_out):
    """Stride-2 conv on the phase layout (1, Hp/2, 2, Wp/2, 2*Cin).

    Each (kh, wb) "double tap" is a contiguous slab whose 2*Cin lanes carry
    both W-phases; the phase selection lives in the (2*Cin, Cout) weight rows,
    so there is no strided or lane slicing in-kernel.
    """
    _, oh, ow, cout = o_ref.shape
    cin2 = x_ref.shape[4]
    kwh = ksize // 2
    acc = jnp.zeros((oh * ow, cout), jnp.float32)
    for kh in range(ksize):
        hblk, hph = kh // 2, kh % 2
        for wbo in range(kwh):
            slab = x_ref[0, hblk:hblk + oh, hph, wbo:wbo + ow, :]  # (oh, ow, 2cin)
            acc = acc + jnp.dot(slab.reshape(oh * ow, cin2),
                                w_ref[kh * kwh + wbo],
                                preferred_element_type=jnp.float32)
    y = acc + b_ref[...].astype(jnp.float32)
    if relu_out:
        y = jnp.maximum(y, 0.0)
    o_ref[0] = y.reshape(oh, ow, cout).astype(o_ref.dtype)


def _resblock_kernel(x_ref, w1_ref, b1_ref, w2_ref, b2_ref, o_ref, xpad_ref, *,
                     relu_out):
    """Fused ResBlock: ReLU -> 3x3 conv -> ReLU -> 1x1 conv -> +residual (-> ReLU)."""
    _, h, w, c = x_ref.shape
    cmid = w1_ref.shape[-1]
    x = x_ref[0]                                             # (h, w, c) bf16
    xpad_ref[...] = jnp.zeros(xpad_ref.shape, xpad_ref.dtype)
    xpad_ref[1:1 + h, 1:1 + w, :] = jnp.maximum(x, 0)        # ReLU once on the tile
    acc = jnp.zeros((h * w, cmid), jnp.float32)
    for kh in range(3):
        for kw in range(3):
            tap = xpad_ref[kh:kh + h, kw:kw + w, :]
            acc = acc + jnp.dot(tap.reshape(h * w, c),
                                w1_ref[kh * 3 + kw],
                                preferred_element_type=jnp.float32)
    hid = jnp.maximum(acc + b1_ref[...].astype(jnp.float32), 0.0)
    y = jnp.dot(hid.astype(jnp.bfloat16), w2_ref[...],
                preferred_element_type=jnp.float32)
    y = y + b2_ref[...].astype(jnp.float32) + x.reshape(h * w, c).astype(jnp.float32)
    if relu_out:
        y = jnp.maximum(y, 0.0)
    o_ref[0] = y.reshape(h, w, c).astype(o_ref.dtype)


# ---------------------------------------------------------------------------
# pallas_call wrappers
# ---------------------------------------------------------------------------

def conv2d_s1_pallas(x, w_taps, bias, *, ksize, pad, relu_out):
    b, h, w, cin = x.shape
    cout = w_taps.shape[-1]
    oh = h + 2 * pad - ksize + 1
    ow = w + 2 * pad - ksize + 1
    flops = 2 * b * oh * ow * ksize * ksize * cin * cout
    bytes_accessed = (x.size + w_taps.size + b * oh * ow * cout) * 2 + bias.size * 4
    return pl.pallas_call(
        functools.partial(_conv_s1_kernel, ksize=ksize, pad=pad,
                          relu_out=relu_out),
        out_shape=jax.ShapeDtypeStruct((b, oh, ow, cout), x.dtype),
        grid=(b,),
        in_specs=[
            pl.BlockSpec((1, h, w, cin), lambda i: (i, 0, 0, 0)),
            pl.BlockSpec((ksize * ksize, cin, cout), lambda i: (0, 0, 0)),
            pl.BlockSpec((1, cout), lambda i: (0, 0)),
        ],
        out_specs=pl.BlockSpec((1, oh, ow, cout), lambda i: (i, 0, 0, 0)),
        scratch_shapes=[pltpu.VMEM((h + 2 * pad, w + 2 * pad, cin), x.dtype)],
        compiler_params=_compiler_params(),
        cost_estimate=pl.CostEstimate(flops=flops, transcendentals=0,
                                      bytes_accessed=bytes_accessed),
    )(x, w_taps, bias)


def conv2d_s2_pallas(x, w_pairs, bias, *, ksize, relu_out):
    """4x4 / stride-2 / pad-1 conv (the only strided conv in this module)."""
    b, h, w, cin = x.shape
    assert h % 2 == 0 and w % 2 == 0 and ksize % 2 == 0
    cout = w_pairs.shape[-1]
    oh, ow = h // 2, w // 2
    hb, wb = (h + 2) // 2, (w + 2) // 2
    # +1 spatial halo pad, then a *pure* row-major reshape into the stride-2
    # phase layout (no transpose, no extra HBM pass beyond the pad).
    xp = jnp.pad(x, ((0, 0), (1, 1), (1, 1), (0, 0)))
    xph = xp.reshape(b, hb, 2, wb, 2 * cin)
    flops = 2 * b * oh * ow * ksize * ksize * cin * cout
    bytes_accessed = (xph.size + w_pairs.size + b * oh * ow * cout) * 2 + bias.size * 4
    return pl.pallas_call(
        functools.partial(_conv_s2_kernel, ksize=ksize, relu_out=relu_out),
        out_shape=jax.ShapeDtypeStruct((b, oh, ow, cout), x.dtype),
        grid=(b,),
        in_specs=[
            pl.BlockSpec((1, hb, 2, wb, 2 * cin), lambda i: (i, 0, 0, 0, 0)),
            pl.BlockSpec(w_pairs.shape, lambda i: (0, 0, 0)),
            pl.BlockSpec((1, cout), lambda i: (0, 0)),
        ],
        out_specs=pl.BlockSpec((1, oh, ow, cout), lambda i: (i, 0, 0, 0)),
        compiler_params=_compiler_params(),
        cost_estimate=pl.CostEstimate(flops=flops, transcendentals=0,
                                      bytes_accessed=bytes_accessed),
    )(xph, w_pairs, bias)


def resblock_pallas(x, w1_taps, b1, w2_mat, b2, *, relu_out):
    b, h, w, c = x.shape
    cmid = w1_taps.shape[-1]
    flops = 2 * b * h * w * (9 * c * cmid + cmid * c)
    bytes_accessed = (2 * x.size + w1_taps.size + w2_mat.size) * 2 \
        + (b1.size + b2.size) * 4
    return pl.pallas_call(
        functools.partial(_resblock_kernel, relu_out=relu_out),
        out_shape=jax.ShapeDtypeStruct((b, h, w, c), x.dtype),
        grid=(b,),
        in_specs=[
            pl.BlockSpec((1, h, w, c), lambda i: (i, 0, 0, 0)),
            pl.BlockSpec((9, c, cmid), lambda i: (0, 0, 0)),
            pl.BlockSpec((1, cmid), lambda i: (0, 0)),
            pl.BlockSpec((cmid, c), lambda i: (0, 0)),
            pl.BlockSpec((1, c), lambda i: (0, 0)),
        ],
        out_specs=pl.BlockSpec((1, h, w, c), lambda i: (i, 0, 0, 0)),
        scratch_shapes=[pltpu.VMEM((h + 2, w + 2, c), x.dtype)],
        compiler_params=_compiler_params(),
        cost_estimate=pl.CostEstimate(flops=flops, transcendentals=0,
                                      bytes_accessed=bytes_accessed),
    )(x, w1_taps, b1, w2_mat, b2)


# ---------------------------------------------------------------------------
# Weight preparation (PyTorch OIHW -> kernel layouts, bf16 operands)
# ---------------------------------------------------------------------------

def _conv_weight_taps(w_oihw):
    """(Cout, Cin, KH, KW) -> (KH*KW, Cin, Cout) bf16 (stride-1 taps)."""
    cout, cin, kh, kw = w_oihw.shape
    wt = jnp.transpose(w_oihw, (2, 3, 1, 0)).reshape(kh * kw, cin, cout)
    return wt.astype(jnp.bfloat16)


def _conv_weight_pairs(w_oihw):
    """(Cout, Cin, KH, KW) -> (KH*(KW//2), 2*Cin, Cout) bf16.

    Row index of the middle dim is (w_phase*Cin + cin), matching the stride-2
    phase layout lanes, so each double-tap dot covers two kw positions.
    """
    cout, cin, kh, kw = w_oihw.shape
    wt = jnp.transpose(w_oihw, (2, 3, 1, 0))               # (KH, KW, Cin, Cout)
    wt = wt.reshape(kh * (kw // 2), 2 * cin, cout)         # row-major regroup
    return wt.astype(jnp.bfloat16)


def _bias2d(b):
    return b.reshape(1, -1).astype(jnp.float32)


# ---------------------------------------------------------------------------
# Encoder parameters / forward (Pallas) / forward (pure-JAX reference)
# ---------------------------------------------------------------------------

def init_encoder_params(key, in_channel, channel, n_res_block, n_res_channel,
                        stride):
    """Weights kept in PyTorch Conv2d layout (Cout, Cin, KH, KW), f32."""
    def conv(k, cout, cin, ksz):
        kw_, kb_ = jax.random.split(k)
        fan_in = cin * ksz * ksz
        wgt = jax.random.normal(kw_, (cout, cin, ksz, ksz), jnp.float32)
        wgt = wgt / jnp.sqrt(jnp.float32(fan_in))
        bias = jax.random.normal(kb_, (cout,), jnp.float32) * 0.1
        return wgt, bias

    keys = iter(jax.random.split(key, 64))
    convs = []  # (w, b, stride, padding, relu_after)
    if stride == 8:
        convs.append(conv(next(keys), channel // 2, in_channel, 4) + (2, 1, True))
        convs.append(conv(next(keys), channel, channel // 2, 4) + (2, 1, True))
        convs.append(conv(next(keys), channel, channel, 4) + (2, 1, True))
        convs.append(conv(next(keys), channel, channel, 3) + (1, 1, False))
    elif stride == 4:
        convs.append(conv(next(keys), channel // 2, in_channel, 4) + (2, 1, True))
        convs.append(conv(next(keys), channel, channel // 2, 4) + (2, 1, True))
        convs.append(conv(next(keys), channel, channel, 3) + (1, 1, False))
    elif stride == 2:
        convs.append(conv(next(keys), channel // 2, in_channel, 4) + (2, 1, True))
        convs.append(conv(next(keys), channel, channel // 2, 3) + (1, 1, False))
    elif stride == 1:
        convs.append(conv(next(keys), channel // 2, in_channel, 5) + (1, 2, True))
        convs.append(conv(next(keys), channel // 2, channel // 2, 3) + (1, 1, False))
    else:
        raise ValueError(f"unsupported stride {stride}")

    resblocks = []
    for _ in range(n_res_block):
        w1, b1 = conv(next(keys), n_res_channel, channel, 3)
        w2, b2 = conv(next(keys), channel, n_res_channel, 1)
        resblocks.append((w1, b1, w2, b2))
    return {"convs": convs, "resblocks": resblocks}


def encoder_forward(x_nchw, params):
    # NHWC (channels -> lanes), bf16 activation streams between layers.
    x = jnp.transpose(x_nchw, (0, 2, 3, 1)).astype(jnp.bfloat16)
    convs = params["convs"]
    resblocks = params["resblocks"]
    for li, (wgt, bias, s, p, relu_after) in enumerate(convs):
        # The PyTorch module appends a trailing nn.ReLU unconditionally; fuse
        # it into the last conv when there are no ResBlocks.
        relu = relu_after or ((li == len(convs) - 1) and not resblocks)
        ksz = int(wgt.shape[2])
        if s == 2:
            assert p == 1
            x = conv2d_s2_pallas(x, _conv_weight_pairs(wgt), _bias2d(bias),
                                 ksize=ksz, relu_out=relu)
        else:
            x = conv2d_s1_pallas(x, _conv_weight_taps(wgt), _bias2d(bias),
                                 ksize=ksz, pad=p, relu_out=relu)
    for ri, (w1, b1, w2, b2) in enumerate(resblocks):
        x = resblock_pallas(
            x, _conv_weight_taps(w1), _bias2d(b1),
            jnp.transpose(w2[:, :, 0, 0]).astype(jnp.bfloat16), _bias2d(b2),
            relu_out=(ri == len(resblocks) - 1))   # trailing nn.ReLU fused here
    return jnp.transpose(x.astype(jnp.float32), (0, 3, 1, 2))


def _conv2d_ref(x_nchw, w, b, stride, padding):
    y = jax.lax.conv_general_dilated(
        x_nchw, w, window_strides=(stride, stride),
        padding=((padding, padding), (padding, padding)),
        dimension_numbers=("NCHW", "OIHW", "NCHW"))
    return y + b[None, :, None, None]


def encoder_forward_ref(x_nchw, params):
    x = x_nchw
    for (w, b, s, p, relu_after) in params["convs"]:
        x = _conv2d_ref(x, w, b, s, p)
        if relu_after:
            x = jax.nn.relu(x)
    for (w1, b1, w2, b2) in params["resblocks"]:
        h = jax.nn.relu(x)
        h = _conv2d_ref(h, w1, b1, 1, 1)
        h = jax.nn.relu(h)
        h = _conv2d_ref(h, w2, b2, 1, 0)
        x = x + h
    return jax.nn.relu(x)   # trailing nn.ReLU (unconditional, as in PyTorch)


if __name__ == "__main__":
    # Small config consistent with the module: Encoder(4, 32, 2, 8, stride=4)
    B, IN_CH, H, W = 2, 4, 16, 16
    CHANNEL, N_RES_BLOCK, N_RES_CHANNEL, STRIDE = 32, 2, 8, 4

    key = jax.random.PRNGKey(0)
    kx, kp = jax.random.split(key)
    x = jax.random.normal(kx, (B, IN_CH, H, W), dtype=jnp.float32)
    params = init_encoder_params(kp, IN_CH, CHANNEL, N_RES_BLOCK,
                                 N_RES_CHANNEL, STRIDE)

    fwd = jax.jit(lambda inp: encoder_forward(inp, params))
    out = fwd(x)
    jax.block_until_ready(out)

    ref = encoder_forward_ref(x, params)
    assert out.shape == ref.shape == (B, CHANNEL, H // STRIDE, W // STRIDE)
    max_err = float(jnp.max(jnp.abs(out - ref)))
    # bf16 matmul operands + bf16 inter-layer streams => loosened tolerance.
    assert jnp.allclose(out, ref, atol=1e-1, rtol=5e-2), (
        "max abs diff = %e" % max_err)

    print("KERNEL_OK")
</pallas_src>

<mosaic_0001>
module attributes {stable_mosaic.version = 11 : i64} {
  func.func @_conv_s2_kernel(%arg0: i32, %arg1: memref<1x9x2x9x8xbf16, #tpu.memory_space<vmem>>, %arg2: memref<8x8x16xbf16, #tpu.memory_space<vmem>>, %arg3: memref<1x16xf32, #tpu.memory_space<vmem>>, %arg4: memref<1x8x8x16xbf16, #tpu.memory_space<vmem>>) attributes {dimension_semantics = [#tpu.dimension_semantics<parallel>], iteration_bounds = array<i64: 2>, scalar_prefetch = 0 : i64, scratch_operands = 0 : i64, tpu.core_type = #tpu.core_type<tc>, window_params = [{transform_indices = @transform_0, window_bounds = array<i64: 1, 9, 2, 9, 8>}, {pipeline_mode = #tpu.pipeline_mode<synchronous>, transform_indices = @transform_1, window_bounds = array<i64: 8, 8, 16>}, {pipeline_mode = #tpu.pipeline_mode<synchronous>, transform_indices = @transform_2, window_bounds = array<i64: 1, 16>}, {transform_indices = @transform_3, window_bounds = array<i64: 1, 8, 8, 16>}]} {
    %cst = arith.constant 0.000000e+00 : f32
    %0 = vector.broadcast %cst : f32 to vector<64x16xf32>
    %c0 = arith.constant 0 : index
    %c0_0 = arith.constant 0 : index
    %c0_1 = arith.constant 0 : index
    %c0_2 = arith.constant 0 : index
    %c0_3 = arith.constant 0 : index
    %1 = vector.load %arg1[%c0, %c0_0, %c0_1, %c0_2, %c0_3] : memref<1x9x2x9x8xbf16, #tpu.memory_space<vmem>>, vector<1x8x1x8x8xbf16>
    %2 = vector.shape_cast %1 : vector<1x8x1x8x8xbf16> to vector<8x8x8xbf16>
    %3 = vector.shape_cast %2 : vector<8x8x8xbf16> to vector<64x8xbf16>
    %c0_4 = arith.constant 0 : index
    %c0_5 = arith.constant 0 : index
    %c0_6 = arith.constant 0 : index
    %4 = vector.load %arg2[%c0_4, %c0_5, %c0_6] : memref<8x8x16xbf16, #tpu.memory_space<vmem>>, vector<1x8x16xbf16>
    %5 = vector.shape_cast %4 : vector<1x8x16xbf16> to vector<8x16xbf16>
    %cst_7 = arith.constant dense<0.000000e+00> : vector<64x16xf32>
    %6 = tpu.matmul %3, %5, %cst_7 {dimension_numbers = #tpu.dot_dimension_numbers<[1], [0], [0], [1], [0, 0, 1, 1], [], []>} : vector<64x8xbf16>, vector<8x16xbf16>, vector<64x16xf32> -> vector<64x16xf32>
    %7 = arith.addf %0, %6 : vector<64x16xf32>
    %c0_8 = arith.constant 0 : index
    %c0_9 = arith.constant 0 : index
    %c0_10 = arith.constant 0 : index
    %c1 = arith.constant 1 : index
    %c0_11 = arith.constant 0 : index
    %8 = vector.load %arg1[%c0_8, %c0_9, %c0_10, %c1, %c0_11] : memref<1x9x2x9x8xbf16, #tpu.memory_space<vmem>>, vector<1x8x1x8x8xbf16>
    %9 = vector.shape_cast %8 : vector<1x8x1x8x8xbf16> to vector<8x8x8xbf16>
    %10 = vector.shape_cast %9 : vector<8x8x8xbf16> to vector<64x8xbf16>
    %c1_12 = arith.constant 1 : index
    %c0_13 = arith.constant 0 : index
    %c0_14 = arith.constant 0 : index
    %11 = vector.load %arg2[%c1_12, %c0_13, %c0_14] : memref<8x8x16xbf16, #tpu.memory_space<vmem>>, vector<1x8x16xbf16>
    %12 = vector.shape_cast %11 : vector<1x8x16xbf16> to vector<8x16xbf16>
    %cst_15 = arith.constant dense<0.000000e+00> : vector<64x16xf32>
    %13 = tpu.matmul %10, %12, %cst_15 {dimension_numbers = #tpu.dot_dimension_numbers<[1], [0], [0], [1], [0, 0, 1, 1], [], []>} : vector<64x8xbf16>, vector<8x16xbf16>, vector<64x16xf32> -> vector<64x16xf32>
    %14 = arith.addf %7, %13 : vector<64x16xf32>
    %c0_16 = arith.constant 0 : index
    %c0_17 = arith.constant 0 : index
    %c1_18 = arith.constant 1 : index
    %c0_19 = arith.constant 0 : index
    %c0_20 = arith.constant 0 : index
    %15 = vector.load %arg1[%c0_16, %c0_17, %c1_18, %c0_19, %c0_20] : memref<1x9x2x9x8xbf16, #tpu.memory_space<vmem>>, vector<1x8x1x8x8xbf16>
    %16 = vector.shape_cast %15 : vector<1x8x1x8x8xbf16> to vector<8x8x8xbf16>
    %17 = vector.shape_cast %16 : vector<8x8x8xbf16> to vector<64x8xbf16>
    %c2 = arith.constant 2 : index
    %c0_21 = arith.constant 0 : index
    %c0_22 = arith.constant 0 : index
    %18 = vector.load %arg2[%c2, %c0_21, %c0_22] : memref<8x8x16xbf16, #tpu.memory_space<vmem>>, vector<1x8x16xbf16>
    %19 = vector.shape_cast %18 : vector<1x8x16xbf16> to vector<8x16xbf16>
    %cst_23 = arith.constant dense<0.000000e+00> : vector<64x16xf32>
    %20 = tpu.matmul %17, %19, %cst_23 {dimension_numbers = #tpu.dot_dimension_numbers<[1], [0], [0], [1], [0, 0, 1, 1], [], []>} : vector<64x8xbf16>, vector<8x16xbf16>, vector<64x16xf32> -> vector<64x16xf32>
    %21 = arith.addf %14, %20 : vector<64x16xf32>
    %c0_24 = arith.constant 0 : index
    %c0_25 = arith.constant 0 : index
    %c1_26 = arith.constant 1 : index
    %c1_27 = arith.constant 1 : index
    %c0_28 = arith.constant 0 : index
    %22 = vector.load %arg1[%c0_24, %c0_25, %c1_26, %c1_27, %c0_28] : memref<1x9x2x9x8xbf16, #tpu.memory_space<vmem>>, vector<1x8x1x8x8xbf16>
    %23 = vector.shape_cast %22 : vector<1x8x1x8x8xbf16> to vector<8x8x8xbf16>
    %24 = vector.shape_cast %23 : vector<8x8x8xbf16> to vector<64x8xbf16>
    %c3 = arith.constant 3 : index
    %c0_29 = arith.constant 0 : index
    %c0_30 = arith.constant 0 : index
    %25 = vector.load %arg2[%c3, %c0_29, %c0_30] : memref<8x8x16xbf16, #tpu.memory_space<vmem>>, vector<1x8x16xbf16>
    %26 = vector.shape_cast %25 : vector<1x8x16xbf16> to vector<8x16xbf16>
    %cst_31 = arith.constant dense<0.000000e+00> : vector<64x16xf32>
    %27 = tpu.matmul %24, %26, %cst_31 {dimension_numbers = #tpu.dot_dimension_numbers<[1], [0], [0], [1], [0, 0, 1, 1], [], []>} : vector<64x8xbf16>, vector<8x16xbf16>, vector<64x16xf32> -> vector<64x16xf32>
    %28 = arith.addf %21, %27 : vector<64x16xf32>
    %c0_32 = arith.constant 0 : index
    %c1_33 = arith.constant 1 : index
    %c0_34 = arith.constant 0 : index
    %c0_35 = arith.constant 0 : index
    %c0_36 = arith.constant 0 : index
    %29 = vector.load %arg1[%c0_32, %c1_33, %c0_34, %c0_35, %c0_36] : memref<1x9x2x9x8xbf16, #tpu.memory_space<vmem>>, vector<1x8x1x8x8xbf16>
    %30 = vector.shape_cast %29 : vector<1x8x1x8x8xbf16> to vector<8x8x8xbf16>
    %31 = vector.shape_cast %30 : vector<8x8x8xbf16> to vector<64x8xbf16>
    %c4 = arith.constant 4 : index
    %c0_37 = arith.constant 0 : index
    %c0_38 = arith.constant 0 : index
    %32 = vector.load %arg2[%c4, %c0_37, %c0_38] : memref<8x8x16xbf16, #tpu.memory_space<vmem>>, vector<1x8x16xbf16>
    %33 = vector.shape_cast %32 : vector<1x8x16xbf16> to vector<8x16xbf16>
    %cst_39 = arith.constant dense<0.000000e+00> : vector<64x16xf32>
    %34 = tpu.matmul %31, %33, %cst_39 {dimension_numbers = #tpu.dot_dimension_numbers<[1], [0], [0], [1], [0, 0, 1, 1], [], []>} : vector<64x8xbf16>, vector<8x16xbf16>, vector<64x16xf32> -> vector<64x16xf32>
    %35 = arith.addf %28, %34 : vector<64x16xf32>
    %c0_40 = arith.constant 0 : index
    %c1_41 = arith.constant 1 : index
    %c0_42 = arith.constant 0 : index
    %c1_43 = arith.constant 1 : index
    %c0_44 = arith.constant 0 : index
    %36 = vector.load %arg1[%c0_40, %c1_41, %c0_42, %c1_43, %c0_44] : memref<1x9x2x9x8xbf16, #tpu.memory_space<vmem>>, vector<1x8x1x8x8xbf16>
    %37 = vector.shape_cast %36 : vector<1x8x1x8x8xbf16> to vector<8x8x8xbf16>
    %38 = vector.shape_cast %37 : vector<8x8x8xbf16> to vector<64x8xbf16>
    %c5 = arith.constant 5 : index
    %c0_45 = arith.constant 0 : index
    %c0_46 = arith.constant 0 : index
    %39 = vector.load %arg2[%c5, %c0_45, %c0_46] : memref<8x8x16xbf16, #tpu.memory_space<vmem>>, vector<1x8x16xbf16>
    %40 = vector.shape_cast %39 : vector<1x8x16xbf16> to vector<8x16xbf16>
    %cst_47 = arith.constant dense<0.000000e+00> : vector<64x16xf32>
    %41 = tpu.matmul %38, %40, %cst_47 {dimension_numbers = #tpu.dot_dimension_numbers<[1], [0], [0], [1], [0, 0, 1, 1], [], []>} : vector<64x8xbf16>, vector<8x16xbf16>, vector<64x16xf32> -> vector<64x16xf32>
    %42 = arith.addf %35, %41 : vector<64x16xf32>
    %c0_48 = arith.constant 0 : index
    %c1_49 = arith.constant 1 : index
    %c1_50 = arith.constant 1 : index
    %c0_51 = arith.constant 0 : index
    %c0_52 = arith.constant 0 : index
    %43 = vector.load %arg1[%c0_48, %c1_49, %c1_50, %c0_51, %c0_52] : memref<1x9x2x9x8xbf16, #tpu.memory_space<vmem>>, vector<1x8x1x8x8xbf16>
    %44 = vector.shape_cast %43 : vector<1x8x1x8x8xbf16> to vector<8x8x8xbf16>
    %45 = vector.shape_cast %44 : vector<8x8x8xbf16> to vector<64x8xbf16>
    %c6 = arith.constant 6 : index
    %c0_53 = arith.constant 0 : index
    %c0_54 = arith.constant 0 : index
    %46 = vector.load %arg2[%c6, %c0_53, %c0_54] : memref<8x8x16xbf16, #tpu.memory_space<vmem>>, vector<1x8x16xbf16>
    %47 = vector.shape_cast %46 : vector<1x8x16xbf16> to vector<8x16xbf16>
    %cst_55 = arith.constant dense<0.000000e+00> : vector<64x16xf32>
    %48 = tpu.matmul %45, %47, %cst_55 {dimension_numbers = #tpu.dot_dimension_numbers<[1], [0], [0], [1], [0, 0, 1, 1], [], []>} : vector<64x8xbf16>, vector<8x16xbf16>, vector<64x16xf32> -> vector<64x16xf32>
    %49 = arith.addf %42, %48 : vector<64x16xf32>
    %c0_56 = arith.constant 0 : index
    %c1_57 = arith.constant 1 : index
    %c1_58 = arith.constant 1 : index
    %c1_59 = arith.constant 1 : index
    %c0_60 = arith.constant 0 : index
    %50 = vector.load %arg1[%c0_56, %c1_57, %c1_58, %c1_59, %c0_60] : memref<1x9x2x9x8xbf16, #tpu.memory_space<vmem>>, vector<1x8x1x8x8xbf16>
    %51 = vector.shape_cast %50 : vector<1x8x1x8x8xbf16> to vector<8x8x8xbf16>
    %52 = vector.shape_cast %51 : vector<8x8x8xbf16> to vector<64x8xbf16>
    %c7 = arith.constant 7 : index
    %c0_61 = arith.constant 0 : index
    %c0_62 = arith.constant 0 : index
    %53 = vector.load %arg2[%c7, %c0_61, %c0_62] : memref<8x8x16xbf16, #tpu.memory_space<vmem>>, vector<1x8x16xbf16>
    %54 = vector.shape_cast %53 : vector<1x8x16xbf16> to vector<8x16xbf16>
    %cst_63 = arith.constant dense<0.000000e+00> : vector<64x16xf32>
    %55 = tpu.matmul %52, %54, %cst_63 {dimension_numbers = #tpu.dot_dimension_numbers<[1], [0], [0], [1], [0, 0, 1, 1], [], []>} : vector<64x8xbf16>, vector<8x16xbf16>, vector<64x16xf32> -> vector<64x16xf32>
    %56 = arith.addf %49, %55 : vector<64x16xf32>
    %c0_64 = arith.constant 0 : index
    %c0_65 = arith.constant 0 : index
    %57 = vector.load %arg3[%c0_64, %c0_65] : memref<1x16xf32, #tpu.memory_space<vmem>>, vector<1x16xf32>
    %58 = vector.broadcast %57 : vector<1x16xf32> to vector<64x16xf32>
    %59 = arith.addf %56, %58 : vector<64x16xf32>
    %cst_66 = arith.constant 0.000000e+00 : f32
    %60 = vector.broadcast %cst_66 : f32 to vector<64x16xf32>
    %61 = arith.maximumf %59, %60 : vector<64x16xf32>
    %62 = vector.shape_cast %61 : vector<64x16xf32> to vector<8x8x16xf32>
    %63 = arith.truncf %62 : vector<8x8x16xf32> to vector<8x8x16xbf16>
    %c0_67 = arith.constant 0 : index
    %c0_68 = arith.constant 0 : index
    %c0_69 = arith.constant 0 : index
    %c0_70 = arith.constant 0 : index
    %64 = vector.load %arg4[%c0_67, %c0_68, %c0_69, %c0_70] : memref<1x8x8x16xbf16, #tpu.memory_space<vmem>>, vector<1x8x8x16xbf16>
    %65 = vector.shape_cast %64 : vector<1x8x8x16xbf16> to vector<8x8x16xbf16>
    %66 = vector.shape_cast %63 : vector<8x8x16xbf16> to vector<1x8x8x16xbf16>
    tpu.vector_store %arg4[%c0_67, %c0_68, %c0_69, %c0_70], %66 {strides = array<i32>} : memref<1x8x8x16xbf16, #tpu.memory_space<vmem>>, vector<1x8x8x16xbf16>,
    return
  }
  func.func @transform_0(%arg0: i32) -> (i32, i32, i32, i32, i32) {
    %c0_i32 = arith.constant 0 : i32
    %c0_i32_0 = arith.constant 0 : i32
    %c0_i32_1 = arith.constant 0 : i32
    %c0_i32_2 = arith.constant 0 : i32
    %c0_i32_3 = arith.constant 0 : i32
    return %arg0, %c0_i32, %c0_i32_0, %c0_i32_1, %c0_i32_2 : i32, i32, i32, i32, i32
  }
  func.func @transform_1(%arg0: i32) -> (i32, i32, i32) {
    %c0_i32 = arith.constant 0 : i32
    %c0_i32_0 = arith.constant 0 : i32
    %c0_i32_1 = arith.constant 0 : i32
    %c0_i32_2 = arith.constant 0 : i32
    return %c0_i32, %c0_i32_0, %c0_i32_1 : i32, i32, i32
  }
  func.func @transform_2(%arg0: i32) -> (i32, i32) {
    %c0_i32 = arith.constant 0 : i32
    %c0_i32_0 = arith.constant 0 : i32
    %c0_i32_1 = arith.constant 0 : i32
    return %c0_i32, %c0_i32_0 : i32, i32
  }
  func.func @transform_3(%arg0: i32) -> (i32, i32, i32, i32) {
    %c0_i32 = arith.constant 0 : i32
    %c0_i32_0 = arith.constant 0 : i32
    %c0_i32_1 = arith.constant 0 : i32
    %c0_i32_2 = arith.constant 0 : i32
    return %arg0, %c0_i32, %c0_i32_0, %c0_i32_1 : i32, i32, i32, i32
  }
}

module attributes {stable_mosaic.version = 11 : i64} {
  func.func @_conv_s1_kernel(%arg0: i32, %arg1: memref<1x4x4x32xbf16, #tpu.memory_space<vmem>>, %arg2: memref<9x32x32xbf16, #tpu.memory_space<vmem>>, %arg3: memref<1x32xf32, #tpu.memory_space<vmem>>, %arg4: memref<1x4x4x32xbf16, #tpu.memory_space<vmem>>, %arg5: memref<6x6x32xbf16, #tpu.memory_space<vmem>>) attributes {dimension_semantics = [#tpu.dimension_semantics<parallel>], iteration_bounds = array<i64: 2>, scalar_prefetch = 0 : i64, scratch_operands = 1 : i64, tpu.core_type = #tpu.core_type<tc>, window_params = [{transform_indices = @transform_0, window_bounds = array<i64: 1, 4, 4, 32>}, {pipeline_mode = #tpu.pipeline_mode<synchronous>, transform_indices = @transform_1, window_bounds = array<i64: 9, 32, 32>}, {pipeline_mode = #tpu.pipeline_mode<synchronous>, transform_indices = @transform_2, window_bounds = array<i64: 1, 32>}, {transform_indices = @transform_3, window_bounds = array<i64: 1, 4, 4, 32>}]} {
    %cst = arith.constant 0.000000e+00 : bf16
    %0 = vector.broadcast %cst : bf16 to vector<6x6x32xbf16>
    %c0 = arith.constant 0 : index
    %c0_0 = arith.constant 0 : index
    %c0_1 = arith.constant 0 : index
    %1 = vector.load %arg5[%c0, %c0_0, %c0_1] : memref<6x6x32xbf16, #tpu.memory_space<vmem>>, vector<6x6x32xbf16>
    tpu.vector_store %arg5[%c0, %c0_0, %c0_1], %0 {strides = array<i32>} : memref<6x6x32xbf16, #tpu.memory_space<vmem>>, vector<6x6x32xbf16>,
    %c0_2 = arith.constant 0 : index
    %c0_3 = arith.constant 0 : index
    %c0_4 = arith.constant 0 : index
    %c0_5 = arith.constant 0 : index
    %2 = vector.load %arg1[%c0_2, %c0_3, %c0_4, %c0_5] : memref<1x4x4x32xbf16, #tpu.memory_space<vmem>>, vector<1x4x4x32xbf16>
    %3 = vector.shape_cast %2 : vector<1x4x4x32xbf16> to vector<4x4x32xbf16>
    %c1 = arith.constant 1 : index
    %c1_6 = arith.constant 1 : index
    %c0_7 = arith.constant 0 : index
    %4 = vector.load %arg5[%c1, %c1_6, %c0_7] : memref<6x6x32xbf16, #tpu.memory_space<vmem>>, vector<4x4x32xbf16>
    tpu.vector_store %arg5[%c1, %c1_6, %c0_7], %3 {strides = array<i32>} : memref<6x6x32xbf16, #tpu.memory_space<vmem>>, vector<4x4x32xbf16>,
    %cst_8 = arith.constant 0.000000e+00 : f32
    %5 = vector.broadcast %cst_8 : f32 to vector<16x32xf32>
    %c0_9 = arith.constant 0 : index
    %c0_10 = arith.constant 0 : index
    %c0_11 = arith.constant 0 : index
    %6 = vector.load %arg5[%c0_9, %c0_10, %c0_11] : memref<6x6x32xbf16, #tpu.memory_space<vmem>>, vector<4x4x32xbf16>
    %7 = vector.shape_cast %6 : vector<4x4x32xbf16> to vector<16x32xbf16>
    %c0_12 = arith.constant 0 : index
    %c0_13 = arith.constant 0 : index
    %c0_14 = arith.constant 0 : index
    %8 = vector.load %arg2[%c0_12, %c0_13, %c0_14] : memref<9x32x32xbf16, #tpu.memory_space<vmem>>, vector<1x32x32xbf16>
    %9 = vector.shape_cast %8 : vector<1x32x32xbf16> to vector<32x32xbf16>
    %cst_15 = arith.constant dense<0.000000e+00> : vector<16x32xf32>
    %10 = tpu.matmul %7, %9, %cst_15 {dimension_numbers = #tpu.dot_dimension_numbers<[1], [0], [0], [1], [0, 0, 1, 1], [], []>} : vector<16x32xbf16>, vector<32x32xbf16>, vector<16x32xf32> -> vector<16x32xf32>
    %11 = arith.addf %5, %10 : vector<16x32xf32>
    %c0_16 = arith.constant 0 : index
    %c1_17 = arith.constant 1 : index
    %c0_18 = arith.constant 0 : index
    %12 = vector.load %arg5[%c0_16, %c1_17, %c0_18] : memref<6x6x32xbf16, #tpu.memory_space<vmem>>, vector<4x4x32xbf16>
    %13 = vector.shape_cast %12 : vector<4x4x32xbf16> to vector<16x32xbf16>
    %c1_19 = arith.constant 1 : index
    %c0_20 = arith.constant 0 : index
    %c0_21 = arith.constant 0 : index
    %14 = vector.load %arg2[%c1_19, %c0_20, %c0_21] : memref<9x32x32xbf16, #tpu.memory_space<vmem>>, vector<1x32x32xbf16>
    %15 = vector.shape_cast %14 : vector<1x32x32xbf16> to vector<32x32xbf16>
    %cst_22 = arith.constant dense<0.000000e+00> : vector<16x32xf32>
    %16 = tpu.matmul %13, %15, %cst_22 {dimension_numbers = #tpu.dot_dimension_numbers<[1], [0], [0], [1], [0, 0, 1, 1], [], []>} : vector<16x32xbf16>, vector<32x32xbf16>, vector<16x32xf32> -> vector<16x32xf32>
    %17 = arith.addf %11, %16 : vector<16x32xf32>
    %c0_23 = arith.constant 0 : index
    %c2 = arith.constant 2 : index
    %c0_24 = arith.constant 0 : index
    %18 = vector.load %arg5[%c0_23, %c2, %c0_24] : memref<6x6x32xbf16, #tpu.memory_space<vmem>>, vector<4x4x32xbf16>
    %19 = vector.shape_cast %18 : vector<4x4x32xbf16> to vector<16x32xbf16>
    %c2_25 = arith.constant 2 : index
    %c0_26 = arith.constant 0 : index
    %c0_27 = arith.constant 0 : index
    %20 = vector.load %arg2[%c2_25, %c0_26, %c0_27] : memref<9x32x32xbf16, #tpu.memory_space<vmem>>, vector<1x32x32xbf16>
    %21 = vector.shape_cast %20 : vector<1x32x32xbf16> to vector<32x32xbf16>
    %cst_28 = arith.constant dense<0.000000e+00> : vector<16x32xf32>
    %22 = tpu.matmul %19, %21, %cst_28 {dimension_numbers = #tpu.dot_dimension_numbers<[1], [0], [0], [1], [0, 0, 1, 1], [], []>} : vector<16x32xbf16>, vector<32x32xbf16>, vector<16x32xf32> -> vector<16x32xf32>
    %23 = arith.addf %17, %22 : vector<16x32xf32>
    %c1_29 = arith.constant 1 : index
    %c0_30 = arith.constant 0 : index
    %c0_31 = arith.constant 0 : index
    %24 = vector.load %arg5[%c1_29, %c0_30, %c0_31] : memref<6x6x32xbf16, #tpu.memory_space<vmem>>, vector<4x4x32xbf16>
    %25 = vector.shape_cast %24 : vector<4x4x32xbf16> to vector<16x32xbf16>
    %c3 = arith.constant 3 : index
    %c0_32 = arith.constant 0 : index
    %c0_33 = arith.constant 0 : index
    %26 = vector.load %arg2[%c3, %c0_32, %c0_33] : memref<9x32x32xbf16, #tpu.memory_space<vmem>>, vector<1x32x32xbf16>
    %27 = vector.shape_cast %26 : vector<1x32x32xbf16> to vector<32x32xbf16>
    %cst_34 = arith.constant dense<0.000000e+00> : vector<16x32xf32>
    %28 = tpu.matmul %25, %27, %cst_34 {dimension_numbers = #tpu.dot_dimension_numbers<[1], [0], [0], [1], [0, 0, 1, 1], [], []>} : vector<16x32xbf16>, vector<32x32xbf16>, vector<16x32xf32> -> vector<16x32xf32>
    %29 = arith.addf %23, %28 : vector<16x32xf32>
    %c1_35 = arith.constant 1 : index
    %c1_36 = arith.constant 1 : index
    %c0_37 = arith.constant 0 : index
    %30 = vector.load %arg5[%c1_35, %c1_36, %c0_37] : memref<6x6x32xbf16, #tpu.memory_space<vmem>>, vector<4x4x32xbf16>
    %31 = vector.shape_cast %30 : vector<4x4x32xbf16> to vector<16x32xbf16>
    %c4 = arith.constant 4 : index
    %c0_38 = arith.constant 0 : index
    %c0_39 = arith.constant 0 : index
    %32 = vector.load %arg2[%c4, %c0_38, %c0_39] : memref<9x32x32xbf16, #tpu.memory_space<vmem>>, vector<1x32x32xbf16>
    %33 = vector.shape_cast %32 : vector<1x32x32xbf16> to vector<32x32xbf16>
    %cst_40 = arith.constant dense<0.000000e+00> : vector<16x32xf32>
    %34 = tpu.matmul %31, %33, %cst_40 {dimension_numbers = #tpu.dot_dimension_numbers<[1], [0], [0], [1], [0, 0, 1, 1], [], []>} : vector<16x32xbf16>, vector<32x32xbf16>, vector<16x32xf32> -> vector<16x32xf32>
    %35 = arith.addf %29, %34 : vector<16x32xf32>
    %c1_41 = arith.constant 1 : index
    %c2_42 = arith.constant 2 : index
    %c0_43 = arith.constant 0 : index
    %36 = vector.load %arg5[%c1_41, %c2_42, %c0_43] : memref<6x6x32xbf16, #tpu.memory_space<vmem>>, vector<4x4x32xbf16>
    %37 = vector.shape_cast %36 : vector<4x4x32xbf16> to vector<16x32xbf16>
    %c5 = arith.constant 5 : index
    %c0_44 = arith.constant 0 : index
    %c0_45 = arith.constant 0 : index
    %38 = vector.load %arg2[%c5, %c0_44, %c0_45] : memref<9x32x32xbf16, #tpu.memory_space<vmem>>, vector<1x32x32xbf16>
    %39 = vector.shape_cast %38 : vector<1x32x32xbf16> to vector<32x32xbf16>
    %cst_46 = arith.constant dense<0.000000e+00> : vector<16x32xf32>
    %40 = tpu.matmul %37, %39, %cst_46 {dimension_numbers = #tpu.dot_dimension_numbers<[1], [0], [0], [1], [0, 0, 1, 1], [], []>} : vector<16x32xbf16>, vector<32x32xbf16>, vector<16x32xf32> -> vector<16x32xf32>
    %41 = arith.addf %35, %40 : vector<16x32xf32>
    %c2_47 = arith.constant 2 : index
    %c0_48 = arith.constant 0 : index
    %c0_49 = arith.constant 0 : index
    %42 = vector.load %arg5[%c2_47, %c0_48, %c0_49] : memref<6x6x32xbf16, #tpu.memory_space<vmem>>, vector<4x4x32xbf16>
    %43 = vector.shape_cast %42 : vector<4x4x32xbf16> to vector<16x32xbf16>
    %c6 = arith.constant 6 : index
    %c0_50 = arith.constant 0 : index
    %c0_51 = arith.constant 0 : index
    %44 = vector.load %arg2[%c6, %c0_50, %c0_51] : memref<9x32x32xbf16, #tpu.memory_space<vmem>>, vector<1x32x32xbf16>
    %45 = vector.shape_cast %44 : vector<1x32x32xbf16> to vector<32x32xbf16>
    %cst_52 = arith.constant dense<0.000000e+00> : vector<16x32xf32>
    %46 = tpu.matmul %43, %45, %cst_52 {dimension_numbers = #tpu.dot_dimension_numbers<[1], [0], [0], [1], [0, 0, 1, 1], [], []>} : vector<16x32xbf16>, vector<32x32xbf16>, vector<16x32xf32> -> vector<16x32xf32>
    %47 = arith.addf %41, %46 : vector<16x32xf32>
    %c2_53 = arith.constant 2 : index
    %c1_54 = arith.constant 1 : index
    %c0_55 = arith.constant 0 : index
    %48 = vector.load %arg5[%c2_53, %c1_54, %c0_55] : memref<6x6x32xbf16, #tpu.memory_space<vmem>>, vector<4x4x32xbf16>
    %49 = vector.shape_cast %48 : vector<4x4x32xbf16> to vector<16x32xbf16>
    %c7 = arith.constant 7 : index
    %c0_56 = arith.constant 0 : index
    %c0_57 = arith.constant 0 : index
    %50 = vector.load %arg2[%c7, %c0_56, %c0_57] : memref<9x32x32xbf16, #tpu.memory_space<vmem>>, vector<1x32x32xbf16>
    %51 = vector.shape_cast %50 : vector<1x32x32xbf16> to vector<32x32xbf16>
    %cst_58 = arith.constant dense<0.000000e+00> : vector<16x32xf32>
    %52 = tpu.matmul %49, %51, %cst_58 {dimension_numbers = #tpu.dot_dimension_numbers<[1], [0], [0], [1], [0, 0, 1, 1], [], []>} : vector<16x32xbf16>, vector<32x32xbf16>, vector<16x32xf32> -> vector<16x32xf32>
    %53 = arith.addf %47, %52 : vector<16x32xf32>
    %c2_59 = arith.constant 2 : index
    %c2_60 = arith.constant 2 : index
    %c0_61 = arith.constant 0 : index
    %54 = vector.load %arg5[%c2_59, %c2_60, %c0_61] : memref<6x6x32xbf16, #tpu.memory_space<vmem>>, vector<4x4x32xbf16>
    %55 = vector.shape_cast %54 : vector<4x4x32xbf16> to vector<16x32xbf16>
    %c8 = arith.constant 8 : index
    %c0_62 = arith.constant 0 : index
    %c0_63 = arith.constant 0 : index
    %56 = vector.load %arg2[%c8, %c0_62, %c0_63] : memref<9x32x32xbf16, #tpu.memory_space<vmem>>, vector<1x32x32xbf16>
    %57 = vector.shape_cast %56 : vector<1x32x32xbf16> to vector<32x32xbf16>
    %cst_64 = arith.constant dense<0.000000e+00> : vector<16x32xf32>
    %58 = tpu.matmul %55, %57, %cst_64 {dimension_numbers = #tpu.dot_dimension_numbers<[1], [0], [0], [1], [0, 0, 1, 1], [], []>} : vector<16x32xbf16>, vector<32x32xbf16>, vector<16x32xf32> -> vector<16x32xf32>
    %59 = arith.addf %53, %58 : vector<16x32xf32>
    %c0_65 = arith.constant 0 : index
    %c0_66 = arith.constant 0 : index
    %60 = vector.load %arg3[%c0_65, %c0_66] : memref<1x32xf32, #tpu.memory_space<vmem>>, vector<1x32xf32>
    %61 = vector.broadcast %60 : vector<1x32xf32> to vector<16x32xf32>
    %62 = arith.addf %59, %61 : vector<16x32xf32>
    %63 = vector.shape_cast %62 : vector<16x32xf32> to vector<4x4x32xf32>
    %64 = arith.truncf %63 : vector<4x4x32xf32> to vector<4x4x32xbf16>
    %c0_67 = arith.constant 0 : index
    %c0_68 = arith.constant 0 : index
    %c0_69 = arith.constant 0 : index
    %c0_70 = arith.constant 0 : index
    %65 = vector.load %arg4[%c0_67, %c0_68, %c0_69, %c0_70] : memref<1x4x4x32xbf16, #tpu.memory_space<vmem>>, vector<1x4x4x32xbf16>
    %66 = vector.shape_cast %65 : vector<1x4x4x32xbf16> to vector<4x4x32xbf16>
    %67 = vector.shape_cast %64 : vector<4x4x32xbf16> to vector<1x4x4x32xbf16>
    tpu.vector_store %arg4[%c0_67, %c0_68, %c0_69, %c0_70], %67 {strides = array<i32>} : memref<1x4x4x32xbf16, #tpu.memory_space<vmem>>, vector<1x4x4x32xbf16>,
    return
  }
  func.func @transform_0(%arg0: i32) -> (i32, i32, i32, i32) {
    %c0_i32 = arith.constant 0 : i32
    %c0_i32_0 = arith.constant 0 : i32
    %c0_i32_1 = arith.constant 0 : i32
    %c0_i32_2 = arith.constant 0 : i32
    return %arg0, %c0_i32, %c0_i32_0, %c0_i32_1 : i32, i32, i32, i32
  }
  func.func @transform_1(%arg0: i32) -> (i32, i32, i32) {
    %c0_i32 = arith.constant 0 : i32
    %c0_i32_0 = arith.constant 0 : i32
    %c0_i32_1 = arith.constant 0 : i32
    %c0_i32_2 = arith.constant 0 : i32
    return %c0_i32, %c0_i32_0, %c0_i32_1 : i32, i32, i32
  }
  func.func @transform_2(%arg0: i32) -> (i32, i32) {
    %c0_i32 = arith.constant 0 : i32
    %c0_i32_0 = arith.constant 0 : i32
    %c0_i32_1 = arith.constant 0 : i32
    return %c0_i32, %c0_i32_0 : i32, i32
  }
  func.func @transform_3(%arg0: i32) -> (i32, i32, i32, i32) {
    %c0_i32 = arith.constant 0 : i32
    %c0_i32_0 = arith.constant 0 : i32
    %c0_i32_1 = arith.constant 0 : i32
    %c0_i32_2 = arith.constant 0 : i32
    return %arg0, %c0_i32, %c0_i32_0, %c0_i32_1 : i32, i32, i32, i32
  }
}

module attributes {stable_mosaic.version = 11 : i64} {
  func.func @_conv_s2_kernel(%arg0: i32, %arg1: memref<1x5x2x5x32xbf16, #tpu.memory_space<vmem>>, %arg2: memref<8x32x32xbf16, #tpu.memory_space<vmem>>, %arg3: memref<1x32xf32, #tpu.memory_space<vmem>>, %arg4: memref<1x4x4x32xbf16, #tpu.memory_space<vmem>>) attributes {dimension_semantics = [#tpu.dimension_semantics<parallel>], iteration_bounds = array<i64: 2>, scalar_prefetch = 0 : i64, scratch_operands = 0 : i64, tpu.core_type = #tpu.core_type<tc>, window_params = [{transform_indices = @transform_0, window_bounds = array<i64: 1, 5, 2, 5, 32>}, {pipeline_mode = #tpu.pipeline_mode<synchronous>, transform_indices = @transform_1, window_bounds = array<i64: 8, 32, 32>}, {pipeline_mode = #tpu.pipeline_mode<synchronous>, transform_indices = @transform_2, window_bounds = array<i64: 1, 32>}, {transform_indices = @transform_3, window_bounds = array<i64: 1, 4, 4, 32>}]} {
    %cst = arith.constant 0.000000e+00 : f32
    %0 = vector.broadcast %cst : f32 to vector<16x32xf32>
    %c0 = arith.constant 0 : index
    %c0_0 = arith.constant 0 : index
    %c0_1 = arith.constant 0 : index
    %c0_2 = arith.constant 0 : index
    %c0_3 = arith.constant 0 : index
    %1 = vector.load %arg1[%c0, %c0_0, %c0_1, %c0_2, %c0_3] : memref<1x5x2x5x32xbf16, #tpu.memory_space<vmem>>, vector<1x4x1x4x32xbf16>
    %2 = vector.shape_cast %1 : vector<1x4x1x4x32xbf16> to vector<4x4x32xbf16>
    %3 = vector.shape_cast %2 : vector<4x4x32xbf16> to vector<16x32xbf16>
    %c0_4 = arith.constant 0 : index
    %c0_5 = arith.constant 0 : index
    %c0_6 = arith.constant 0 : index
    %4 = vector.load %arg2[%c0_4, %c0_5, %c0_6] : memref<8x32x32xbf16, #tpu.memory_space<vmem>>, vector<1x32x32xbf16>
    %5 = vector.shape_cast %4 : vector<1x32x32xbf16> to vector<32x32xbf16>
    %cst_7 = arith.constant dense<0.000000e+00> : vector<16x32xf32>
    %6 = tpu.matmul %3, %5, %cst_7 {dimension_numbers = #tpu.dot_dimension_numbers<[1], [0], [0], [1], [0, 0, 1, 1], [], []>} : vector<16x32xbf16>, vector<32x32xbf16>, vector<16x32xf32> -> vector<16x32xf32>
    %7 = arith.addf %0, %6 : vector<16x32xf32>
    %c0_8 = arith.constant 0 : index
    %c0_9 = arith.constant 0 : index
    %c0_10 = arith.constant 0 : index
    %c1 = arith.constant 1 : index
    %c0_11 = arith.constant 0 : index
    %8 = vector.load %arg1[%c0_8, %c0_9, %c0_10, %c1, %c0_11] : memref<1x5x2x5x32xbf16, #tpu.memory_space<vmem>>, vector<1x4x1x4x32xbf16>
    %9 = vector.shape_cast %8 : vector<1x4x1x4x32xbf16> to vector<4x4x32xbf16>
    %10 = vector.shape_cast %9 : vector<4x4x32xbf16> to vector<16x32xbf16>
    %c1_12 = arith.constant 1 : index
    %c0_13 = arith.constant 0 : index
    %c0_14 = arith.constant 0 : index
    %11 = vector.load %arg2[%c1_12, %c0_13, %c0_14] : memref<8x32x32xbf16, #tpu.memory_space<vmem>>, vector<1x32x32xbf16>
    %12 = vector.shape_cast %11 : vector<1x32x32xbf16> to vector<32x32xbf16>
    %cst_15 = arith.constant dense<0.000000e+00> : vector<16x32xf32>
    %13 = tpu.matmul %10, %12, %cst_15 {dimension_numbers = #tpu.dot_dimension_numbers<[1], [0], [0], [1], [0, 0, 1, 1], [], []>} : vector<16x32xbf16>, vector<32x32xbf16>, vector<16x32xf32> -> vector<16x32xf32>
    %14 = arith.addf %7, %13 : vector<16x32xf32>
    %c0_16 = arith.constant 0 : index
    %c0_17 = arith.constant 0 : index
    %c1_18 = arith.constant 1 : index
    %c0_19 = arith.constant 0 : index
    %c0_20 = arith.constant 0 : index
    %15 = vector.load %arg1[%c0_16, %c0_17, %c1_18, %c0_19, %c0_20] : memref<1x5x2x5x32xbf16, #tpu.memory_space<vmem>>, vector<1x4x1x4x32xbf16>
    %16 = vector.shape_cast %15 : vector<1x4x1x4x32xbf16> to vector<4x4x32xbf16>
    %17 = vector.shape_cast %16 : vector<4x4x32xbf16> to vector<16x32xbf16>
    %c2 = arith.constant 2 : index
    %c0_21 = arith.constant 0 : index
    %c0_22 = arith.constant 0 : index
    %18 = vector.load %arg2[%c2, %c0_21, %c0_22] : memref<8x32x32xbf16, #tpu.memory_space<vmem>>, vector<1x32x32xbf16>
    %19 = vector.shape_cast %18 : vector<1x32x32xbf16> to vector<32x32xbf16>
    %cst_23 = arith.constant dense<0.000000e+00> : vector<16x32xf32>
    %20 = tpu.matmul %17, %19, %cst_23 {dimension_numbers = #tpu.dot_dimension_numbers<[1], [0], [0], [1], [0, 0, 1, 1], [], []>} : vector<16x32xbf16>, vector<32x32xbf16>, vector<16x32xf32> -> vector<16x32xf32>
    %21 = arith.addf %14, %20 : vector<16x32xf32>
    %c0_24 = arith.constant 0 : index
    %c0_25 = arith.constant 0 : index
    %c1_26 = arith.constant 1 : index
    %c1_27 = arith.constant 1 : index
    %c0_28 = arith.constant 0 : index
    %22 = vector.load %arg1[%c0_24, %c0_25, %c1_26, %c1_27, %c0_28] : memref<1x5x2x5x32xbf16, #tpu.memory_space<vmem>>, vector<1x4x1x4x32xbf16>
    %23 = vector.shape_cast %22 : vector<1x4x1x4x32xbf16> to vector<4x4x32xbf16>
    %24 = vector.shape_cast %23 : vector<4x4x32xbf16> to vector<16x32xbf16>
    %c3 = arith.constant 3 : index
    %c0_29 = arith.constant 0 : index
    %c0_30 = arith.constant 0 : index
    %25 = vector.load %arg2[%c3, %c0_29, %c0_30] : memref<8x32x32xbf16, #tpu.memory_space<vmem>>, vector<1x32x32xbf16>
    %26 = vector.shape_cast %25 : vector<1x32x32xbf16> to vector<32x32xbf16>
    %cst_31 = arith.constant dense<0.000000e+00> : vector<16x32xf32>
    %27 = tpu.matmul %24, %26, %cst_31 {dimension_numbers = #tpu.dot_dimension_numbers<[1], [0], [0], [1], [0, 0, 1, 1], [], []>} : vector<16x32xbf16>, vector<32x32xbf16>, vector<16x32xf32> -> vector<16x32xf32>
    %28 = arith.addf %21, %27 : vector<16x32xf32>
    %c0_32 = arith.constant 0 : index
    %c1_33 = arith.constant 1 : index
    %c0_34 = arith.constant 0 : index
    %c0_35 = arith.constant 0 : index
    %c0_36 = arith.constant 0 : index
    %29 = vector.load %arg1[%c0_32, %c1_33, %c0_34, %c0_35, %c0_36] : memref<1x5x2x5x32xbf16, #tpu.memory_space<vmem>>, vector<1x4x1x4x32xbf16>
    %30 = vector.shape_cast %29 : vector<1x4x1x4x32xbf16> to vector<4x4x32xbf16>
    %31 = vector.shape_cast %30 : vector<4x4x32xbf16> to vector<16x32xbf16>
    %c4 = arith.constant 4 : index
    %c0_37 = arith.constant 0 : index
    %c0_38 = arith.constant 0 : index
    %32 = vector.load %arg2[%c4, %c0_37, %c0_38] : memref<8x32x32xbf16, #tpu.memory_space<vmem>>, vector<1x32x32xbf16>
    %33 = vector.shape_cast %32 : vector<1x32x32xbf16> to vector<32x32xbf16>
    %cst_39 = arith.constant dense<0.000000e+00> : vector<16x32xf32>
    %34 = tpu.matmul %31, %33, %cst_39 {dimension_numbers = #tpu.dot_dimension_numbers<[1], [0], [0], [1], [0, 0, 1, 1], [], []>} : vector<16x32xbf16>, vector<32x32xbf16>, vector<16x32xf32> -> vector<16x32xf32>
    %35 = arith.addf %28, %34 : vector<16x32xf32>
    %c0_40 = arith.constant 0 : index
    %c1_41 = arith.constant 1 : index
    %c0_42 = arith.constant 0 : index
    %c1_43 = arith.constant 1 : index
    %c0_44 = arith.constant 0 : index
    %36 = vector.load %arg1[%c0_40, %c1_41, %c0_42, %c1_43, %c0_44] : memref<1x5x2x5x32xbf16, #tpu.memory_space<vmem>>, vector<1x4x1x4x32xbf16>
    %37 = vector.shape_cast %36 : vector<1x4x1x4x32xbf16> to vector<4x4x32xbf16>
    %38 = vector.shape_cast %37 : vector<4x4x32xbf16> to vector<16x32xbf16>
    %c5 = arith.constant 5 : index
    %c0_45 = arith.constant 0 : index
    %c0_46 = arith.constant 0 : index
    %39 = vector.load %arg2[%c5, %c0_45, %c0_46] : memref<8x32x32xbf16, #tpu.memory_space<vmem>>, vector<1x32x32xbf16>
    %40 = vector.shape_cast %39 : vector<1x32x32xbf16> to vector<32x32xbf16>
    %cst_47 = arith.constant dense<0.000000e+00> : vector<16x32xf32>
    %41 = tpu.matmul %38, %40, %cst_47 {dimension_numbers = #tpu.dot_dimension_numbers<[1], [0], [0], [1], [0, 0, 1, 1], [], []>} : vector<16x32xbf16>, vector<32x32xbf16>, vector<16x32xf32> -> vector<16x32xf32>
    %42 = arith.addf %35, %41 : vector<16x32xf32>
    %c0_48 = arith.constant 0 : index
    %c1_49 = arith.constant 1 : index
    %c1_50 = arith.constant 1 : index
    %c0_51 = arith.constant 0 : index
    %c0_52 = arith.constant 0 : index
    %43 = vector.load %arg1[%c0_48, %c1_49, %c1_50, %c0_51, %c0_52] : memref<1x5x2x5x32xbf16, #tpu.memory_space<vmem>>, vector<1x4x1x4x32xbf16>
    %44 = vector.shape_cast %43 : vector<1x4x1x4x32xbf16> to vector<4x4x32xbf16>
    %45 = vector.shape_cast %44 : vector<4x4x32xbf16> to vector<16x32xbf16>
    %c6 = arith.constant 6 : index
    %c0_53 = arith.constant 0 : index
    %c0_54 = arith.constant 0 : index
    %46 = vector.load %arg2[%c6, %c0_53, %c0_54] : memref<8x32x32xbf16, #tpu.memory_space<vmem>>, vector<1x32x32xbf16>
    %47 = vector.shape_cast %46 : vector<1x32x32xbf16> to vector<32x32xbf16>
    %cst_55 = arith.constant dense<0.000000e+00> : vector<16x32xf32>
    %48 = tpu.matmul %45, %47, %cst_55 {dimension_numbers = #tpu.dot_dimension_numbers<[1], [0], [0], [1], [0, 0, 1, 1], [], []>} : vector<16x32xbf16>, vector<32x32xbf16>, vector<16x32xf32> -> vector<16x32xf32>
    %49 = arith.addf %42, %48 : vector<16x32xf32>
    %c0_56 = arith.constant 0 : index
    %c1_57 = arith.constant 1 : index
    %c1_58 = arith.constant 1 : index
    %c1_59 = arith.constant 1 : index
    %c0_60 = arith.constant 0 : index
    %50 = vector.load %arg1[%c0_56, %c1_57, %c1_58, %c1_59, %c0_60] : memref<1x5x2x5x32xbf16, #tpu.memory_space<vmem>>, vector<1x4x1x4x32xbf16>
    %51 = vector.shape_cast %50 : vector<1x4x1x4x32xbf16> to vector<4x4x32xbf16>
    %52 = vector.shape_cast %51 : vector<4x4x32xbf16> to vector<16x32xbf16>
    %c7 = arith.constant 7 : index
    %c0_61 = arith.constant 0 : index
    %c0_62 = arith.constant 0 : index
    %53 = vector.load %arg2[%c7, %c0_61, %c0_62] : memref<8x32x32xbf16, #tpu.memory_space<vmem>>, vector<1x32x32xbf16>
    %54 = vector.shape_cast %53 : vector<1x32x32xbf16> to vector<32x32xbf16>
    %cst_63 = arith.constant dense<0.000000e+00> : vector<16x32xf32>
    %55 = tpu.matmul %52, %54, %cst_63 {dimension_numbers = #tpu.dot_dimension_numbers<[1], [0], [0], [1], [0, 0, 1, 1], [], []>} : vector<16x32xbf16>, vector<32x32xbf16>, vector<16x32xf32> -> vector<16x32xf32>
    %56 = arith.addf %49, %55 : vector<16x32xf32>
    %c0_64 = arith.constant 0 : index
    %c0_65 = arith.constant 0 : index
    %57 = vector.load %arg3[%c0_64, %c0_65] : memref<1x32xf32, #tpu.memory_space<vmem>>, vector<1x32xf32>
    %58 = vector.broadcast %57 : vector<1x32xf32> to vector<16x32xf32>
    %59 = arith.addf %56, %58 : vector<16x32xf32>
    %cst_66 = arith.constant 0.000000e+00 : f32
    %60 = vector.broadcast %cst_66 : f32 to vector<16x32xf32>
    %61 = arith.maximumf %59, %60 : vector<16x32xf32>
    %62 = vector.shape_cast %61 : vector<16x32xf32> to vector<4x4x32xf32>
    %63 = arith.truncf %62 : vector<4x4x32xf32> to vector<4x4x32xbf16>
    %c0_67 = arith.constant 0 : index
    %c0_68 = arith.constant 0 : index
    %c0_69 = arith.constant 0 : index
    %c0_70 = arith.constant 0 : index
    %64 = vector.load %arg4[%c0_67, %c0_68, %c0_69, %c0_70] : memref<1x4x4x32xbf16, #tpu.memory_space<vmem>>, vector<1x4x4x32xbf16>
    %65 = vector.shape_cast %64 : vector<1x4x4x32xbf16> to vector<4x4x32xbf16>
    %66 = vector.shape_cast %63 : vector<4x4x32xbf16> to vector<1x4x4x32xbf16>
    tpu.vector_store %arg4[%c0_67, %c0_68, %c0_69, %c0_70], %66 {strides = array<i32>} : memref<1x4x4x32xbf16, #tpu.memory_space<vmem>>, vector<1x4x4x32xbf16>,
    return
  }
  func.func @transform_0(%arg0: i32) -> (i32, i32, i32, i32, i32) {
    %c0_i32 = arith.constant 0 : i32
    %c0_i32_0 = arith.constant 0 : i32
    %c0_i32_1 = arith.constant 0 : i32
    %c0_i32_2 = arith.constant 0 : i32
    %c0_i32_3 = arith.constant 0 : i32
    return %arg0, %c0_i32, %c0_i32_0, %c0_i32_1, %c0_i32_2 : i32, i32, i32, i32, i32
  }
  func.func @transform_1(%arg0: i32) -> (i32, i32, i32) {
    %c0_i32 = arith.constant 0 : i32
    %c0_i32_0 = arith.constant 0 : i32
    %c0_i32_1 = arith.constant 0 : i32
    %c0_i32_2 = arith.constant 0 : i32
    return %c0_i32, %c0_i32_0, %c0_i32_1 : i32, i32, i32
  }
  func.func @transform_2(%arg0: i32) -> (i32, i32) {
    %c0_i32 = arith.constant 0 : i32
    %c0_i32_0 = arith.constant 0 : i32
    %c0_i32_1 = arith.constant 0 : i32
    return %c0_i32, %c0_i32_0 : i32, i32
  }
  func.func @transform_3(%arg0: i32) -> (i32, i32, i32, i32) {
    %c0_i32 = arith.constant 0 : i32
    %c0_i32_0 = arith.constant 0 : i32
    %c0_i32_1 = arith.constant 0 : i32
    %c0_i32_2 = arith.constant 0 : i32
    return %arg0, %c0_i32, %c0_i32_0, %c0_i32_1 : i32, i32, i32, i32
  }
}

module attributes {stable_mosaic.version = 11 : i64} {
  func.func @_resblock_kernel(%arg0: i32, %arg1: memref<1x4x4x32xbf16, #tpu.memory_space<vmem>>, %arg2: memref<9x32x8xbf16, #tpu.memory_space<vmem>>, %arg3: memref<1x8xf32, #tpu.memory_space<vmem>>, %arg4: memref<8x32xbf16, #tpu.memory_space<vmem>>, %arg5: memref<1x32xf32, #tpu.memory_space<vmem>>, %arg6: memref<1x4x4x32xbf16, #tpu.memory_space<vmem>>, %arg7: memref<6x6x32xbf16, #tpu.memory_space<vmem>>) attributes {dimension_semantics = [#tpu.dimension_semantics<parallel>], iteration_bounds = array<i64: 2>, scalar_prefetch = 0 : i64, scratch_operands = 1 : i64, tpu.core_type = #tpu.core_type<tc>, window_params = [{transform_indices = @transform_0, window_bounds = array<i64: 1, 4, 4, 32>}, {pipeline_mode = #tpu.pipeline_mode<synchronous>, transform_indices = @transform_1, window_bounds = array<i64: 9, 32, 8>}, {pipeline_mode = #tpu.pipeline_mode<synchronous>, transform_indices = @transform_2, window_bounds = array<i64: 1, 8>}, {pipeline_mode = #tpu.pipeline_mode<synchronous>, transform_indices = @transform_3, window_bounds = array<i64: 8, 32>}, {pipeline_mode = #tpu.pipeline_mode<synchronous>, transform_indices = @transform_4, window_bounds = array<i64: 1, 32>}, {transform_indices = @transform_5, window_bounds = array<i64: 1, 4, 4, 32>}]} {
    %c0 = arith.constant 0 : index
    %c0_0 = arith.constant 0 : index
    %c0_1 = arith.constant 0 : index
    %c0_2 = arith.constant 0 : index
    %0 = vector.load %arg1[%c0, %c0_0, %c0_1, %c0_2] : memref<1x4x4x32xbf16, #tpu.memory_space<vmem>>, vector<1x4x4x32xbf16>
    %1 = vector.shape_cast %0 : vector<1x4x4x32xbf16> to vector<4x4x32xbf16>
    %cst = arith.constant 0.000000e+00 : bf16
    %2 = vector.broadcast %cst : bf16 to vector<6x6x32xbf16>
    %c0_3 = arith.constant 0 : index
    %c0_4 = arith.constant 0 : index
    %c0_5 = arith.constant 0 : index
    %3 = vector.load %arg7[%c0_3, %c0_4, %c0_5] : memref<6x6x32xbf16, #tpu.memory_space<vmem>>, vector<6x6x32xbf16>
    tpu.vector_store %arg7[%c0_3, %c0_4, %c0_5], %2 {strides = array<i32>} : memref<6x6x32xbf16, #tpu.memory_space<vmem>>, vector<6x6x32xbf16>,
    %cst_6 = arith.constant 0.000000e+00 : bf16
    %4 = vector.broadcast %cst_6 : bf16 to vector<4x4x32xbf16>
    %5 = arith.maximumf %1, %4 : vector<4x4x32xbf16>
    %c1 = arith.constant 1 : index
    %c1_7 = arith.constant 1 : index
    %c0_8 = arith.constant 0 : index
    %6 = vector.load %arg7[%c1, %c1_7, %c0_8] : memref<6x6x32xbf16, #tpu.memory_space<vmem>>, vector<4x4x32xbf16>
    tpu.vector_store %arg7[%c1, %c1_7, %c0_8], %5 {strides = array<i32>} : memref<6x6x32xbf16, #tpu.memory_space<vmem>>, vector<4x4x32xbf16>,
    %cst_9 = arith.constant 0.000000e+00 : f32
    %7 = vector.broadcast %cst_9 : f32 to vector<16x8xf32>
    %c0_10 = arith.constant 0 : index
    %c0_11 = arith.constant 0 : index
    %c0_12 = arith.constant 0 : index
    %8 = vector.load %arg7[%c0_10, %c0_11, %c0_12] : memref<6x6x32xbf16, #tpu.memory_space<vmem>>, vector<4x4x32xbf16>
    %9 = vector.shape_cast %8 : vector<4x4x32xbf16> to vector<16x32xbf16>
    %c0_13 = arith.constant 0 : index
    %c0_14 = arith.constant 0 : index
    %c0_15 = arith.constant 0 : index
    %10 = vector.load %arg2[%c0_13, %c0_14, %c0_15] : memref<9x32x8xbf16, #tpu.memory_space<vmem>>, vector<1x32x8xbf16>
    %11 = vector.shape_cast %10 : vector<1x32x8xbf16> to vector<32x8xbf16>
    %cst_16 = arith.constant dense<0.000000e+00> : vector<16x8xf32>
    %12 = tpu.matmul %9, %11, %cst_16 {dimension_numbers = #tpu.dot_dimension_numbers<[1], [0], [0], [1], [0, 0, 1, 1], [], []>} : vector<16x32xbf16>, vector<32x8xbf16>, vector<16x8xf32> -> vector<16x8xf32>
    %13 = arith.addf %7, %12 : vector<16x8xf32>
    %c0_17 = arith.constant 0 : index
    %c1_18 = arith.constant 1 : index
    %c0_19 = arith.constant 0 : index
    %14 = vector.load %arg7[%c0_17, %c1_18, %c0_19] : memref<6x6x32xbf16, #tpu.memory_space<vmem>>, vector<4x4x32xbf16>
    %15 = vector.shape_cast %14 : vector<4x4x32xbf16> to vector<16x32xbf16>
    %c1_20 = arith.constant 1 : index
    %c0_21 = arith.constant 0 : index
    %c0_22 = arith.constant 0 : index
    %16 = vector.load %arg2[%c1_20, %c0_21, %c0_22] : memref<9x32x8xbf16, #tpu.memory_space<vmem>>, vector<1x32x8xbf16>
    %17 = vector.shape_cast %16 : vector<1x32x8xbf16> to vector<32x8xbf16>
    %cst_23 = arith.constant dense<0.000000e+00> : vector<16x8xf32>
    %18 = tpu.matmul %15, %17, %cst_23 {dimension_numbers = #tpu.dot_dimension_numbers<[1], [0], [0], [1], [0, 0, 1, 1], [], []>} : vector<16x32xbf16>, vector<32x8xbf16>, vector<16x8xf32> -> vector<16x8xf32>
    %19 = arith.addf %13, %18 : vector<16x8xf32>
    %c0_24 = arith.constant 0 : index
    %c2 = arith.constant 2 : index
    %c0_25 = arith.constant 0 : index
    %20 = vector.load %arg7[%c0_24, %c2, %c0_25] : memref<6x6x32xbf16, #tpu.memory_space<vmem>>, vector<4x4x32xbf16>
    %21 = vector.shape_cast %20 : vector<4x4x32xbf16> to vector<16x32xbf16>
    %c2_26 = arith.constant 2 : index
    %c0_27 = arith.constant 0 : index
    %c0_28 = arith.constant 0 : index
    %22 = vector.load %arg2[%c2_26, %c0_27, %c0_28] : memref<9x32x8xbf16, #tpu.memory_space<vmem>>, vector<1x32x8xbf16>
    %23 = vector.shape_cast %22 : vector<1x32x8xbf16> to vector<32x8xbf16>
    %cst_29 = arith.constant dense<0.000000e+00> : vector<16x8xf32>
    %24 = tpu.matmul %21, %23, %cst_29 {dimension_numbers = #tpu.dot_dimension_numbers<[1], [0], [0], [1], [0, 0, 1, 1], [], []>} : vector<16x32xbf16>, vector<32x8xbf16>, vector<16x8xf32> -> vector<16x8xf32>
    %25 = arith.addf %19, %24 : vector<16x8xf32>
    %c1_30 = arith.constant 1 : index
    %c0_31 = arith.constant 0 : index
    %c0_32 = arith.constant 0 : index
    %26 = vector.load %arg7[%c1_30, %c0_31, %c0_32] : memref<6x6x32xbf16, #tpu.memory_space<vmem>>, vector<4x4x32xbf16>
    %27 = vector.shape_cast %26 : vector<4x4x32xbf16> to vector<16x32xbf16>
    %c3 = arith.constant 3 : index
    %c0_33 = arith.constant 0 : index
    %c0_34 = arith.constant 0 : index
    %28 = vector.load %arg2[%c3, %c0_33, %c0_34] : memref<9x32x8xbf16, #tpu.memory_space<vmem>>, vector<1x32x8xbf16>
    %29 = vector.shape_cast %28 : vector<1x32x8xbf16> to vector<32x8xbf16>
    %cst_35 = arith.constant dense<0.000000e+00> : vector<16x8xf32>
    %30 = tpu.matmul %27, %29, %cst_35 {dimension_numbers = #tpu.dot_dimension_numbers<[1], [0], [0], [1], [0, 0, 1, 1], [], []>} : vector<16x32xbf16>, vector<32x8xbf16>, vector<16x8xf32> -> vector<16x8xf32>
    %31 = arith.addf %25, %30 : vector<16x8xf32>
    %c1_36 = arith.constant 1 : index
    %c1_37 = arith.constant 1 : index
    %c0_38 = arith.constant 0 : index
    %32 = vector.load %arg7[%c1_36, %c1_37, %c0_38] : memref<6x6x32xbf16, #tpu.memory_space<vmem>>, vector<4x4x32xbf16>
    %33 = vector.shape_cast %32 : vector<4x4x32xbf16> to vector<16x32xbf16>
    %c4 = arith.constant 4 : index
    %c0_39 = arith.constant 0 : index
    %c0_40 = arith.constant 0 : index
    %34 = vector.load %arg2[%c4, %c0_39, %c0_40] : memref<9x32x8xbf16, #tpu.memory_space<vmem>>, vector<1x32x8xbf16>
    %35 = vector.shape_cast %34 : vector<1x32x8xbf16> to vector<32x8xbf16>
    %cst_41 = arith.constant dense<0.000000e+00> : vector<16x8xf32>
    %36 = tpu.matmul %33, %35, %cst_41 {dimension_numbers = #tpu.dot_dimension_numbers<[1], [0], [0], [1], [0, 0, 1, 1], [], []>} : vector<16x32xbf16>, vector<32x8xbf16>, vector<16x8xf32> -> vector<16x8xf32>
    %37 = arith.addf %31, %36 : vector<16x8xf32>
    %c1_42 = arith.constant 1 : index
    %c2_43 = arith.constant 2 : index
    %c0_44 = arith.constant 0 : index
    %38 = vector.load %arg7[%c1_42, %c2_43, %c0_44] : memref<6x6x32xbf16, #tpu.memory_space<vmem>>, vector<4x4x32xbf16>
    %39 = vector.shape_cast %38 : vector<4x4x32xbf16> to vector<16x32xbf16>
    %c5 = arith.constant 5 : index
    %c0_45 = arith.constant 0 : index
    %c0_46 = arith.constant 0 : index
    %40 = vector.load %arg2[%c5, %c0_45, %c0_46] : memref<9x32x8xbf16, #tpu.memory_space<vmem>>, vector<1x32x8xbf16>
    %41 = vector.shape_cast %40 : vector<1x32x8xbf16> to vector<32x8xbf16>
    %cst_47 = arith.constant dense<0.000000e+00> : vector<16x8xf32>
    %42 = tpu.matmul %39, %41, %cst_47 {dimension_numbers = #tpu.dot_dimension_numbers<[1], [0], [0], [1], [0, 0, 1, 1], [], []>} : vector<16x32xbf16>, vector<32x8xbf16>, vector<16x8xf32> -> vector<16x8xf32>
    %43 = arith.addf %37, %42 : vector<16x8xf32>
    %c2_48 = arith.constant 2 : index
    %c0_49 = arith.constant 0 : index
    %c0_50 = arith.constant 0 : index
    %44 = vector.load %arg7[%c2_48, %c0_49, %c0_50] : memref<6x6x32xbf16, #tpu.memory_space<vmem>>, vector<4x4x32xbf16>
    %45 = vector.shape_cast %44 : vector<4x4x32xbf16> to vector<16x32xbf16>
    %c6 = arith.constant 6 : index
    %c0_51 = arith.constant 0 : index
    %c0_52 = arith.constant 0 : index
    %46 = vector.load %arg2[%c6, %c0_51, %c0_52] : memref<9x32x8xbf16, #tpu.memory_space<vmem>>, vector<1x32x8xbf16>
    %47 = vector.shape_cast %46 : vector<1x32x8xbf16> to vector<32x8xbf16>
    %cst_53 = arith.constant dense<0.000000e+00> : vector<16x8xf32>
    %48 = tpu.matmul %45, %47, %cst_53 {dimension_numbers = #tpu.dot_dimension_numbers<[1], [0], [0], [1], [0, 0, 1, 1], [], []>} : vector<16x32xbf16>, vector<32x8xbf16>, vector<16x8xf32> -> vector<16x8xf32>
    %49 = arith.addf %43, %48 : vector<16x8xf32>
    %c2_54 = arith.constant 2 : index
    %c1_55 = arith.constant 1 : index
    %c0_56 = arith.constant 0 : index
    %50 = vector.load %arg7[%c2_54, %c1_55, %c0_56] : memref<6x6x32xbf16, #tpu.memory_space<vmem>>, vector<4x4x32xbf16>
    %51 = vector.shape_cast %50 : vector<4x4x32xbf16> to vector<16x32xbf16>
    %c7 = arith.constant 7 : index
    %c0_57 = arith.constant 0 : index
    %c0_58 = arith.constant 0 : index
    %52 = vector.load %arg2[%c7, %c0_57, %c0_58] : memref<9x32x8xbf16, #tpu.memory_space<vmem>>, vector<1x32x8xbf16>
    %53 = vector.shape_cast %52 : vector<1x32x8xbf16> to vector<32x8xbf16>
    %cst_59 = arith.constant dense<0.000000e+00> : vector<16x8xf32>
    %54 = tpu.matmul %51, %53, %cst_59 {dimension_numbers = #tpu.dot_dimension_numbers<[1], [0], [0], [1], [0, 0, 1, 1], [], []>} : vector<16x32xbf16>, vector<32x8xbf16>, vector<16x8xf32> -> vector<16x8xf32>
    %55 = arith.addf %49, %54 : vector<16x8xf32>
    %c2_60 = arith.constant 2 : index
    %c2_61 = arith.constant 2 : index
    %c0_62 = arith.constant 0 : index
    %56 = vector.load %arg7[%c2_60, %c2_61, %c0_62] : memref<6x6x32xbf16, #tpu.memory_space<vmem>>, vector<4x4x32xbf16>
    %57 = vector.shape_cast %56 : vector<4x4x32xbf16> to vector<16x32xbf16>
    %c8 = arith.constant 8 : index
    %c0_63 = arith.constant 0 : index
    %c0_64 = arith.constant 0 : index
    %58 = vector.load %arg2[%c8, %c0_63, %c0_64] : memref<9x32x8xbf16, #tpu.memory_space<vmem>>, vector<1x32x8xbf16>
    %59 = vector.shape_cast %58 : vector<1x32x8xbf16> to vector<32x8xbf16>
    %cst_65 = arith.constant dense<0.000000e+00> : vector<16x8xf32>
    %60 = tpu.matmul %57, %59, %cst_65 {dimension_numbers = #tpu.dot_dimension_numbers<[1], [0], [0], [1], [0, 0, 1, 1], [], []>} : vector<16x32xbf16>, vector<32x8xbf16>, vector<16x8xf32> -> vector<16x8xf32>
    %61 = arith.addf %55, %60 : vector<16x8xf32>
    %c0_66 = arith.constant 0 : index
    %c0_67 = arith.constant 0 : index
    %62 = vector.load %arg3[%c0_66, %c0_67] : memref<1x8xf32, #tpu.memory_space<vmem>>, vector<1x8xf32>
    %63 = vector.broadcast %62 : vector<1x8xf32> to vector<16x8xf32>
    %64 = arith.addf %61, %63 : vector<16x8xf32>
    %cst_68 = arith.constant 0.000000e+00 : f32
    %65 = vector.broadcast %cst_68 : f32 to vector<16x8xf32>
    %66 = arith.maximumf %64, %65 : vector<16x8xf32>
    %67 = arith.truncf %66 : vector<16x8xf32> to vector<16x8xbf16>
    %c0_69 = arith.constant 0 : index
    %c0_70 = arith.constant 0 : index
    %68 = vector.load %arg4[%c0_69, %c0_70] : memref<8x32xbf16, #tpu.memory_space<vmem>>, vector<8x32xbf16>
    %cst_71 = arith.constant dense<0.000000e+00> : vector<16x32xf32>
    %69 = tpu.matmul %67, %68, %cst_71 {dimension_numbers = #tpu.dot_dimension_numbers<[1], [0], [0], [1], [0, 0, 1, 1], [], []>} : vector<16x8xbf16>, vector<8x32xbf16>, vector<16x32xf32> -> vector<16x32xf32>
    %c0_72 = arith.constant 0 : index
    %c0_73 = arith.constant 0 : index
    %70 = vector.load %arg5[%c0_72, %c0_73] : memref<1x32xf32, #tpu.memory_space<vmem>>, vector<1x32xf32>
    %71 = vector.broadcast %70 : vector<1x32xf32> to vector<16x32xf32>
    %72 = arith.addf %69, %71 : vector<16x32xf32>
    %73 = vector.shape_cast %1 : vector<4x4x32xbf16> to vector<16x32xbf16>
    %74 = arith.extf %73 : vector<16x32xbf16> to vector<16x32xf32>
    %75 = arith.addf %72, %74 : vector<16x32xf32>
    %76 = vector.shape_cast %75 : vector<16x32xf32> to vector<4x4x32xf32>
    %77 = arith.truncf %76 : vector<4x4x32xf32> to vector<4x4x32xbf16>
    %c0_74 = arith.constant 0 : index
    %c0_75 = arith.constant 0 : index
    %c0_76 = arith.constant 0 : index
    %c0_77 = arith.constant 0 : index
    %78 = vector.load %arg6[%c0_74, %c0_75, %c0_76, %c0_77] : memref<1x4x4x32xbf16, #tpu.memory_space<vmem>>, vector<1x4x4x32xbf16>
    %79 = vector.shape_cast %78 : vector<1x4x4x32xbf16> to vector<4x4x32xbf16>
    %80 = vector.shape_cast %77 : vector<4x4x32xbf16> to vector<1x4x4x32xbf16>
    tpu.vector_store %arg6[%c0_74, %c0_75, %c0_76, %c0_77], %80 {strides = array<i32>} : memref<1x4x4x32xbf16, #tpu.memory_space<vmem>>, vector<1x4x4x32xbf16>,
    return
  }
  func.func @transform_0(%arg0: i32) -> (i32, i32, i32, i32) {
    %c0_i32 = arith.constant 0 : i32
    %c0_i32_0 = arith.constant 0 : i32
    %c0_i32_1 = arith.constant 0 : i32
    %c0_i32_2 = arith.constant 0 : i32
    return %arg0, %c0_i32, %c0_i32_0, %c0_i32_1 : i32, i32, i32, i32
  }
  func.func @transform_1(%arg0: i32) -> (i32, i32, i32) {
    %c0_i32 = arith.constant 0 : i32
    %c0_i32_0 = arith.constant 0 : i32
    %c0_i32_1 = arith.constant 0 : i32
    %c0_i32_2 = arith.constant 0 : i32
    return %c0_i32, %c0_i32_0, %c0_i32_1 : i32, i32, i32
  }
  func.func @transform_2(%arg0: i32) -> (i32, i32) {
    %c0_i32 = arith.constant 0 : i32
    %c0_i32_0 = arith.constant 0 : i32
    %c0_i32_1 = arith.constant 0 : i32
    return %c0_i32, %c0_i32_0 : i32, i32
  }
  func.func @transform_3(%arg0: i32) -> (i32, i32) {
    %c0_i32 = arith.constant 0 : i32
    %c0_i32_0 = arith.constant 0 : i32
    %c0_i32_1 = arith.constant 0 : i32
    return %c0_i32, %c0_i32_0 : i32, i32
  }
  func.func @transform_4(%arg0: i32) -> (i32, i32) {
    %c0_i32 = arith.constant 0 : i32
    %c0_i32_0 = arith.constant 0 : i32
    %c0_i32_1 = arith.constant 0 : i32
    return %c0_i32, %c0_i32_0 : i32, i32
  }
  func.func @transform_5(%arg0: i32) -> (i32, i32, i32, i32) {
    %c0_i32 = arith.constant 0 : i32
    %c0_i32_0 = arith.constant 0 : i32
    %c0_i32_1 = arith.constant 0 : i32
    %c0_i32_2 = arith.constant 0 : i32
    return %arg0, %c0_i32, %c0_i32_0, %c0_i32_1 : i32, i32, i32, i32
  }
}

module attributes {stable_mosaic.version = 11 : i64} {
  func.func @_resblock_kernel(%arg0: i32, %arg1: memref<1x4x4x32xbf16, #tpu.memory_space<vmem>>, %arg2: memref<9x32x8xbf16, #tpu.memory_space<vmem>>, %arg3: memref<1x8xf32, #tpu.memory_space<vmem>>, %arg4: memref<8x32xbf16, #tpu.memory_space<vmem>>, %arg5: memref<1x32xf32, #tpu.memory_space<vmem>>, %arg6: memref<1x4x4x32xbf16, #tpu.memory_space<vmem>>, %arg7: memref<6x6x32xbf16, #tpu.memory_space<vmem>>) attributes {dimension_semantics = [#tpu.dimension_semantics<parallel>], iteration_bounds = array<i64: 2>, scalar_prefetch = 0 : i64, scratch_operands = 1 : i64, tpu.core_type = #tpu.core_type<tc>, window_params = [{transform_indices = @transform_0, window_bounds = array<i64: 1, 4, 4, 32>}, {pipeline_mode = #tpu.pipeline_mode<synchronous>, transform_indices = @transform_1, window_bounds = array<i64: 9, 32, 8>}, {pipeline_mode = #tpu.pipeline_mode<synchronous>, transform_indices = @transform_2, window_bounds = array<i64: 1, 8>}, {pipeline_mode = #tpu.pipeline_mode<synchronous>, transform_indices = @transform_3, window_bounds = array<i64: 8, 32>}, {pipeline_mode = #tpu.pipeline_mode<synchronous>, transform_indices = @transform_4, window_bounds = array<i64: 1, 32>}, {transform_indices = @transform_5, window_bounds = array<i64: 1, 4, 4, 32>}]} {
    %c0 = arith.constant 0 : index
    %c0_0 = arith.constant 0 : index
    %c0_1 = arith.constant 0 : index
    %c0_2 = arith.constant 0 : index
    %0 = vector.load %arg1[%c0, %c0_0, %c0_1, %c0_2] : memref<1x4x4x32xbf16, #tpu.memory_space<vmem>>, vector<1x4x4x32xbf16>
    %1 = vector.shape_cast %0 : vector<1x4x4x32xbf16> to vector<4x4x32xbf16>
    %cst = arith.constant 0.000000e+00 : bf16
    %2 = vector.broadcast %cst : bf16 to vector<6x6x32xbf16>
    %c0_3 = arith.constant 0 : index
    %c0_4 = arith.constant 0 : index
    %c0_5 = arith.constant 0 : index
    %3 = vector.load %arg7[%c0_3, %c0_4, %c0_5] : memref<6x6x32xbf16, #tpu.memory_space<vmem>>, vector<6x6x32xbf16>
    tpu.vector_store %arg7[%c0_3, %c0_4, %c0_5], %2 {strides = array<i32>} : memref<6x6x32xbf16, #tpu.memory_space<vmem>>, vector<6x6x32xbf16>,
    %cst_6 = arith.constant 0.000000e+00 : bf16
    %4 = vector.broadcast %cst_6 : bf16 to vector<4x4x32xbf16>
    %5 = arith.maximumf %1, %4 : vector<4x4x32xbf16>
    %c1 = arith.constant 1 : index
    %c1_7 = arith.constant 1 : index
    %c0_8 = arith.constant 0 : index
    %6 = vector.load %arg7[%c1, %c1_7, %c0_8] : memref<6x6x32xbf16, #tpu.memory_space<vmem>>, vector<4x4x32xbf16>
    tpu.vector_store %arg7[%c1, %c1_7, %c0_8], %5 {strides = array<i32>} : memref<6x6x32xbf16, #tpu.memory_space<vmem>>, vector<4x4x32xbf16>,
    %cst_9 = arith.constant 0.000000e+00 : f32
    %7 = vector.broadcast %cst_9 : f32 to vector<16x8xf32>
    %c0_10 = arith.constant 0 : index
    %c0_11 = arith.constant 0 : index
    %c0_12 = arith.constant 0 : index
    %8 = vector.load %arg7[%c0_10, %c0_11, %c0_12] : memref<6x6x32xbf16, #tpu.memory_space<vmem>>, vector<4x4x32xbf16>
    %9 = vector.shape_cast %8 : vector<4x4x32xbf16> to vector<16x32xbf16>
    %c0_13 = arith.constant 0 : index
    %c0_14 = arith.constant 0 : index
    %c0_15 = arith.constant 0 : index
    %10 = vector.load %arg2[%c0_13, %c0_14, %c0_15] : memref<9x32x8xbf16, #tpu.memory_space<vmem>>, vector<1x32x8xbf16>
    %11 = vector.shape_cast %10 : vector<1x32x8xbf16> to vector<32x8xbf16>
    %cst_16 = arith.constant dense<0.000000e+00> : vector<16x8xf32>
    %12 = tpu.matmul %9, %11, %cst_16 {dimension_numbers = #tpu.dot_dimension_numbers<[1], [0], [0], [1], [0, 0, 1, 1], [], []>} : vector<16x32xbf16>, vector<32x8xbf16>, vector<16x8xf32> -> vector<16x8xf32>
    %13 = arith.addf %7, %12 : vector<16x8xf32>
    %c0_17 = arith.constant 0 : index
    %c1_18 = arith.constant 1 : index
    %c0_19 = arith.constant 0 : index
    %14 = vector.load %arg7[%c0_17, %c1_18, %c0_19] : memref<6x6x32xbf16, #tpu.memory_space<vmem>>, vector<4x4x32xbf16>
    %15 = vector.shape_cast %14 : vector<4x4x32xbf16> to vector<16x32xbf16>
    %c1_20 = arith.constant 1 : index
    %c0_21 = arith.constant 0 : index
    %c0_22 = arith.constant 0 : index
    %16 = vector.load %arg2[%c1_20, %c0_21, %c0_22] : memref<9x32x8xbf16, #tpu.memory_space<vmem>>, vector<1x32x8xbf16>
    %17 = vector.shape_cast %16 : vector<1x32x8xbf16> to vector<32x8xbf16>
    %cst_23 = arith.constant dense<0.000000e+00> : vector<16x8xf32>
    %18 = tpu.matmul %15, %17, %cst_23 {dimension_numbers = #tpu.dot_dimension_numbers<[1], [0], [0], [1], [0, 0, 1, 1], [], []>} : vector<16x32xbf16>, vector<32x8xbf16>, vector<16x8xf32> -> vector<16x8xf32>
    %19 = arith.addf %13, %18 : vector<16x8xf32>
    %c0_24 = arith.constant 0 : index
    %c2 = arith.constant 2 : index
    %c0_25 = arith.constant 0 : index
    %20 = vector.load %arg7[%c0_24, %c2, %c0_25] : memref<6x6x32xbf16, #tpu.memory_space<vmem>>, vector<4x4x32xbf16>
    %21 = vector.shape_cast %20 : vector<4x4x32xbf16> to vector<16x32xbf16>
    %c2_26 = arith.constant 2 : index
    %c0_27 = arith.constant 0 : index
    %c0_28 = arith.constant 0 : index
    %22 = vector.load %arg2[%c2_26, %c0_27, %c0_28] : memref<9x32x8xbf16, #tpu.memory_space<vmem>>, vector<1x32x8xbf16>
    %23 = vector.shape_cast %22 : vector<1x32x8xbf16> to vector<32x8xbf16>
    %cst_29 = arith.constant dense<0.000000e+00> : vector<16x8xf32>
    %24 = tpu.matmul %21, %23, %cst_29 {dimension_numbers = #tpu.dot_dimension_numbers<[1], [0], [0], [1], [0, 0, 1, 1], [], []>} : vector<16x32xbf16>, vector<32x8xbf16>, vector<16x8xf32> -> vector<16x8xf32>
    %25 = arith.addf %19, %24 : vector<16x8xf32>
    %c1_30 = arith.constant 1 : index
    %c0_31 = arith.constant 0 : index
    %c0_32 = arith.constant 0 : index
    %26 = vector.load %arg7[%c1_30, %c0_31, %c0_32] : memref<6x6x32xbf16, #tpu.memory_space<vmem>>, vector<4x4x32xbf16>
    %27 = vector.shape_cast %26 : vector<4x4x32xbf16> to vector<16x32xbf16>
    %c3 = arith.constant 3 : index
    %c0_33 = arith.constant 0 : index
    %c0_34 = arith.constant 0 : index
    %28 = vector.load %arg2[%c3, %c0_33, %c0_34] : memref<9x32x8xbf16, #tpu.memory_space<vmem>>, vector<1x32x8xbf16>
    %29 = vector.shape_cast %28 : vector<1x32x8xbf16> to vector<32x8xbf16>
    %cst_35 = arith.constant dense<0.000000e+00> : vector<16x8xf32>
    %30 = tpu.matmul %27, %29, %cst_35 {dimension_numbers = #tpu.dot_dimension_numbers<[1], [0], [0], [1], [0, 0, 1, 1], [], []>} : vector<16x32xbf16>, vector<32x8xbf16>, vector<16x8xf32> -> vector<16x8xf32>
    %31 = arith.addf %25, %30 : vector<16x8xf32>
    %c1_36 = arith.constant 1 : index
    %c1_37 = arith.constant 1 : index
    %c0_38 = arith.constant 0 : index
    %32 = vector.load %arg7[%c1_36, %c1_37, %c0_38] : memref<6x6x32xbf16, #tpu.memory_space<vmem>>, vector<4x4x32xbf16>
    %33 = vector.shape_cast %32 : vector<4x4x32xbf16> to vector<16x32xbf16>
    %c4 = arith.constant 4 : index
    %c0_39 = arith.constant 0 : index
    %c0_40 = arith.constant 0 : index
    %34 = vector.load %arg2[%c4, %c0_39, %c0_40] : memref<9x32x8xbf16, #tpu.memory_space<vmem>>, vector<1x32x8xbf16>
    %35 = vector.shape_cast %34 : vector<1x32x8xbf16> to vector<32x8xbf16>
    %cst_41 = arith.constant dense<0.000000e+00> : vector<16x8xf32>
    %36 = tpu.matmul %33, %35, %cst_41 {dimension_numbers = #tpu.dot_dimension_numbers<[1], [0], [0], [1], [0, 0, 1, 1], [], []>} : vector<16x32xbf16>, vector<32x8xbf16>, vector<16x8xf32> -> vector<16x8xf32>
    %37 = arith.addf %31, %36 : vector<16x8xf32>
    %c1_42 = arith.constant 1 : index
    %c2_43 = arith.constant 2 : index
    %c0_44 = arith.constant 0 : index
    %38 = vector.load %arg7[%c1_42, %c2_43, %c0_44] : memref<6x6x32xbf16, #tpu.memory_space<vmem>>, vector<4x4x32xbf16>
    %39 = vector.shape_cast %38 : vector<4x4x32xbf16> to vector<16x32xbf16>
    %c5 = arith.constant 5 : index
    %c0_45 = arith.constant 0 : index
    %c0_46 = arith.constant 0 : index
    %40 = vector.load %arg2[%c5, %c0_45, %c0_46] : memref<9x32x8xbf16, #tpu.memory_space<vmem>>, vector<1x32x8xbf16>
    %41 = vector.shape_cast %40 : vector<1x32x8xbf16> to vector<32x8xbf16>
    %cst_47 = arith.constant dense<0.000000e+00> : vector<16x8xf32>
    %42 = tpu.matmul %39, %41, %cst_47 {dimension_numbers = #tpu.dot_dimension_numbers<[1], [0], [0], [1], [0, 0, 1, 1], [], []>} : vector<16x32xbf16>, vector<32x8xbf16>, vector<16x8xf32> -> vector<16x8xf32>
    %43 = arith.addf %37, %42 : vector<16x8xf32>
    %c2_48 = arith.constant 2 : index
    %c0_49 = arith.constant 0 : index
    %c0_50 = arith.constant 0 : index
    %44 = vector.load %arg7[%c2_48, %c0_49, %c0_50] : memref<6x6x32xbf16, #tpu.memory_space<vmem>>, vector<4x4x32xbf16>
    %45 = vector.shape_cast %44 : vector<4x4x32xbf16> to vector<16x32xbf16>
    %c6 = arith.constant 6 : index
    %c0_51 = arith.constant 0 : index
    %c0_52 = arith.constant 0 : index
    %46 = vector.load %arg2[%c6, %c0_51, %c0_52] : memref<9x32x8xbf16, #tpu.memory_space<vmem>>, vector<1x32x8xbf16>
    %47 = vector.shape_cast %46 : vector<1x32x8xbf16> to vector<32x8xbf16>
    %cst_53 = arith.constant dense<0.000000e+00> : vector<16x8xf32>
    %48 = tpu.matmul %45, %47, %cst_53 {dimension_numbers = #tpu.dot_dimension_numbers<[1], [0], [0], [1], [0, 0, 1, 1], [], []>} : vector<16x32xbf16>, vector<32x8xbf16>, vector<16x8xf32> -> vector<16x8xf32>
    %49 = arith.addf %43, %48 : vector<16x8xf32>
    %c2_54 = arith.constant 2 : index
    %c1_55 = arith.constant 1 : index
    %c0_56 = arith.constant 0 : index
    %50 = vector.load %arg7[%c2_54, %c1_55, %c0_56] : memref<6x6x32xbf16, #tpu.memory_space<vmem>>, vector<4x4x32xbf16>
    %51 = vector.shape_cast %50 : vector<4x4x32xbf16> to vector<16x32xbf16>
    %c7 = arith.constant 7 : index
    %c0_57 = arith.constant 0 : index
    %c0_58 = arith.constant 0 : index
    %52 = vector.load %arg2[%c7, %c0_57, %c0_58] : memref<9x32x8xbf16, #tpu.memory_space<vmem>>, vector<1x32x8xbf16>
    %53 = vector.shape_cast %52 : vector<1x32x8xbf16> to vector<32x8xbf16>
    %cst_59 = arith.constant dense<0.000000e+00> : vector<16x8xf32>
    %54 = tpu.matmul %51, %53, %cst_59 {dimension_numbers = #tpu.dot_dimension_numbers<[1], [0], [0], [1], [0, 0, 1, 1], [], []>} : vector<16x32xbf16>, vector<32x8xbf16>, vector<16x8xf32> -> vector<16x8xf32>
    %55 = arith.addf %49, %54 : vector<16x8xf32>
    %c2_60 = arith.constant 2 : index
    %c2_61 = arith.constant 2 : index
    %c0_62 = arith.constant 0 : index
    %56 = vector.load %arg7[%c2_60, %c2_61, %c0_62] : memref<6x6x32xbf16, #tpu.memory_space<vmem>>, vector<4x4x32xbf16>
    %57 = vector.shape_cast %56 : vector<4x4x32xbf16> to vector<16x32xbf16>
    %c8 = arith.constant 8 : index
    %c0_63 = arith.constant 0 : index
    %c0_64 = arith.constant 0 : index
    %58 = vector.load %arg2[%c8, %c0_63, %c0_64] : memref<9x32x8xbf16, #tpu.memory_space<vmem>>, vector<1x32x8xbf16>
    %59 = vector.shape_cast %58 : vector<1x32x8xbf16> to vector<32x8xbf16>
    %cst_65 = arith.constant dense<0.000000e+00> : vector<16x8xf32>
    %60 = tpu.matmul %57, %59, %cst_65 {dimension_numbers = #tpu.dot_dimension_numbers<[1], [0], [0], [1], [0, 0, 1, 1], [], []>} : vector<16x32xbf16>, vector<32x8xbf16>, vector<16x8xf32> -> vector<16x8xf32>
    %61 = arith.addf %55, %60 : vector<16x8xf32>
    %c0_66 = arith.constant 0 : index
    %c0_67 = arith.constant 0 : index
    %62 = vector.load %arg3[%c0_66, %c0_67] : memref<1x8xf32, #tpu.memory_space<vmem>>, vector<1x8xf32>
    %63 = vector.broadcast %62 : vector<1x8xf32> to vector<16x8xf32>
    %64 = arith.addf %61, %63 : vector<16x8xf32>
    %cst_68 = arith.constant 0.000000e+00 : f32
    %65 = vector.broadcast %cst_68 : f32 to vector<16x8xf32>
    %66 = arith.maximumf %64, %65 : vector<16x8xf32>
    %67 = arith.truncf %66 : vector<16x8xf32> to vector<16x8xbf16>
    %c0_69 = arith.constant 0 : index
    %c0_70 = arith.constant 0 : index
    %68 = vector.load %arg4[%c0_69, %c0_70] : memref<8x32xbf16, #tpu.memory_space<vmem>>, vector<8x32xbf16>
    %cst_71 = arith.constant dense<0.000000e+00> : vector<16x32xf32>
    %69 = tpu.matmul %67, %68, %cst_71 {dimension_numbers = #tpu.dot_dimension_numbers<[1], [0], [0], [1], [0, 0, 1, 1], [], []>} : vector<16x8xbf16>, vector<8x32xbf16>, vector<16x32xf32> -> vector<16x32xf32>
    %c0_72 = arith.constant 0 : index
    %c0_73 = arith.constant 0 : index
    %70 = vector.load %arg5[%c0_72, %c0_73] : memref<1x32xf32, #tpu.memory_space<vmem>>, vector<1x32xf32>
    %71 = vector.broadcast %70 : vector<1x32xf32> to vector<16x32xf32>
    %72 = arith.addf %69, %71 : vector<16x32xf32>
    %73 = vector.shape_cast %1 : vector<4x4x32xbf16> to vector<16x32xbf16>
    %74 = arith.extf %73 : vector<16x32xbf16> to vector<16x32xf32>
    %75 = arith.addf %72, %74 : vector<16x32xf32>
    %cst_74 = arith.constant 0.000000e+00 : f32
    %76 = vector.broadcast %cst_74 : f32 to vector<16x32xf32>
    %77 = arith.maximumf %75, %76 : vector<16x32xf32>
    %78 = vector.shape_cast %77 : vector<16x32xf32> to vector<4x4x32xf32>
    %79 = arith.truncf %78 : vector<4x4x32xf32> to vector<4x4x32xbf16>
    %c0_75 = arith.constant 0 : index
    %c0_76 = arith.constant 0 : index
    %c0_77 = arith.constant 0 : index
    %c0_78 = arith.constant 0 : index
    %80 = vector.load %arg6[%c0_75, %c0_76, %c0_77, %c0_78] : memref<1x4x4x32xbf16, #tpu.memory_space<vmem>>, vector<1x4x4x32xbf16>
    %81 = vector.shape_cast %80 : vector<1x4x4x32xbf16> to vector<4x4x32xbf16>
    %82 = vector.shape_cast %79 : vector<4x4x32xbf16> to vector<1x4x4x32xbf16>
    tpu.vector_store %arg6[%c0_75, %c0_76, %c0_77, %c0_78], %82 {strides = array<i32>} : memref<1x4x4x32xbf16, #tpu.memory_space<vmem>>, vector<1x4x4x32xbf16>,
    return
  }
  func.func @transform_0(%arg0: i32) -> (i32, i32, i32, i32) {
    %c0_i32 = arith.constant 0 : i32
    %c0_i32_0 = arith.constant 0 : i32
    %c0_i32_1 = arith.constant 0 : i32
    %c0_i32_2 = arith.constant 0 : i32
    return %arg0, %c0_i32, %c0_i32_0, %c0_i32_1 : i32, i32, i32, i32
  }
  func.func @transform_1(%arg0: i32) -> (i32, i32, i32) {
    %c0_i32 = arith.constant 0 : i32
    %c0_i32_0 = arith.constant 0 : i32
    %c0_i32_1 = arith.constant 0 : i32
    %c0_i32_2 = arith.constant 0 : i32
    return %c0_i32, %c0_i32_0, %c0_i32_1 : i32, i32, i32
  }
  func.func @transform_2(%arg0: i32) -> (i32, i32) {
    %c0_i32 = arith.constant 0 : i32
    %c0_i32_0 = arith.constant 0 : i32
    %c0_i32_1 = arith.constant 0 : i32
    return %c0_i32, %c0_i32_0 : i32, i32
  }
  func.func @transform_3(%arg0: i32) -> (i32, i32) {
    %c0_i32 = arith.constant 0 : i32
    %c0_i32_0 = arith.constant 0 : i32
    %c0_i32_1 = arith.constant 0 : i32
    return %c0_i32, %c0_i32_0 : i32, i32
  }
  func.func @transform_4(%arg0: i32) -> (i32, i32) {
    %c0_i32 = arith.constant 0 : i32
    %c0_i32_0 = arith.constant 0 : i32
    %c0_i32_1 = arith.constant 0 : i32
    return %c0_i32, %c0_i32_0 : i32, i32
  }
  func.func @transform_5(%arg0: i32) -> (i32, i32, i32, i32) {
    %c0_i32 = arith.constant 0 : i32
    %c0_i32_0 = arith.constant 0 : i32
    %c0_i32_1 = arith.constant 0 : i32
    %c0_i32_2 = arith.constant 0 : i32
    return %arg0, %c0_i32, %c0_i32_0, %c0_i32_1 : i32, i32, i32, i32
  }
}

</mosaic_0001>

<bundles_post_ra>
// kernel: _lambda_.6
= control target key start
LH: loop header
LB: loop body
LE: loop exit
PB: predicated region body
PF: predicated region fallthrough
CT: control target
= control target key end

     0   :  { %s1574_s12 = smov 0   ;;  %s1774_s0 = inlined_call_operand.vmem [shape: bf16[2,5,2,5,32], index: 0, kind: input, shape index: {}]   ;;  %s1775_s1 = inlined_call_operand.vmem [shape: bf16[8,32,32], index: 1, kind: input, shape index: {}]   ;;  %s1776_s2 = inlined_call_operand.vmem [shape: f32[1,32], index: 2, kind: input, shape index: {}]   ;;  %s1777_s3 = inlined_call_operand.vmem [shape: bf16[2,4,4,32], index: 3, kind: output, shape index: {}]  }
   0x1 LB: > { %s1315_s13 = sadd.s32 4294967295, %s1549_s12   ;;  %p1319_p0 = scmp.ge.s32.totalorder %s1549_s12, 1  ;;  %s1549_s12 = sphi %s1574_s12, %s13_s12  }
   0x2   : > { %p137_p1 = scmp.lt.s32.totalorder %s1549_s12, 3 }
   0x4   : > { %p138_p2 = pnand %p1319_p0, %p137_p1 }
   0x5   : > { %v1519_v0 = vld [vmem:[%s1775_s1 + $0x10] sm:$0xff] (!%p138_p2)   ;;  %v1551_v1 = vmov (!%p138_p2), 0.0   ;;  %v1520_v2 = vld [vmem:[%s1775_s1] sm:$0xff] (!%p138_p2)   ;;  %v293_v3 = vlaneseq (!%p138_p2)  ;;  %v1521_v4 = vld [vmem:[%s1775_s1 + $0x18] sm:$0xff] (!%p138_p2)   ;;  %vm1552_vm0 = vmmov (!%p138_p2), 0   ;;  %p161_p3 = scmp.lt.s32.totalorder (!%p138_p2), %s1315_s13, 1 }
   0x6   : > { %141 = sbr.rel (%p138_p2) target bundleno = 293 (0x125), region = 32  ;;  %1443 = vmatprep.subr.bf16.mxu0 (!%p138_p2), %v1551_v1  ;;  %1451 = vmatprep.subr.bf16.mxu1 (!%p138_p2), %v1551_v1  ;;  %v1522_v5 = vld [vmem:[%s1775_s1 + $0x8] sm:$0xff] (!%p138_p2)   ;;  %v1553_v6 = vmov (!%p138_p2), 1983009808   ;;  %vm220_vm1 = vsmask.f32 (!%p138_p2), 1280 }
   0x7   : > { %1444 = vmatpush3.bf16.msra.mxu0 (!%p138_p2), %v1519_v0  ;;  %1455 = vmatprep.mubr.msk.bf16.mxu1 (!%p138_p2), %vm1552_vm0, %v1551_v1  ;;  %v291_v7 = vunpack.c.l.s4 (!%p138_p2), %v1553_v6  ;;  %v294_v8 = vshrl.u32 (!%p138_p2), %v293_v3, 7  ;;  %vm221_vm2 = vsmask.f32 (!%p138_p2), 3336  ;;  %vm223_vm3 = vsmask.f32 (!%p138_p2), 5392  ;;  %v1526_v15 = vld [vmem:[%s1775_s1 + $0x30] sm:$0xff] (!%p138_p2)  }
   0x8   : > { %1452 = vmatpush3.bf16.msra.mxu1 (!%p138_p2), %v1520_v2  ;;  %1445 = vmatprep.subr.bf16.mxu0 (!%p138_p2), %v1551_v1  ;;  %vm225_vm4 = vsmask.f32 (!%p138_p2), 7448  ;;  %vm317_vm5 = vcmask (!%p138_p2), 261120   ;;  %vm222_vm6 = vmor (!%p138_p2), %vm220_vm1, %vm221_vm2  ;;  %v1528_v43 = vld [vmem:[%s1775_s1 + $0x38] sm:$0xff] (!%p138_p2)   ;;  %vm1255_vm9 = vcmask (!%p138_p2), 254976  }
   0x9   : > { %1453 = vmatprep.subr.bf16.mxu1 (!%p138_p2), %v1551_v1  ;;  %1447 = vmatprep.mubr.msk.bf16.mxu0 (!%p138_p2), %vm1552_vm0, %v1551_v1  ;;  %v292_v9 = vunpack.c.0.s8 (!%p138_p2), %v291_v7  ;;  %vm224_vm7 = vmor (!%p138_p2), %vm222_vm6, %vm223_vm3 }
   0xa   : > { %vm1628_vm8 = vmor (!%p138_p2), %vm224_vm7, %vm225_vm4 }
   0xb   : > { %1446 = vmatpush3.bf16.msra.mxu0 (!%p138_p2), %v1521_v4  ;;  %v1612_v10 = vsub.s32 (!%p138_p2), %v292_v9, %v294_v8 }
   0xc   : > { %1454 = vmatpush3.bf16.msra.mxu1 (!%p138_p2), %v1522_v5  ;;  %1459 = vmatprep.subr.bf16.mxu0 (!%p138_p2), %v1551_v1 }
   0xd   : > { %s1781_s13 = smov (!%p161_p3, %s1315_s13), 1  ;;  %1467 = vmatprep.subr.bf16.mxu1 %v1551_v1 }
   0xe   : > { %s1507_s22 = smul.u32 40, %s1781_s13  ;;  %s1418_s27 = sshll.u32 %s1781_s13, 3 }
   0xf   : > { %s170_s30 = scalar_lea.vmem %s1777_s3, %s1418_s27 }
  0x10   : > { %s1609_s25 = scalar_lea.vmem %s1774_s0, %s1507_s22 }
  0x11   : > { %v1523_v11 = vld [vmem:[%s1609_s25] ss:$8 sps:$4 sm:$0x33]   ;;  %v1524_v12 = vld [vmem:[%s1609_s25 + $0x10] ss:$8 sps:$4 sm:$0x33]  }
  0x12   : > { %v374_v13 = vrot.slane %v1523_v11, %v1612_v10  ;;  %v1323_v14 = vld.sshfl [vmem:[%s1609_s25] sm:$0x13 pattern:$0x76325410]  ;;  %v381_v16 = vrot.slane %v1524_v12, %v1612_v10 }
  0x13   : > { %v1324_v17 = vld.sshfl [vmem:[%s1609_s25 + $0x8] sm:$0x13 pattern:$0x76325410]  ;;  %v195_v18 = vcombine.high %v1323_v14, %v1323_v14  ;;  %v228_v19 = vshrl.u32 %v1323_v14, 16  ;;  %v231_v20 = vshll.u32 %v1323_v14, 16 }
  0x14   : > { %v1325_v21 = vld.sshfl [vmem:[%s1609_s25 + $0x10] sm:$0x13 pattern:$0x76325410]  ;;  %v203_v22 = vcombine.high %v1324_v17, %v1324_v17  ;;  %v242_v23 = vshrl.u32 %v1324_v17, 16  ;;  %v245_v24 = vshll.u32 %v1324_v17, 16  ;;  %v382_v25 = vcombine.low %v374_v13, %v381_v16 }
  0x15   : > { %v1326_v26 = vld.sshfl [vmem:[%s1609_s25 + $0x18] sm:$0x13 pattern:$0x76325410]  ;;  %v211_v27 = vcombine.high %v1325_v21, %v1325_v21  ;;  %v230_v28 = vrot.slane %v228_v19, 6  ;;  %v233_v29 = vrot.slane %v231_v20, 7 }
  0x16   : > { %v219_v30 = vcombine.high %v1326_v26, %v1326_v26  ;;  %v237_v31 = vshll.u32 %v195_v18, 16  ;;  %v244_v32 = vrot.slane %v242_v23, 6  ;;  %v247_v33 = vrot.slane %v245_v24, 7  ;;  %1456 = vmatmul.mubr.msk.bf16.vlgmr.msra.gmra.mrb[0].mxu1 %vm317_vm5, %v382_v25 }
  0x17   : > { %v234_v34 = vor.u32 %v233_v29, %v230_v28  ;;  %v251_v35 = vshll.u32 %v203_v22, 16  ;;  %v256_v36 = vshrl.u32 %v1325_v21, 16  ;;  %v259_v37 = vshll.u32 %v1325_v21, 16  ;;  %1468 = vmatpush3.bf16.msra.mxu1 %v1526_v15  ;;  %1471 = vmatprep.mubr.msk.bf16.mxu1 %vm1552_vm0, %v1551_v1  ;;  %v1529_v29 = vld [vmem:[%s1609_s25 + $0x4] ss:$8 sps:$4 sm:$0x33]  }
  0x18   : > { %v239_v39 = vrot.slane %v237_v31, 7  ;;  %v248_v40 = vor.u32 %v247_v33, %v244_v32  ;;  %v265_v41 = vshll.u32 %v211_v27, 16  ;;  %v270_v42 = vshrl.u32 %v1326_v26, 16  ;;  %1469 = vmatprep.subr.bf16.mxu1 %v1551_v1 }
  0x19   : > { %v235_v44 = vrot.slane %v234_v34, 2  ;;  %v253_v45 = vrot.slane %v251_v35, 7  ;;  %v258_v46 = vrot.slane %v256_v36, 6  ;;  %v261_v47 = vrot.slane %v259_v37, 7 }
  0x1a   : > { %v249_v48 = vrot.slane %v248_v40, 2  ;;  %v272_v49 = vrot.slane %v270_v42, 6  ;;  %v273_v50 = vshll.u32 %v1326_v26, 16  ;;  %v267_v53 = vrot.slane %v265_v41, 7  ;;  %v1525_v40 = vld [vmem:[%s1775_s1 + $0x20] sm:$0xff]  }
  0x1b   : > { %v240_v51 = vsel %vm1628_vm8, %v235_v44, %v239_v39  ;;  %v262_v52 = vor.u32 %v261_v47, %v258_v46  ;;  %v279_v54 = vshll.u32 %v219_v30, 16  ;;  %v1352_v55 = vld.sshfl [vmem:[%s1609_s25 + $0x4] sm:$0x13 pattern:$0x76325410]  ;;  %1470 = vmatpush3.bf16.msra.mxu1 %v1528_v43 }
  0x1c   : > { %v1643_v56 = vsel %vm1628_vm8, %v249_v48, %v253_v45  ;;  %v275_v57 = vrot.slane %v273_v50, 7  ;;  %v1353_v58 = vld.sshfl [vmem:[%s1609_s25 + $0xc] sm:$0x13 pattern:$0x76325410]  ;;  %v543_v59 = vcombine.high %v1352_v55, %v1352_v55  ;;  %v569_v60 = vshrl.u32 %v1352_v55, 16  ;;  %1483 = vmatprep.subr.bf16.mxu1 %v1551_v1 }
  0x1d   : > { %v263_v61 = vrot.slane %v262_v52, 2  ;;  %v281_v62 = vrot.slane %v279_v54, 7  ;;  %v288_v63 = vcombine.low %v240_v51, %v1643_v56  ;;  %v1354_v0 = vld.sshfl [vmem:[%s1609_s25 + $0x14] sm:$0x13 pattern:$0x76325410]  ;;  %v551_v2 = vcombine.high %v1353_v58, %v1353_v58 }
  0x1e   : > { %v276_v3 = vor.u32 %v275_v57, %v272_v49  ;;  %v1355_v4 = vld.sshfl [vmem:[%s1609_s25 + $0x1c] sm:$0x13 pattern:$0x76325410]  ;;  %v559_v5 = vcombine.high %v1354_v0, %v1354_v0  ;;  %v571_v6 = vrot.slane %v569_v60, 6  ;;  %v572_v7 = vshll.u32 %v1352_v55, 16 }
  0x1f   : > { %v1652_v8 = vsel %vm1628_vm8, %v263_v61, %v267_v53  ;;  %v296_v9 = vrot.slane %v288_v63, %v1612_v10  ;;  %v567_v11 = vcombine.high %v1355_v4, %v1355_v4  ;;  %v578_v12 = vshll.u32 %v543_v59, 16  ;;  %v1530_v30 = vld [vmem:[%s1609_s25 + $0x14] ss:$8 sps:$4 sm:$0x33]   ;;  %v1527_v55 = vld [vmem:[%s1775_s1 + $0x28] sm:$0xff]  }
  0x20   : > { %v277_v13 = vrot.slane %v276_v3, 2  ;;  %v574_v14 = vrot.slane %v572_v7, 7  ;;  %v583_v15 = vshrl.u32 %v1353_v58, 16  ;;  %v586_v16 = vshll.u32 %v1353_v58, 16 }
  0x21   : > { %v580_v17 = vrot.slane %v578_v12, 7  ;;  %v592_v18 = vshll.u32 %v551_v2, 16  ;;  %v597_v19 = vshrl.u32 %v1354_v0, 16  ;;  %v600_v20 = vshll.u32 %v1354_v0, 16 }
  0x22   : > { %v1657_v21 = vsel %vm1628_vm8, %v277_v13, %v281_v62  ;;  %v575_v22 = vor.u32 %v574_v14, %v571_v6  ;;  %v585_v23 = vrot.slane %v583_v15, 6  ;;  %v588_v24 = vrot.slane %v586_v16, 7  ;;  %v1381_v50 = vld.sshfl [vmem:[%s1609_s25 + $0x20] sm:$0x13 pattern:$0x76325410] }
  0x23   : > { %v289_v25 = vcombine.low %v1652_v8, %v1657_v21  ;;  %v594_v26 = vrot.slane %v592_v18, 7  ;;  %v599_v27 = vrot.slane %v597_v19, 6  ;;  %v602_v28 = vrot.slane %v600_v20, 7  ;;  %v1535_v63 = vld [vmem:[%s1609_s25 + $0x8] ss:$8 sps:$4 sm:$0x33]  }
  0x24   : > { %v576_v31 = vrot.slane %v575_v22, 2  ;;  %v589_v32 = vor.u32 %v588_v24, %v585_v23  ;;  %v606_v33 = vshll.u32 %v559_v5, 16  ;;  %v611_v34 = vshrl.u32 %v1355_v4, 16  ;;  %v1536_v0 = vld [vmem:[%s1609_s25 + $0x18] ss:$8 sps:$4 sm:$0x33]  }
  0x25   : > { %v303_v35 = vrot.slane %v289_v25, %v1612_v10  ;;  %v603_v36 = vor.u32 %v602_v28, %v599_v27  ;;  %v614_v37 = vshll.u32 %v1355_v4, 16  ;;  %v620_v39 = vshll.u32 %v567_v11, 16  ;;  %v1531_v6 = vld [vmem:[%s1775_s1 + $0x40] sm:$0xff]   ;;  %v1532_v19 = vld [vmem:[%s1775_s1 + $0x50] sm:$0xff]  }
  0x26   : > { %v581_v41 = vsel %vm1628_vm8, %v576_v31, %v580_v17  ;;  %v590_v42 = vrot.slane %v589_v32, 2  ;;  %v608_v43 = vrot.slane %v606_v33, 7  ;;  %v613_v44 = vrot.slane %v611_v34, 6  ;;  %v1534_v31 = vld [vmem:[%s1775_s1 + $0x58] sm:$0xff]  }
  0x27   : > { %v304_v45 = vcombine.low %v296_v9, %v303_v35  ;;  %v604_v46 = vrot.slane %v603_v36, 2  ;;  %v616_v47 = vrot.slane %v614_v37, 7  ;;  %v622_v48 = vrot.slane %v620_v39, 7  ;;  %v1537_v36 = vld [vmem:[%s1775_s1 + $0x60] sm:$0xff]  }
  0x28   : > { %v1671_v49 = vsel %vm1628_vm8, %v590_v42, %v594_v26  ;;  %v461_v52 = vrot.slane %v1529_v29, %v1612_v10  ;;  %v468_v53 = vrot.slane %v1530_v30, %v1612_v10  ;;  %v832_v54 = vcombine.high %v1381_v50, %v1381_v50  ;;  %v1407_v14 = vld.sshfl [vmem:[%s1609_s25 + $0x24] sm:$0x13 pattern:$0x76325410] }
  0x29   : > { %1448 = vmatmul.mubr.msk.bf16.vlgmr.msra.gmra.mrb[0].mxu0 %vm317_vm5, %v304_v45  ;;  %v617_v51 = vor.u32 %v616_v47, %v613_v44  ;;  %v629_v57 = vcombine.low %v581_v41, %v1671_v49  ;;  %v876_v58 = vshrl.u32 %v1381_v50, 16  ;;  %v879_v59 = vshll.u32 %v1381_v50, 16  ;;  %v1541_v30 = vld [vmem:[%s1609_s25 + $0xc] ss:$8 sps:$4 sm:$0x33]  }
  0x2a   : > { %1460 = vmatpush3.bf16.msra.mxu0 %v1525_v40  ;;  %1463 = vmatprep.mubr.msk.bf16.mxu0 %vm1552_vm0, %v1551_v1  ;;  %v1686_v60 = vsel %vm1628_vm8, %v604_v46, %v608_v43  ;;  %v885_v62 = vshll.u32 %v832_v54, 16  ;;  %v469_v5 = vcombine.low %v461_v52, %v468_v53  ;;  %v894_v13 = vcombine.low %v1643_v56, %v1652_v8  ;;  %v1533_v56 = vld [vmem:[%s1775_s1 + $0x48] sm:$0xff]   ;;  %v1538_v41 = vld [vmem:[%s1775_s1 + $0x70] sm:$0xff]  }
  0x2b   : > { %1461 = vmatprep.subr.bf16.mxu0 %v1551_v1  ;;  %v618_v61 = vrot.slane %v617_v51, 2  ;;  %v878_v2 = vrot.slane %v876_v58, 6  ;;  %v881_v3 = vrot.slane %v879_v59, 7  ;;  %v637_v11 = vrot.slane %v629_v57, %v1612_v10  ;;  %v1539_v45 = vld [vmem:[%s1775_s1 + $0x68] sm:$0xff]  }
  0x2c   : > { %v887_v7 = vrot.slane %v885_v62, 7  ;;  %v1097_v17 = vcombine.high %v1407_v14, %v1407_v14  ;;  %v1141_v18 = vshrl.u32 %v1407_v14, 16  ;;  %v726_v20 = vrot.slane %v1535_v63, %v1612_v10 }
  0x2d   : > { %v1692_v4 = vsel %vm1628_vm8, %v618_v61, %v622_v48  ;;  %v882_v12 = vor.u32 %v881_v3, %v878_v2  ;;  %v733_v22 = vrot.slane %v1536_v0, %v1612_v10  ;;  %v1144_v23 = vshll.u32 %v1407_v14, 16  ;;  %v1540_v48 = vld [vmem:[%s1775_s1 + $0x78] sm:$0xff]  }
  0x2e   : > { %1462 = vmatpush3.bf16.msra.mxu0 %v1527_v55  ;;  %v630_v9 = vcombine.low %v1686_v60, %v1692_v4  ;;  %v1143_v25 = vrot.slane %v1141_v18, 6  ;;  %v1150_v26 = vshll.u32 %v1097_v17, 16  ;;  %v902_v29 = vrot.slane %v894_v13, %v1612_v10 }
  0x2f   : > { %1475 = vmatprep.subr.bf16.mxu0 %v1551_v1  ;;  %v883_v16 = vrot.slane %v882_v12, 2  ;;  %v1146_v28 = vrot.slane %v1144_v23, 7  ;;  %v734_v33 = vcombine.low %v726_v20, %v733_v22  ;;  %v1159_v40 = vcombine.low %v1671_v49, %v1686_v60 }
  0x30   : > { %v644_v15 = vrot.slane %v630_v9, %v1612_v10  ;;  %v1152_v35 = vrot.slane %v1150_v26, 7  ;;  %v991_v43 = vrot.slane %v1541_v30, %v1612_v10 }
  0x31   : > { %1464 = vmatmul.mubr.msk.bf16.vlgmr.msra.gmra.mrb[4].mxu0 %vm317_vm5, %v469_v5  ;;  %v888_v8 = vsel %vm1628_vm8, %v883_v16, %v887_v7  ;;  %v1147_v34 = vor.u32 %v1146_v28, %v1143_v25  ;;  %v1167_v38 = vrot.slane %v1159_v40, %v1612_v10 }
  0x32   : > { %v645_v24 = vcombine.low %v637_v11, %v644_v15  ;;  %1476 = vmatpush3.bf16.msra.mxu0 %v1531_v6  ;;  %1479 = vmatprep.mubr.msk.bf16.mxu0 %vm1552_vm0, %v1551_v1  ;;  %v895_v27 = vcombine.low %v1657_v21, %v888_v8  ;;  %v1542_v21 = vld [vmem:[%s1609_s25 + $0x1c] ss:$8 sps:$4 sm:$0x33]  }
  0x33   : > { %1477 = vmatprep.subr.bf16.mxu0 %v1551_v1  ;;  %v1148_v37 = vrot.slane %v1147_v34, 2  ;;  %v998_v44 = vrot.slane %v1542_v21, %v1612_v10 }
  0x34   : > { %1472 = vmatmul.mubr.msk.bf16.vlgmr.msra.gmra.mrb[4].mxu1 %vm317_vm5, %v645_v24  ;;  %v909_v32 = vrot.slane %v895_v27, %v1612_v10  ;;  %v1415_v27 = vld [vmem:[%s1776_s2] ss:$0 sm:$0xff] }
  0x35   : > { %1484 = vmatpush3.bf16.msra.mxu1 %v1532_v19  ;;  %1487 = vmatprep.mubr.msk.bf16.mxu1 %vm1552_vm0, %v1551_v1  ;;  %v1153_v42 = vsel %vm1628_vm8, %v1148_v37, %v1152_v35  ;;  %v999_v49 = vcombine.low %v991_v43, %v998_v44 }
  0x36   : > { %1485 = vmatprep.subr.bf16.mxu1 %v1551_v1  ;;  %1478 = vmatpush3.bf16.msra.mxu0 %v1533_v56  ;;  %v910_v39 = vcombine.low %v902_v29, %v909_v32  ;;  %v1160_v46 = vcombine.low %v1692_v4, %v1153_v42 }
  0x37   : > { %1491 = vmatprep.subr.bf16.mxu0 %v1551_v1 }
  0x38   : > { %v1174_v47 = vrot.slane %v1160_v46, %v1612_v10 }
  0x39   : > { %1486 = vmatpush3.bf16.msra.mxu1 %v1534_v31  ;;  %1480 = vmatmul.mubr.msk.bf16.vlgmr.msra.gmra.mrb[8].mxu0 %vm317_vm5, %v734_v33 }
  0x3a   : > { %1499 = vmatprep.subr.bf16.mxu1 %v1551_v1  ;;  %1492 = vmatpush3.bf16.msra.mxu0 %v1537_v36  ;;  %v1175_v50 = vcombine.low %v1167_v38, %v1174_v47 }
  0x3b   : > { %1493 = vmatprep.subr.bf16.mxu0 %v1551_v1  ;;  %1495 = vmatprep.mubr.msk.bf16.mxu0 %vm1552_vm0, %v1551_v1 }
  0x3c   : > { %1488 = vmatmul.mubr.msk.bf16.vlgmr.msra.gmra.mrb[8].mxu1 %vm317_vm5, %v910_v39 }
  0x3d   : > { %1500 = vmatpush3.bf16.msra.mxu1 %v1538_v41  ;;  %1503 = vmatprep.mubr.msk.bf16.mxu1 %vm1552_vm0, %v1551_v1 }
  0x3e   : > { %1501 = vmatprep.subr.bf16.mxu1 %v1551_v1  ;;  %1494 = vmatpush3.bf16.msra.mxu0 %v1539_v45 }
  0x41   : > { %1502 = vmatpush3.bf16.msra.mxu1 %v1540_v48  ;;  %1496 = vmatmul.mubr.msk.bf16.vlgmr.msra.gmra.mrb[12].mxu0 %vm317_vm5, %v999_v49 }
  0x44   : > { %1504 = vmatmul.mubr.msk.bf16.vlgmr.msra.gmra.mrb[12].mxu1 %vm317_vm5, %v1175_v50 }
  0xe9   : > { %v432_v51 = vpop.f32.mrb[0].mxu1 }
  0xea   : > { %v1457_v10 = vpop.f32.mrb[1].mxu1 }
  0xeb   : > { %v435_v52 = vpop.f32.mrb[2].mxu1 }
  0xec   : > { %v1458_v53 = vpop.f32.mrb[3].mxu1 }
  0xfc   : > { %v355_v54 = vpop.f32.mrb[0].mxu0 }
  0xfd   : > { %v433_v55 = vadd.f32 %v432_v51, %v355_v54  ;;  %v1449_v57 = vpop.f32.mrb[1].mxu0 }
  0xfe   : > { %v358_v58 = vpop.f32.mrb[2].mxu0 }
  0xff   : > { %v436_v59 = vadd.f32 %v435_v52, %v358_v58  ;;  %v1450_v60 = vpop.f32.mrb[3].mxu0 }
 0x104   : > { %v519_v61 = vpop.f32.mrb[4].mxu0 }
 0x105   : > { %v526_v62 = vadd.f32 %v519_v61, %v433_v55  ;;  %v1465_v1 = vpop.f32.mrb[5].mxu0 }
 0x106   : > { %v522_v63 = vpop.f32.mrb[6].mxu0 }
 0x107   : > { %v695_v0 = vpop.f32.mrb[4].mxu1  ;;  %v527_v2 = vadd.f32 %v522_v63, %v436_v59  ;;  %v1466_v3 = vpop.f32.mrb[7].mxu0 }
 0x108   : > { %v1473_v4 = vpop.f32.mrb[5].mxu1  ;;  %v702_v5 = vadd.f32 %v695_v0, %v526_v62 }
 0x109   : > { %v698_v6 = vpop.f32.mrb[6].mxu1 }
 0x10a   : > { %v1474_v7 = vpop.f32.mrb[7].mxu1  ;;  %v703_v9 = vadd.f32 %v698_v6, %v527_v2 }
 0x10c   : > { %v784_v11 = vpop.f32.mrb[8].mxu0 }
 0x10d   : > { %v791_v12 = vadd.f32 %v784_v11, %v702_v5  ;;  %v1481_v13 = vpop.f32.mrb[9].mxu0 }
 0x10e   : > { %v787_v14 = vpop.f32.mrb[10].mxu0 }
 0x10f   : > { %v960_v15 = vpop.f32.mrb[8].mxu1  ;;  %v792_v16 = vadd.f32 %v787_v14, %v703_v9  ;;  %v1482_v17 = vpop.f32.mrb[11].mxu0 }
 0x110   : > { %v1489_v18 = vpop.f32.mrb[9].mxu1  ;;  %v967_v19 = vadd.f32 %v960_v15, %v791_v12 }
 0x111   : > { %v963_v20 = vpop.f32.mrb[10].mxu1 }
 0x112   : > { %v1490_v22 = vpop.f32.mrb[11].mxu1  ;;  %v968_v23 = vadd.f32 %v963_v20, %v792_v16 }
 0x114   : > { %v1049_v24 = vpop.f32.mrb[12].mxu0 }
 0x115   : > { %v1056_v56 = vadd.f32 %v1049_v24, %v967_v19  ;;  %v1497_v8 = vpop.f32.mrb[13].mxu0 }
 0x116   : > { %v1052_v25 = vpop.f32.mrb[14].mxu0 }
 0x117   : > { %v1225_v26 = vpop.f32.mrb[12].mxu1  ;;  %v1057_v28 = vadd.f32 %v1052_v25, %v968_v23  ;;  %v1498_v29 = vpop.f32.mrb[15].mxu0 }
 0x118   : > { %v1232_v30 = vadd.f32 %v1225_v26, %v1056_v56  ;;  %v1505_v31 = vpop.f32.mrb[13].mxu1 }
 0x119   : > { %v1228_v32 = vpop.f32.mrb[14].mxu1 }
 0x11a   : > { %v1241_v33 = vadd.f32 %v1415_v27, %v1232_v30  ;;  %v1233_v34 = vadd.f32 %v1228_v32, %v1057_v28  ;;  %v1506_v35 = vpop.f32.mrb[15].mxu1 }
 0x11c   : > { %v1243_v21 = vmax.f32 %v1241_v33, 0.0  ;;  %v1242_v36 = vadd.f32 %v1415_v27, %v1233_v34 }
 0x11e   : > { %v1247_v37 = vcombine.high %v1243_v21, %v1243_v21  ;;  %v1251_v39 = vpack.c.bf16 %v1243_v21, %v1243_v21  ;;  %v1244_v40 = vmax.f32 %v1242_v36, 0.0 }
 0x120   : > { %v1252_v41 = vpack.c.bf16 %v1247_v37, %v1247_v37  ;;  %1256 = vst.msk [vmem:[%s170_s30] sm:$0x3] %vm1255_vm9, %v1251_v39  ;;  %v1248_v42 = vcombine.high %v1244_v40, %v1244_v40  ;;  %v1253_v43 = vpack.c.bf16 %v1244_v40, %v1244_v40 }
 0x122   : > { %1257 = vst.msk [vmem:[%s170_s30 + $0x2] sm:$0x3] %vm1255_vm9, %v1252_v41  ;;  %v1254_v44 = vpack.c.bf16 %v1248_v42, %v1248_v42  ;;  %1258 = vst.msk [vmem:[%s170_s30 + $0x4] sm:$0x3] %vm1255_vm9, %v1253_v43 }
 0x124   : > { %1259 = vst.msk [vmem:[%s170_s30 + $0x6] sm:$0x3] %vm1255_vm9, %v1254_v44 }
 0x125 PF: > { %s13_s12 = sadd.s32 1, %s1549_s12  }
 0x126   : > { %p10_p4 = scmp.ge.s32.totalorder %s13_s12, 4  }
 0x128   :  { %12 = sbr.rel (!%p10_p4) target bundleno = 1 (0x1), region = 72 }

// kernel: _lambda_.7
= control target key start
LH: loop header
LB: loop body
LE: loop exit
PB: predicated region body
PF: predicated region fallthrough
CT: control target
= control target key end

     0   :  { %s1839_s12 = smov 0   ;;  %s2083_s0 = inlined_call_operand.vmem [shape: bf16[2,4,4,32], index: 0, kind: input, shape index: {}]   ;;  %s2084_s1 = inlined_call_operand.vmem [shape: bf16[9,32,32], index: 1, kind: input, shape index: {}]   ;;  %s2085_s2 = inlined_call_operand.vmem [shape: f32[1,32], index: 2, kind: input, shape index: {}]   ;;  %s2086_s3 = inlined_call_operand.vmem [shape: bf16[2,4,4,32], index: 3, kind: output, shape index: {}]  }
   0x1 LB: > { %s1553_s13 = sadd.s32 4294967295, %s1813_s12   ;;  %p1557_p0 = scmp.ge.s32.totalorder %s1813_s12, 1  ;;  %s1813_s12 = sphi %s1839_s12, %s13_s12  }
   0x2   : > { %p137_p1 = scmp.lt.s32.totalorder %s1813_s12, 3 }
   0x4   : > { %p138_p2 = pnand %p1557_p0, %p137_p1 }
   0x5   : > { %v1777_v0 = vld [vmem:[%s2084_s1 + $0x10] sm:$0xff] (!%p138_p2)   ;;  %v1815_v1 = vmov (!%p138_p2), 0.0   ;;  %v1778_v2 = vld [vmem:[%s2084_s1] sm:$0xff] (!%p138_p2)   ;;  %v1779_v3 = vld [vmem:[%s2084_s1 + $0x18] sm:$0xff] (!%p138_p2)   ;;  %vm1816_vm0 = vmmov (!%p138_p2), 0   ;;  %p161_p3 = scmp.lt.s32.totalorder (!%p138_p2), %s1553_s13, 1  ;;  %v384_v20 = vlaneseq (!%p138_p2) }
   0x6   : > { %141 = sbr.rel (%p138_p2) target bundleno = 306 (0x132), region = 32  ;;  %1693 = vmatprep.subr.bf16.mxu0 (!%p138_p2), %v1815_v1  ;;  %1701 = vmatprep.subr.bf16.mxu1 (!%p138_p2), %v1815_v1  ;;  %v1780_v4 = vld [vmem:[%s2084_s1 + $0x8] sm:$0xff] (!%p138_p2)   ;;  %vm172_vm1 = vcmask (!%p138_p2), 256000   ;;  %v1817_v5 = vmov (!%p138_p2), 0   ;;  %vm249_vm2 = vsmask.f32 (!%p138_p2), 2306 }
   0x7   : > { %1694 = vmatpush3.bf16.msra.mxu0 (!%p138_p2), %v1777_v0  ;;  %1697 = vmatprep.mubr.msk.bf16.mxu0 (!%p138_p2), %vm1816_vm0, %v1815_v1  ;;  %173 = vst.msk [vmem:[#allocation2] sm:$0x7] (!%p138_p2), %vm172_vm1, %v1817_v5  ;;  %174 = vst.msk [vmem:[#allocation2 + $0x4] sm:$0x7] (!%p138_p2), %vm172_vm1, %v1817_v5  ;;  %vm311_vm3 = vsmask.f32 (!%p138_p2), 1280 }
   0x8   : > { %1702 = vmatpush3.bf16.msra.mxu1 (!%p138_p2), %v1778_v2  ;;  %1695 = vmatprep.subr.bf16.mxu0 (!%p138_p2), %v1815_v1  ;;  %175 = vst.msk [vmem:[#allocation2 + $0x8] sm:$0x7] (!%p138_p2), %vm172_vm1, %v1817_v5  ;;  %176 = vst.msk [vmem:[#allocation2 + $0xc] sm:$0x7] (!%p138_p2), %vm172_vm1, %v1817_v5  ;;  %vm312_vm4 = vsmask.f32 (!%p138_p2), 3336 }
   0x9   : > { %1703 = vmatprep.subr.bf16.mxu1 (!%p138_p2), %v1815_v1  ;;  %1705 = vmatprep.mubr.msk.bf16.mxu1 (!%p138_p2), %vm1816_vm0, %v1815_v1  ;;  %177 = vst.msk [vmem:[#allocation2 + $0x10] sm:$0x7] (!%p138_p2), %vm172_vm1, %v1817_v5  ;;  %178 = vst.msk [vmem:[#allocation2 + $0x14] sm:$0x7] (!%p138_p2), %vm172_vm1, %v1817_v5  ;;  %vm314_vm6 = vsmask.f32 (!%p138_p2), 5392 }
   0xa   : > { %vm1890_vm5 = vmand (!%p138_p2), %vm172_vm1, %vm249_vm2  ;;  %v1818_v26 = vmov (!%p138_p2), 1983009808   ;;  %vm316_vm7 = vsmask.f32 (!%p138_p2), 7448  ;;  %v385_v34 = vshrl.u32 (!%p138_p2), %v384_v20, 7  ;;  %vm570_vm8 = vcmask (!%p138_p2), 1040384  }
   0xb   : > { %1696 = vmatpush3.bf16.msra.mxu0 (!%p138_p2), %v1779_v3  ;;  %v382_v27 = vunpack.c.l.s4 (!%p138_p2), %v1818_v26  ;;  %vm571_vm9 = vcmask (!%p138_p2), 1042434   ;;  %vm573_vm10 = vcmask (!%p138_p2), 1044484   ;;  %vm313_vm11 = vmor (!%p138_p2), %vm311_vm3, %vm312_vm4  ;;  %vm575_vm12 = vcmask (!%p138_p2), 1046534  }
   0xc   : > { %1704 = vmatpush3.bf16.msra.mxu1 (!%p138_p2), %v1780_v4  ;;  %1709 = vmatprep.subr.bf16.mxu0 (!%p138_p2), %v1815_v1  ;;  %vm315_vm13 = vmor (!%p138_p2), %vm313_vm11, %vm314_vm6  ;;  %vm408_vm14 = vcmask (!%p138_p2), 261120  }
   0xd   : > { %s2096_s13 = smov (!%p161_p3, %s1553_s13), 1  ;;  %1717 = vmatprep.subr.bf16.mxu1 %v1815_v1  ;;  %v383_v42 = vunpack.c.0.s8 %v382_v27  ;;  %vm1914_vm15 = vmor %vm315_vm13, %vm316_vm7 }
   0xe   : > { %s1664_s22 = sshll.u32 %s2096_s13, 3  ;;  %v251_v18 = vld [vmem:[#allocation2 + $0x4] sm:$0x7]  ;;  %vm572_vm1 = vmor %vm570_vm8, %vm571_vm9 }
   0xf   : > { %s1882_s25 = scalar_lea.vmem %s2083_s0, %s1664_s22  ;;  %v254_v19 = vld [vmem:[#allocation2 + $0x8] sm:$0x7]  ;;  %v257_v23 = vld [vmem:[#allocation2 + $0xc] sm:$0x7]  ;;  %v1911_v56 = vsub.s32 %v383_v42, %v385_v34  ;;  %vm1925_vm2 = vmor %vm572_vm1, %vm573_vm10  ;;  %s170_s7 = scalar_lea.vmem %s2086_s3, %s1664_s22 }
  0x10   : > { %v1562_v6 = vld.sshfl [vmem:[%s1882_s25] sm:$0x3 pattern:$0x76325410]  ;;  %v260_v57 = vld [vmem:[#allocation2 + $0x10] sm:$0x7]  ;;  %vm1944_vm3 = vmor %vm1925_vm2, %vm575_vm12 }
  0x11   : > { %v1563_v7 = vld.sshfl [vmem:[%s1882_s25 + $0x2] sm:$0x3 pattern:$0x76325410]  ;;  %v216_v8 = vshrl.u32 %v1562_v6, 16  ;;  %v219_v9 = vshll.u32 %v1562_v6, 16 }
  0x12   : > { %v1564_v10 = vld.sshfl [vmem:[%s1882_s25 + $0x4] sm:$0x3 pattern:$0x76325410]  ;;  %v223_v11 = vshrl.u32 %v1563_v7, 16  ;;  %v226_v12 = vshll.u32 %v1563_v7, 16 }
  0x13   : > { %v218_v13 = vrot.slane %v216_v8, 7  ;;  %v230_v14 = vshrl.u32 %v1564_v10, 16  ;;  %v233_v15 = vshll.u32 %v1564_v10, 16 }
  0x14   : > { %v225_v16 = vrot.slane %v223_v11, 7  ;;  %v1566_v25 = vld.sshfl [vmem:[#allocation2] sm:$0x13 pattern:$0x76325410] }
  0x15   : > { %v221_v21 = vor.u32 %v219_v9, %v218_v13  ;;  %v232_v22 = vrot.slane %v230_v14, 7  ;;  %v286_v30 = vcombine.high %v1566_v25, %v1566_v25  ;;  %v319_v31 = vshrl.u32 %v1566_v25, 16  ;;  %v1900_v38 = vld.sshfl [vmem:[#allocation2] sm:$0x12 pattern:$0x76325410] }
  0x16   : > { %v228_v24 = vor.u32 %v226_v12, %v225_v16  ;;  %v322_v33 = vshll.u32 %v1566_v25, 16  ;;  %v545_v40 = vcombine.high %v1900_v38, %v1900_v38  ;;  %v1584_v43 = vrot.slane %v1900_v38, 9  ;;  %v1565_v44 = vld.sshfl [vmem:[%s1882_s25 + $0x6] sm:$0x3 pattern:$0x76325410] }
  0x17   : > { %v235_v28 = vor.u32 %v233_v15, %v232_v22  ;;  %v252_v29 = vsel %vm1890_vm5, %v221_v21, %v251_v18  ;;  %v321_v36 = vrot.slane %v319_v31, 6  ;;  %v328_v37 = vshll.u32 %v286_v30, 16 }
  0x18   : > { %253 = vst [vmem:[#allocation2 + $0x4] sm:$0x7] %v252_v29  ;;  %v255_v32 = vsel %vm1890_vm5, %v228_v24, %v254_v19  ;;  %v324_v39 = vrot.slane %v322_v33, 7  ;;  %v1908_v46 = vrot.slane %v545_v40, 7  ;;  %v237_v47 = vshrl.u32 %v1565_v44, 16 }
  0x19   : > { %256 = vst [vmem:[#allocation2 + $0x8] sm:$0x7] %v255_v32  ;;  %v258_v35 = vsel %vm1890_vm5, %v235_v28, %v257_v23  ;;  %v330_v41 = vrot.slane %v328_v37, 7  ;;  %v240_v48 = vshll.u32 %v1565_v44, 16  ;;  %v1784_v28 = vld [vmem:[%s2084_s1 + $0x30] sm:$0xff]   ;;  %v1800_v37 = vld [vmem:[%s2084_s1 + $0x88] sm:$0xff]  }
  0x1a   : > { %259 = vst [vmem:[#allocation2 + $0xc] sm:$0x7] %v258_v35  ;;  %v325_v45 = vor.u32 %v324_v39, %v321_v36  ;;  %v239_v50 = vrot.slane %v237_v47, 7 }
  0x1b   : > { %v1638_v23 = vld.sshfl [vmem:[#allocation2 + $0x14] sm:$0x13 pattern:$0x76325410] }
  0x1c   : > { %v326_v49 = vrot.slane %v325_v45, 2  ;;  %v242_v62 = vor.u32 %v240_v48, %v239_v50  ;;  %v580_v50 = vsel %vm1944_vm3, %v1584_v43, %v1908_v46  ;;  %v1783_v43 = vld [vmem:[%s2084_s1 + $0x20] sm:$0xff]  }
  0x1e   : > { %v261_v19 = vsel %vm1890_vm5, %v242_v62, %v260_v57  ;;  %v331_v20 = vsel %vm1914_vm15, %v326_v49, %v330_v41  ;;  %v1786_v49 = vld [vmem:[%s2084_s1 + $0x38] sm:$0xff]  }
  0x1f   : > { %v1567_v51 = vld.sshfl [vmem:[#allocation2 + $0x4] sm:$0x13 pattern:$0x76325410]  ;;  %262 = vst [vmem:[#allocation2 + $0x10] sm:$0x7] %v261_v19 }
  0x20   : > { %v1568_v52 = vld.sshfl [vmem:[#allocation2 + $0x8] sm:$0x13 pattern:$0x76325410]  ;;  %v294_v53 = vcombine.high %v1567_v51, %v1567_v51  ;;  %v333_v54 = vshrl.u32 %v1567_v51, 16  ;;  %v336_v55 = vshll.u32 %v1567_v51, 16 }
  0x21   : > { %v1569_v58 = vld.sshfl [vmem:[#allocation2 + $0xc] sm:$0x13 pattern:$0x76325410]  ;;  %v302_v59 = vcombine.high %v1568_v52, %v1568_v52  ;;  %v347_v60 = vshrl.u32 %v1568_v52, 16  ;;  %v350_v61 = vshll.u32 %v1568_v52, 16 }
  0x22   : > { %v310_v63 = vcombine.high %v1569_v58, %v1569_v58  ;;  %v335_v2 = vrot.slane %v333_v54, 6  ;;  %v338_v3 = vrot.slane %v336_v55, 7  ;;  %v342_v4 = vshll.u32 %v294_v53, 16 }
  0x23   : > { %v349_v5 = vrot.slane %v347_v60, 6  ;;  %v352_v6 = vrot.slane %v350_v61, 7  ;;  %v356_v7 = vshll.u32 %v302_v59, 16  ;;  %v361_v8 = vshrl.u32 %v1569_v58, 16 }
  0x24   : > { %v339_v9 = vor.u32 %v338_v3, %v335_v2  ;;  %v344_v10 = vrot.slane %v342_v4, 7  ;;  %v364_v11 = vshll.u32 %v1569_v58, 16  ;;  %v370_v12 = vshll.u32 %v310_v63, 16 }
  0x25   : > { %v1801_v13 = vld.sshfl [vmem:[#allocation2] sm:$0xf pattern:$0x76325410]  ;;  %v353_v14 = vor.u32 %v352_v6, %v349_v5  ;;  %v358_v15 = vrot.slane %v356_v7, 7  ;;  %v363_v16 = vrot.slane %v361_v8, 6 }
  0x26   : > { %v1802_v18 = vld.sshfl [vmem:[#allocation2 + $0x8] sm:$0xf pattern:$0x76325410]  ;;  %v340_v21 = vrot.slane %v339_v9, 2  ;;  %v366_v22 = vrot.slane %v364_v11, 7 }
  0x27   : > { %v354_v24 = vrot.slane %v353_v14, 2  ;;  %v372_v25 = vrot.slane %v370_v12, 7  ;;  %v1581_v26 = vld.sshfl [vmem:[#allocation2 + $0x4] sm:$0x12 pattern:$0x76325410]  ;;  %v473_v34 = vcombine.low %v1801_v13, %v1802_v18 }
  0x28   : > { %v1931_v27 = vsel %vm1914_vm15, %v340_v21, %v344_v10  ;;  %v367_v17 = vor.u32 %v366_v22, %v363_v16  ;;  %v1582_v29 = vld.sshfl [vmem:[#allocation2 + $0x8] sm:$0x12 pattern:$0x76325410]  ;;  %v553_v30 = vcombine.high %v1581_v26, %v1581_v26  ;;  %v1585_v31 = vrot.slane %v1581_v26, 9  ;;  %v1790_v6 = vld [vmem:[%s2084_s1 + $0x50] sm:$0xff]  }
  0x29   : > { %v1938_v32 = vsel %vm1914_vm15, %v354_v24, %v358_v15  ;;  %v379_v33 = vcombine.low %v331_v20, %v1931_v27  ;;  %v1583_v35 = vld.sshfl [vmem:[#allocation2 + $0xc] sm:$0x12 pattern:$0x76325410]  ;;  %v561_v36 = vcombine.high %v1582_v29, %v1582_v29  ;;  %v1586_v42 = vrot.slane %v1582_v29, 9  ;;  %1706 = vmatmul.mubr.msk.bf16.vlgmr.msra.gmra.mrb[0].mxu1 %vm408_vm14, %v473_v34  ;;  %v1792_v16 = vld [vmem:[%s2084_s1 + $0x58] sm:$0xff]  }
  0x2a   : > { %v368_v39 = vrot.slane %v367_v17, 2  ;;  %v569_v40 = vcombine.high %v1583_v35, %v1583_v35  ;;  %v583_v41 = vrot.slane %v553_v30, 7  ;;  %v1803_v44 = vld.sshfl [vmem:[#allocation2 + $0x4] sm:$0xf pattern:$0x76325410]  ;;  %1718 = vmatpush3.bf16.msra.mxu1 %v1784_v28  ;;  %1721 = vmatprep.mubr.msk.bf16.mxu1 %vm1816_vm0, %v1815_v1  ;;  %v862_v29 = vcombine.low %v1931_v27, %v1938_v32 }
  0x2b   : > { %v587_v45 = vrot.slane %v561_v36, 7  ;;  %v1587_v47 = vrot.slane %v1583_v35, 9  ;;  %v387_v54 = vrot.slane %v379_v33, %v1911_v56  ;;  %1719 = vmatprep.subr.bf16.mxu1 %v1815_v1  ;;  %v1804_v55 = vld.sshfl [vmem:[#allocation2 + $0xc] sm:$0xf pattern:$0x76325410] }
  0x2c   : > { %v1951_v48 = vsel %vm1914_vm15, %v368_v39, %v372_v25  ;;  %v584_v51 = vsel %vm1944_vm3, %v1585_v31, %v583_v41  ;;  %v591_v52 = vrot.slane %v569_v40, 7  ;;  %v1605_v57 = vld.sshfl [vmem:[#allocation2 + $0x10] sm:$0x13 pattern:$0x76325410]  ;;  %v702_v5 = vcombine.low %v1803_v44, %v1804_v55  ;;  %v1785_v13 = vld [vmem:[%s2084_s1 + $0x28] sm:$0xff]  }
  0x2d   : > { %v380_v53 = vcombine.low %v1938_v32, %v1951_v48  ;;  %v588_v38 = vsel %vm1944_vm3, %v1586_v42, %v587_v45  ;;  %v598_v59 = vcombine.low %v580_v50, %v584_v51  ;;  %v1616_v61 = vld.sshfl [vmem:[#allocation2 + $0x10] sm:$0x12 pattern:$0x76325410]  ;;  %v800_v62 = vcombine.high %v1605_v57, %v1605_v57  ;;  %v1787_v31 = vld [vmem:[%s2084_s1 + $0x40] sm:$0xff]   ;;  %v1796_v50 = vld [vmem:[%s2084_s1 + $0x78] sm:$0xff]  }
  0x2e   : > { %v592_v46 = vsel %vm1944_vm3, %v1587_v47, %v591_v52  ;;  %1720 = vmatpush3.bf16.msra.mxu1 %v1786_v49  ;;  %v844_v63 = vshrl.u32 %v1605_v57, 16  ;;  %v847_v2 = vshll.u32 %v1605_v57, 16  ;;  %v976_v3 = vcombine.high %v1616_v61, %v1616_v61  ;;  %v1649_v27 = vld.sshfl [vmem:[#allocation2 + $0x14] sm:$0x12 pattern:$0x76325410] }
  0x2f   : > { %v1977_v58 = vrot.slane %v380_v53, %v1911_v56  ;;  %v599_v60 = vcombine.low %v588_v38, %v592_v46  ;;  %1733 = vmatprep.subr.bf16.mxu1 %v1815_v1  ;;  %v1620_v7 = vrot.slane %v1616_v61, 9  ;;  %v998_v8 = vcombine.low %v584_v51, %v588_v38  ;;  %v1794_v32 = vld [vmem:[%s2084_s1 + $0x70] sm:$0xff]   ;;  %v1791_v47 = vld [vmem:[%s2084_s1 + $0x48] sm:$0xff]   ;;  %v1793_v55 = vld [vmem:[%s2084_s1 + $0x60] sm:$0xff]  }
  0x30   : > { %v846_v9 = vrot.slane %v844_v63, 6  ;;  %v849_v10 = vrot.slane %v847_v2, 7  ;;  %v853_v11 = vshll.u32 %v800_v62, 16  ;;  %v991_v12 = vrot.slane %v976_v3, 7 }
  0x31   : > { %v395_v4 = vcombine.low %v387_v54, %v1977_v58  ;;  %v606_v14 = vrot.slane %v598_v59, %v1911_v56  ;;  %v1990_v15 = vrot.slane %v599_v60, %v1911_v56  ;;  %1722 = vmatmul.mubr.msk.bf16.vlgmr.msra.gmra.mrb[4].mxu1 %vm408_vm14, %v702_v5  ;;  %v1006_v22 = vrot.slane %v998_v8, %v1911_v56  ;;  %v1805_v53 = vld.sshfl [vmem:[#allocation2 + $0x8] sm:$0xf pattern:$0x76325410] }
  0x32   : > { %v850_v18 = vor.u32 %v849_v10, %v846_v9  ;;  %v855_v19 = vrot.slane %v853_v11, 7  ;;  %v2000_v20 = vsel %vm1944_vm3, %v1620_v7, %v991_v12  ;;  %1734 = vmatpush3.bf16.msra.mxu1 %v1790_v6  ;;  %1737 = vmatprep.mubr.msk.bf16.mxu1 %vm1816_vm0, %v1815_v1  ;;  %v1201_v25 = vcombine.high %v1638_v23, %v1638_v23  ;;  %v1806_v54 = vld.sshfl [vmem:[#allocation2 + $0x10] sm:$0xf pattern:$0x76325410]  ;;  %v1795_v59 = vld [vmem:[%s2084_s1 + $0x68] sm:$0xff]  }
  0x33   : > { %1698 = vmatmul.mubr.msk.bf16.vlgmr.msra.gmra.mrb[0].mxu0 %vm408_vm14, %v395_v4  ;;  %v999_v21 = vcombine.low %v592_v46, %v2000_v20  ;;  %1735 = vmatprep.subr.bf16.mxu1 %v1815_v1  ;;  %v1245_v26 = vshrl.u32 %v1638_v23, 16  ;;  %v1248_v17 = vshll.u32 %v1638_v23, 16  ;;  %v614_v28 = vcombine.low %v606_v14, %v1990_v15 }
  0x34   : > { %1710 = vmatpush3.bf16.msra.mxu0 %v1783_v43  ;;  %1713 = vmatprep.mubr.msk.bf16.mxu0 %vm1816_vm0, %v1815_v1  ;;  %v851_v24 = vrot.slane %v850_v18, 2  ;;  %v1254_v36 = vshll.u32 %v1201_v25, 16  ;;  %v870_v44 = vrot.slane %v862_v29, %v1911_v56  ;;  %v1377_v49 = vcombine.high %v1649_v27, %v1649_v27 }
  0x35   : > { %1711 = vmatprep.subr.bf16.mxu0 %v1815_v1  ;;  %v1013_v30 = vrot.slane %v999_v21, %v1911_v56  ;;  %v1247_v34 = vrot.slane %v1245_v26, 6  ;;  %v1250_v35 = vrot.slane %v1248_v17, 7  ;;  %v1653_v43 = vrot.slane %v1649_v27, 9 }
  0x36   : > { %v856_v33 = vsel %vm1914_vm15, %v851_v24, %v855_v19  ;;  %1736 = vmatpush3.bf16.msra.mxu1 %v1792_v16  ;;  %v1256_v42 = vrot.slane %v1254_v36, 7  ;;  %v1392_v46 = vrot.slane %v1377_v49, 7  ;;  %v1103_v61 = vcombine.low %v1805_v53, %v1806_v54 }
  0x37   : > { %v863_v39 = vcombine.low %v1951_v48, %v856_v33  ;;  %v1014_v40 = vcombine.low %v1006_v22, %v1013_v30  ;;  %1749 = vmatprep.subr.bf16.mxu1 %v1815_v1  ;;  %v1251_v41 = vor.u32 %v1250_v35, %v1247_v34 }
  0x38   : > { %1712 = vmatpush3.bf16.msra.mxu0 %v1785_v13  ;;  %v1393_v60 = vsel %vm1944_vm3, %v1653_v43, %v1392_v46 }
  0x39   : > { %1725 = vmatprep.subr.bf16.mxu0 %v1815_v1  ;;  %v877_v45 = vrot.slane %v863_v39, %v1911_v56  ;;  %v1252_v48 = vrot.slane %v1251_v41, 2  ;;  %1738 = vmatmul.mubr.msk.bf16.vlgmr.msra.gmra.mrb[8].mxu1 %vm408_vm14, %v1014_v40  ;;  %v1400_v62 = vcombine.low %v2000_v20, %v1393_v60 }
  0x3a   : > { %1750 = vmatpush3.bf16.msra.mxu1 %v1794_v32  ;;  %1753 = vmatprep.mubr.msk.bf16.mxu1 %vm1816_vm0, %v1815_v1 }
  0x3b   : > { %1714 = vmatmul.mubr.msk.bf16.vlgmr.msra.gmra.mrb[4].mxu0 %vm408_vm14, %v614_v28  ;;  %v1257_v51 = vsel %vm1914_vm15, %v1252_v48, %v1256_v42  ;;  %v878_v52 = vcombine.low %v870_v44, %v877_v45  ;;  %1751 = vmatprep.subr.bf16.mxu1 %v1815_v1  ;;  %v1414_v63 = vrot.slane %v1400_v62, %v1911_v56 }
  0x3c   : > { %1726 = vmatpush3.bf16.msra.mxu0 %v1787_v31  ;;  %1729 = vmatprep.mubr.msk.bf16.mxu0 %vm1816_vm0, %v1815_v1  ;;  %v1264_v38 = vcombine.low %v856_v33, %v1257_v51 }
  0x3d   : > { %1727 = vmatprep.subr.bf16.mxu0 %v1815_v1  ;;  %v1415_v2 = vcombine.low %v1990_v15, %v1414_v63 }
  0x3e   : > { %v1278_v57 = vrot.slane %v1264_v38, %v1911_v56  ;;  %1752 = vmatpush3.bf16.msra.mxu1 %v1796_v50 }
  0x40   : > { %1728 = vmatpush3.bf16.msra.mxu0 %v1791_v47  ;;  %v1279_v0 = vcombine.low %v1977_v58, %v1278_v57  ;;  %v1799_v58 = vld [vmem:[%s2084_s1 + $0x80] sm:$0xff]  }
  0x41   : > { %1741 = vmatprep.subr.bf16.mxu0 %v1815_v1 }
  0x42   : > { %1754 = vmatmul.mubr.msk.bf16.vlgmr.msra.gmra.mrb[12].mxu1 %vm408_vm14, %v1279_v0 }
  0x43   : > { %1730 = vmatmul.mubr.msk.bf16.vlgmr.msra.gmra.mrb[8].mxu0 %vm408_vm14, %v878_v52  ;;  %v1661_v52 = vld [vmem:[%s2085_s2] ss:$0 sm:$0xff] }
  0x44   : > { %1742 = vmatpush3.bf16.msra.mxu0 %v1793_v55  ;;  %1745 = vmatprep.mubr.msk.bf16.mxu0 %vm1816_vm0, %v1815_v1 }
  0x45   : > { %1743 = vmatprep.subr.bf16.mxu0 %v1815_v1 }
  0x48   : > { %1744 = vmatpush3.bf16.msra.mxu0 %v1795_v59 }
  0x49   : > { %1757 = vmatprep.subr.bf16.mxu0 %v1815_v1 }
  0x4b   : > { %1746 = vmatmul.mubr.msk.bf16.vlgmr.msra.gmra.mrb[12].mxu0 %vm408_vm14, %v1103_v61 }
  0x4c   : > { %1758 = vmatpush3.bf16.msra.mxu0 %v1799_v58  ;;  %1761 = vmatprep.mubr.msk.bf16.mxu0 %vm1816_vm0, %v1815_v1  ;;  %vm1493_vm0 = vcmask 254976  }
  0x4d   : > { %1759 = vmatprep.subr.bf16.mxu0 %v1815_v1 }
  0x50   : > { %1760 = vmatpush3.bf16.msra.mxu0 %v1800_v37 }
  0x53   : > { %1762 = vmatmul.mubr.msk.bf16.vlgmr.msra.gmra.mrb[16].mxu0 %vm408_vm14, %v1415_v2 }
  0xfc   : > { %v523_v3 = vpop.f32.mrb[0].mxu1 }
  0xfd   : > { %v1707_v4 = vpop.f32.mrb[1].mxu1 }
  0xfe   : > { %v526_v5 = vpop.f32.mrb[2].mxu1 }
  0xff   : > { %v1708_v6 = vpop.f32.mrb[3].mxu1 }
 0x104   : > { %v752_v7 = vpop.f32.mrb[4].mxu1 }
 0x105   : > { %v1723_v10 = vpop.f32.mrb[5].mxu1 }
 0x106   : > { %v446_v56 = vpop.f32.mrb[0].mxu0  ;;  %v755_v12 = vpop.f32.mrb[6].mxu1 }
 0x107   : > { %v524_v8 = vadd.f32 %v523_v3, %v446_v56  ;;  %v1699_v9 = vpop.f32.mrb[1].mxu0  ;;  %v1724_v16 = vpop.f32.mrb[7].mxu1 }
 0x108   : > { %v449_v11 = vpop.f32.mrb[2].mxu0 }
 0x109   : > { %v527_v13 = vadd.f32 %v526_v5, %v449_v11  ;;  %v1700_v14 = vpop.f32.mrb[3].mxu0 }
 0x10c   : > { %v1064_v20 = vpop.f32.mrb[8].mxu1 }
 0x10d   : > { %v1739_v24 = vpop.f32.mrb[9].mxu1 }
 0x10e   : > { %v664_v1 = vpop.f32.mrb[4].mxu0  ;;  %v1067_v25 = vpop.f32.mrb[10].mxu1 }
 0x10f   : > { %v671_v18 = vadd.f32 %v664_v1, %v524_v8  ;;  %v1715_v15 = vpop.f32.mrb[5].mxu0  ;;  %v1740_v17 = vpop.f32.mrb[11].mxu1 }
 0x110   : > { %v667_v19 = vpop.f32.mrb[6].mxu0 }
 0x111   : > { %v672_v21 = vadd.f32 %v667_v19, %v527_v13  ;;  %v759_v22 = vadd.f32 %v752_v7, %v671_v18  ;;  %v1716_v23 = vpop.f32.mrb[7].mxu0 }
 0x113   : > { %v760_v26 = vadd.f32 %v755_v12, %v672_v21 }
 0x115   : > { %v1329_v33 = vpop.f32.mrb[12].mxu1 }
 0x116   : > { %v928_v28 = vpop.f32.mrb[8].mxu0  ;;  %v1755_v39 = vpop.f32.mrb[13].mxu1 }
 0x117   : > { %v935_v29 = vadd.f32 %v928_v28, %v759_v22  ;;  %v1731_v30 = vpop.f32.mrb[9].mxu0  ;;  %v1332_v40 = vpop.f32.mrb[14].mxu1 }
 0x118   : > { %v931_v31 = vpop.f32.mrb[10].mxu0  ;;  %v1756_v32 = vpop.f32.mrb[15].mxu1 }
 0x119   : > { %v936_v34 = vadd.f32 %v931_v31, %v760_v26  ;;  %v1071_v35 = vadd.f32 %v1064_v20, %v935_v29  ;;  %v1732_v36 = vpop.f32.mrb[11].mxu0 }
 0x11b   : > { %v1072_v27 = vadd.f32 %v1067_v25, %v936_v34 }
 0x11e   : > { %v1153_v41 = vpop.f32.mrb[12].mxu0 }
 0x11f   : > { %v1160_v42 = vadd.f32 %v1153_v41, %v1071_v35  ;;  %v1747_v44 = vpop.f32.mrb[13].mxu0 }
 0x120   : > { %v1156_v45 = vpop.f32.mrb[14].mxu0 }
 0x121   : > { %v1161_v47 = vadd.f32 %v1156_v45, %v1072_v27  ;;  %v1336_v48 = vadd.f32 %v1329_v33, %v1160_v42  ;;  %v1748_v49 = vpop.f32.mrb[15].mxu0 }
 0x123   : > { %v1337_v50 = vadd.f32 %v1332_v40, %v1161_v47 }
 0x126   : > { %v1465_v51 = vpop.f32.mrb[16].mxu0 }
 0x127   : > { %v1472_v53 = vadd.f32 %v1465_v51, %v1336_v48  ;;  %v1763_v54 = vpop.f32.mrb[17].mxu0 }
 0x128   : > { %v1468_v38 = vpop.f32.mrb[18].mxu0 }
 0x129   : > { %v1481_v55 = vadd.f32 %v1661_v52, %v1472_v53  ;;  %v1473_v43 = vadd.f32 %v1468_v38, %v1337_v50  ;;  %v1764_v46 = vpop.f32.mrb[19].mxu0 }
 0x12b   : > { %v1485_v57 = vcombine.high %v1481_v55, %v1481_v55  ;;  %v1489_v0 = vpack.c.bf16 %v1481_v55, %v1481_v55  ;;  %v1482_v59 = vadd.f32 %v1661_v52, %v1473_v43 }
 0x12d   : > { %v1490_v60 = vpack.c.bf16 %v1485_v57, %v1485_v57  ;;  %1494 = vst.msk [vmem:[%s170_s7] sm:$0x3] %vm1493_vm0, %v1489_v0  ;;  %v1486_v61 = vcombine.high %v1482_v59, %v1482_v59  ;;  %v1491_v62 = vpack.c.bf16 %v1482_v59, %v1482_v59 }
 0x12f   : > { %1495 = vst.msk [vmem:[%s170_s7 + $0x2] sm:$0x3] %vm1493_vm0, %v1490_v60  ;;  %v1492_v58 = vpack.c.bf16 %v1486_v61, %v1486_v61  ;;  %1496 = vst.msk [vmem:[%s170_s7 + $0x4] sm:$0x3] %vm1493_vm0, %v1491_v62 }
 0x131   : > { %1497 = vst.msk [vmem:[%s170_s7 + $0x6] sm:$0x3] %vm1493_vm0, %v1492_v58 }
 0x132 PF: > { %s13_s12 = sadd.s32 1, %s1813_s12  }
 0x133   : > { %p10_p4 = scmp.ge.s32.totalorder %s13_s12, 4  }
 0x135   :  { %12 = sbr.rel (!%p10_p4) target bundleno = 1 (0x1), region = 72 }

// kernel: _lambda_.5
= control target key start
LH: loop header
LB: loop body
LE: loop exit
PB: predicated region body
PF: predicated region fallthrough
CT: control target
= control target key end

     0   :  { %s2034_s12 = smov 0   ;;  %s2378_s0 = inlined_call_operand.vmem [shape: bf16[2,9,2,9,8], index: 0, kind: input, shape index: {}]   ;;  %s2379_s1 = inlined_call_operand.vmem [shape: bf16[8,8,16], index: 1, kind: input, shape index: {}]   ;;  %s2380_s2 = inlined_call_operand.vmem [shape: f32[1,16], index: 2, kind: input, shape index: {}]   ;;  %s2381_s3 = inlined_call_operand.vmem [shape: bf16[2,8,8,16], index: 3, kind: output, shape index: {}]  }
   0x1 LB: > { %s1642_s13 = sadd.s32 4294967295, %s2012_s12   ;;  %p1646_p0 = scmp.ge.s32.totalorder %s2012_s12, 1  ;;  %s2012_s12 = sphi %s2034_s12, %s13_s12  }
   0x2   : > { %p137_p1 = scmp.lt.s32.totalorder %s2012_s12, 3 }
   0x4   : > { %p138_p2 = pnand %p1646_p0, %p137_p1 }
   0x5   : > { %vm331_vm0 = vcmask (!%p138_p2), 1043456   ;;  %v1717_v0 = vld [vmem:[%s2379_s1 + $0x10] sm:$0xf] (!%p138_p2)  ;;  %p161_p3 = scmp.lt.s32.totalorder (!%p138_p2), %s1642_s13, 1  ;;  %v1650_v2 = vld [vmem:[%s2379_s1 + $0x4] sm:$0xf] (!%p138_p2) }
   0x6   : > { %141 = sbr.rel (%p138_p2) target bundleno = 329 (0x149), region = 32  ;;  %1977 = vmatprep.subr.msk.bf16.mxu0 (!%p138_p2), %vm331_vm0, %v1717_v0  ;;  %v893_v1 = vsel (!%p138_p2), %vm331_vm0, %v1717_v0, 0  ;;  %1973 = vmatprep.subr.msk.bf16.mxu1 (!%p138_p2), %vm331_vm0, %v1650_v2  ;;  %v333_v3 = vsel (!%p138_p2), %vm331_vm0, %v1650_v2, 0  ;;  %v180_v4 = vld [vmem:[%s2379_s1] sm:$0xf] (!%p138_p2)  ;;  %vm318_vm1 = vcmask (!%p138_p2), 64512  }
   0x7   : > { %1878 = vmatpush3.bf16.msra.mxu0 (!%p138_p2), %v893_v1  ;;  %1838 = vmatpush3.bf16.msra.mxu1 (!%p138_p2), %v333_v3  ;;  %v1742_v5 = vld [vmem:[%s2379_s1 + $0x14] sm:$0xf] (!%p138_p2)  ;;  %v2063_v6 = vld [vmem:[%s2379_s1 + $0x8] sm:$0xf] (!%p138_p2)  ;;  %v1759_v7 = vld [vmem:[%s2379_s1 + $0x18] sm:$0xf] (!%p138_p2) }
   0x8   : > { %1974 = vmatprep.subr.msk.bf16.mxu1 (!%p138_p2), %vm331_vm0, %v180_v4  ;;  %1978 = vmatprep.subr.msk.bf16.mxu0 (!%p138_p2), %vm331_vm0, %v1742_v5  ;;  %vm189_vm2 = vsmask.f32 (!%p138_p2), 3328  ;;  %vm190_vm3 = vsmask.f32 (!%p138_p2), 7440  ;;  %v2077_v8 = vsel (!%p138_p2), %vm331_vm0, %v180_v4, 0  ;;  %v1123_v9 = vsel (!%p138_p2), %vm331_vm0, %v1742_v5, 0 }
   0x9   : > { %v2082_v10 = vsel (!%p138_p2), %vm331_vm0, %v2063_v6, 0  ;;  %v2085_v11 = vsel (!%p138_p2), %vm331_vm0, %v1759_v7, 0  ;;  %vm2119_vm4 = vmor (!%p138_p2), %vm189_vm2, %vm190_vm3  ;;  %vm1578_vm5 = vcmask (!%p138_p2), 125952  }
   0xd   : > { %s2385_s13 = smov (!%p161_p3, %s1642_s13), 1 }
   0xe   : > { %s1981_s24 = smul.u32 144, %s2385_s13  ;;  %s1796_s9 = sshll.u32 %s2385_s13, 5 }
   0xf   : > { %s2357_s14 = scalar_lea.vmem %s2381_s3, %s1796_s9 }
  0x10   : > { %s2074_s29 = scalar_lea.vmem %s2378_s0, %s1981_s24 }
  0x11   : > { %v1990_v12 = vld [vmem:[%s2074_s29 + $0x10] ss:$16 sps:$4 sm:$0xff]   ;;  %v181_v17 = vld [vmem:[%s2074_s29 + $0x4] sm:$0x1]  ;;  %v182_v18 = vld [vmem:[%s2074_s29 + $0x14] sm:$0x1] }
  0x12   : > { %v1991_v13 = vld [vmem:[%s2074_s29 + $0x30] ss:$16 sps:$4 sm:$0xff]   ;;  %1879 = vmatprep.mubr.msk.bf16.mxu0 %vm318_vm1, %v1990_v12  ;;  %v202_v21 = vshll.u32 %v181_v17, 16  ;;  %v216_v24 = vshll.u32 %v182_v18, 16  ;;  %v183_v35 = vld [vmem:[%s2074_s29 + $0x24] sm:$0x1] }
  0x13   : > { %v1992_v14 = vld [vmem:[%s2074_s29 + $0x50] ss:$16 sps:$4 sm:$0xff]   ;;  %1880 = vmatmul.mubr.msk.bf16.vlgmr.msra.gmra.mrb[0].mxu0 %vm318_vm1, %v1991_v13  ;;  %v184_v36 = vld [vmem:[%s2074_s29 + $0x34] sm:$0x1]  ;;  %v230_v41 = vshll.u32 %v183_v35, 16 }
  0x14   : > { %v2093_v15 = vld [vmem:[%s2074_s29] sm:$0xf]  ;;  %v2096_v16 = vld [vmem:[%s2074_s29 + $0x10] sm:$0xf]  ;;  %1883 = vmatprep.mubr.msk.bf16.mxu0 %vm318_vm1, %v1992_v14  ;;  %1888 = vmatpush3.bf16.msra.mxu0 %v1123_v9  ;;  %v204_v27 = vrot.slane %v202_v21, 5  ;;  %v218_v31 = vrot.slane %v216_v24, 5 }
  0x15   : > { %v193_v19 = vshrl.u32 %v2093_v15, 16  ;;  %v196_v20 = vshll.u32 %v2093_v15, 16  ;;  %v207_v22 = vshrl.u32 %v2096_v16, 16  ;;  %v210_v23 = vshll.u32 %v2096_v16, 16  ;;  %1979 = vmatprep.subr.msk.bf16.mxu0 %vm331_vm0, %v1759_v7  ;;  %v1993_v29 = vld [vmem:[%s2074_s29 + $0x70] ss:$16 sps:$4 sm:$0xff]  }
  0x16   : > { %v2108_v32 = vld [vmem:[%s2074_s29 + $0x20] sm:$0xf]  ;;  %v2111_v33 = vld [vmem:[%s2074_s29 + $0x30] sm:$0xf]  ;;  %v244_v48 = vshll.u32 %v184_v36, 16  ;;  %v232_v51 = vrot.slane %v230_v41, 5 }
  0x17   : > { %v195_v25 = vrot.slane %v193_v19, 4  ;;  %v198_v26 = vrot.slane %v196_v20, 5  ;;  %v209_v28 = vrot.slane %v207_v22, 4  ;;  %v212_v30 = vrot.slane %v210_v23, 5  ;;  %v1726_v44 = vld [vmem:[%s2074_s29 + $0x10] sm:$0xf] }
  0x18   : > { %v221_v37 = vshrl.u32 %v2108_v32, 16  ;;  %v224_v38 = vshll.u32 %v2108_v32, 16  ;;  %v235_v42 = vshrl.u32 %v2111_v33, 16  ;;  %v238_v43 = vshll.u32 %v2111_v33, 16  ;;  %v1727_v49 = vld [vmem:[%s2074_s29 + $0x14] sm:$0x1] }
  0x19   : > { %v199_v34 = vor.u32 %v198_v26, %v195_v25  ;;  %v213_v40 = vor.u32 %v212_v30, %v209_v28  ;;  %v1728_v54 = vld [vmem:[%s2074_s29 + $0x20] sm:$0xf]  ;;  %v246_v57 = vrot.slane %v244_v48, 5  ;;  %v985_v58 = vshrl.u32 %v1726_v44, 16  ;;  %v1729_v61 = vld [vmem:[%s2074_s29 + $0x24] sm:$0x1] }
  0x1a   : > { %v223_v46 = vrot.slane %v221_v37, 4  ;;  %v226_v47 = vrot.slane %v224_v38, 5  ;;  %v237_v52 = vrot.slane %v235_v42, 4  ;;  %v240_v53 = vrot.slane %v238_v43, 5  ;;  %v2135_v0 = vld [vmem:[%s2074_s29 + $0x40] sm:$0xf] }
  0x1b   : > { %v200_v45 = vrot.slane %v199_v34, 4  ;;  %v214_v50 = vrot.slane %v213_v40, 4  ;;  %1884 = vmatmul.mubr.msk.bf16.gmra.mrb[4].mxu0 %vm318_vm1, %v1993_v29  ;;  %v988_v62 = vshll.u32 %v1726_v44, 16  ;;  %v994_v63 = vshll.u32 %v1727_v49, 16  ;;  %v185_v13 = vld [vmem:[%s2074_s29 + $0x44] sm:$0x1] }
  0x1c   : > { %v227_v56 = vor.u32 %v226_v47, %v223_v46  ;;  %v241_v60 = vor.u32 %v240_v53, %v237_v52  ;;  %v987_v3 = vrot.slane %v985_v58, 4  ;;  %v999_v4 = vshrl.u32 %v1728_v54, 16  ;;  %v2142_v19 = vld [vmem:[%s2074_s29 + $0x50] sm:$0xf]  ;;  %v186_v24 = vld [vmem:[%s2074_s29 + $0x54] sm:$0x1] }
  0x1d   : > { %v205_v55 = vsel %vm2119_vm4, %v200_v45, %v204_v27  ;;  %v219_v59 = vsel %vm2119_vm4, %v214_v50, %v218_v31  ;;  %v990_v7 = vrot.slane %v988_v62, 5  ;;  %v996_v9 = vrot.slane %v994_v63, 5  ;;  %v1730_v26 = vld [vmem:[%s2074_s29 + $0x30] sm:$0xf]  ;;  %v1731_v37 = vld [vmem:[%s2074_s29 + $0x34] sm:$0x1] }
  0x1e   : > { %v1651_v1 = vcombine.low %v205_v55, %v219_v59  ;;  %v228_v2 = vrot.slane %v227_v56, 4  ;;  %v242_v5 = vrot.slane %v241_v60, 4  ;;  %v1002_v12 = vshll.u32 %v1728_v54, 16  ;;  %v1732_v42 = vld [vmem:[%s2074_s29 + $0x40] sm:$0xf] }
  0x1f   : > { %v1001_v17 = vrot.slane %v999_v4, 4  ;;  %v1008_v18 = vshll.u32 %v1729_v61, 16  ;;  %v249_v20 = vshrl.u32 %v2135_v0, 16  ;;  %v991_v22 = vor.u32 %v990_v7, %v987_v3  ;;  %v1733_v50 = vld [vmem:[%s2074_s29 + $0x44] sm:$0x1] }
  0x20   : > { %1839 = vmatprep.mubr.msk.bf16.mxu1 %vm318_vm1, %v1651_v1  ;;  %v233_v14 = vsel %vm2119_vm4, %v228_v2, %v232_v51  ;;  %v247_v21 = vsel %vm2119_vm4, %v242_v5, %v246_v57  ;;  %v1004_v23 = vrot.slane %v1002_v12, 5  ;;  %v252_v25 = vshll.u32 %v2135_v0, 16  ;;  %v2164_v56 = vld [vmem:[%s2074_s29 + $0x60] sm:$0xf]  ;;  %v2167_v61 = vld [vmem:[%s2074_s29 + $0x70] sm:$0xf] }
  0x21   : > { %v1652_v27 = vcombine.low %v233_v14, %v247_v21  ;;  %v1010_v28 = vrot.slane %v1008_v18, 5  ;;  %v251_v29 = vrot.slane %v249_v20, 4  ;;  %v258_v30 = vshll.u32 %v185_v13, 16  ;;  %v187_v62 = vld [vmem:[%s2074_s29 + $0x64] sm:$0x1] }
  0x22   : > { %v992_v31 = vrot.slane %v991_v22, 4  ;;  %v1005_v34 = vor.u32 %v1004_v23, %v1001_v17  ;;  %v254_v35 = vrot.slane %v252_v25, 5  ;;  %v263_v36 = vshrl.u32 %v2142_v19, 16  ;;  %v188_v3 = vld [vmem:[%s2074_s29 + $0x74] sm:$0x1] }
  0x23   : > { %1840 = vmatmul.mubr.msk.bf16.vlgmr.msra.gmra.mrb[0].mxu1 %vm318_vm1, %v1652_v27  ;;  %v260_v38 = vrot.slane %v258_v30, 5  ;;  %v266_v40 = vshll.u32 %v2142_v19, 16  ;;  %v272_v41 = vshll.u32 %v186_v24, 16  ;;  %v1013_v43 = vshrl.u32 %v1730_v26, 16  ;;  %v1734_v12 = vld [vmem:[%s2074_s29 + $0x50] sm:$0xf] }
  0x24   : > { %1848 = vmatpush3.bf16.msra.mxu1 %v2077_v8  ;;  %v997_v44 = vsel %vm2119_vm4, %v992_v31, %v996_v9  ;;  %v1006_v45 = vrot.slane %v1005_v34, 4  ;;  %v255_v46 = vor.u32 %v254_v35, %v251_v29  ;;  %v265_v47 = vrot.slane %v263_v36, 4  ;;  %v1735_v20 = vld [vmem:[%s2074_s29 + $0x54] sm:$0x1]  ;;  %v1736_v29 = vld [vmem:[%s2074_s29 + $0x60] sm:$0xf] }
  0x25   : > { %v268_v48 = vrot.slane %v266_v40, 5  ;;  %v274_v49 = vrot.slane %v272_v41, 5  ;;  %v1015_v51 = vrot.slane %v1013_v43, 4  ;;  %v1016_v52 = vshll.u32 %v1730_v26, 16  ;;  %1975 = vmatprep.subr.msk.bf16.mxu1 %vm331_vm0, %v2063_v6  ;;  %v1737_v36 = vld [vmem:[%s2074_s29 + $0x64] sm:$0x1] }
  0x26   : > { %v1011_v8 = vsel %vm2119_vm4, %v1006_v45, %v1010_v28  ;;  %v256_v53 = vrot.slane %v255_v46, 4  ;;  %v1022_v54 = vshll.u32 %v1731_v37, 16  ;;  %v1027_v55 = vshrl.u32 %v1732_v42, 16  ;;  %v1738_v37 = vld [vmem:[%s2074_s29 + $0x70] sm:$0xf] }
  0x27   : > { %v1743_v57 = vcombine.low %v997_v44, %v1011_v8  ;;  %v269_v58 = vor.u32 %v268_v48, %v265_v47  ;;  %v1018_v59 = vrot.slane %v1016_v52, 5  ;;  %v1030_v60 = vshll.u32 %v1732_v42, 16  ;;  %v1739_v43 = vld [vmem:[%s2074_s29 + $0x74] sm:$0x1]  ;;  %v1740_v48 = vld [vmem:[%s2074_s29 + $0x80] sm:$0xf] }
  0x28   : > { %v261_v6 = vsel %vm2119_vm4, %v256_v53, %v260_v38  ;;  %v1024_v63 = vrot.slane %v1022_v54, 5  ;;  %v1029_v1 = vrot.slane %v1027_v55, 4  ;;  %v1036_v2 = vshll.u32 %v1733_v50, 16 }
  0x29   : > { %1889 = vmatprep.mubr.msk.bf16.mxu0 %vm318_vm1, %v1743_v57  ;;  %v270_v4 = vrot.slane %v269_v58, 4  ;;  %v1019_v5 = vor.u32 %v1018_v59, %v1015_v51  ;;  %v1032_v7 = vrot.slane %v1030_v60, 5  ;;  %v277_v9 = vshrl.u32 %v2164_v56, 16 }
  0x2a   : > { %v1038_v13 = vrot.slane %v1036_v2, 5  ;;  %v280_v14 = vshll.u32 %v2164_v56, 16  ;;  %v286_v17 = vshll.u32 %v187_v62, 16  ;;  %v291_v18 = vshrl.u32 %v2167_v61, 16 }
  0x2b   : > { %v275_v21 = vsel %vm2119_vm4, %v270_v4, %v274_v49  ;;  %v1020_v22 = vrot.slane %v1019_v5, 4  ;;  %v1033_v23 = vor.u32 %v1032_v7, %v1029_v1  ;;  %v279_v24 = vrot.slane %v277_v9, 4  ;;  %v2195_v49 = vld [vmem:[%s2379_s1 + $0x1c] sm:$0xf]  ;;  %v1741_v7 = vld [vmem:[%s2074_s29 + $0x84] sm:$0x1] }
  0x2c   : > { %v1653_v25 = vcombine.low %v261_v6, %v275_v21  ;;  %v282_v26 = vrot.slane %v280_v14, 5  ;;  %v288_v27 = vrot.slane %v286_v17, 5  ;;  %v293_v28 = vrot.slane %v291_v18, 4 }
  0x2d   : > { %v1025_v30 = vsel %vm2119_vm4, %v1020_v22, %v1024_v63  ;;  %v1034_v31 = vrot.slane %v1033_v23, 4  ;;  %v294_v34 = vshll.u32 %v2167_v61, 16  ;;  %v300_v35 = vshll.u32 %v188_v3, 16  ;;  %v2204_v3 = vld [vmem:[%s2379_s1 + $0xc] sm:$0xf] }
  0x2e   : > { %1843 = vmatprep.mubr.msk.bf16.mxu1 %vm318_vm1, %v1653_v25  ;;  %v283_v38 = vor.u32 %v282_v26, %v279_v24  ;;  %v1041_v40 = vshrl.u32 %v1734_v12, 16  ;;  %v1044_v41 = vshll.u32 %v1734_v12, 16  ;;  %v1050_v42 = vshll.u32 %v1735_v20, 16 }
  0x2f   : > { %v1039_v44 = vsel %vm2119_vm4, %v1034_v31, %v1038_v13  ;;  %v296_v45 = vrot.slane %v294_v34, 5  ;;  %v302_v46 = vrot.slane %v300_v35, 5  ;;  %v1055_v47 = vshrl.u32 %v1736_v29, 16 }
  0x30   : > { %v1744_v50 = vcombine.low %v1025_v30, %v1039_v44  ;;  %v284_v51 = vrot.slane %v283_v38, 4  ;;  %v1043_v52 = vrot.slane %v1041_v40, 4  ;;  %v1046_v8 = vrot.slane %v1044_v41, 5 }
  0x31   : > { %v297_v53 = vor.u32 %v296_v45, %v293_v28  ;;  %v1052_v54 = vrot.slane %v1050_v42, 5  ;;  %v1057_v55 = vrot.slane %v1055_v47, 4  ;;  %v1058_v57 = vshll.u32 %v1736_v29, 16  ;;  %v1768_v28 = vld [vmem:[%s2074_s29 + $0x18] sm:$0xf] }
  0x32   : > { %1890 = vmatmul.mubr.msk.bf16.vlgmr.msra.gmra.mrb[0].mxu0 %vm318_vm1, %v1744_v50  ;;  %v289_v58 = vsel %vm2119_vm4, %v284_v51, %v288_v27  ;;  %v1047_v59 = vor.u32 %v1046_v8, %v1043_v52  ;;  %v1064_v60 = vshll.u32 %v1737_v36, 16  ;;  %v1069_v62 = vshrl.u32 %v1738_v37, 16  ;;  %v1769_v29 = vld [vmem:[%s2074_s29 + $0x1c] sm:$0x1]  ;;  %v1770_v36 = vld [vmem:[%s2074_s29 + $0x28] sm:$0xf] }
  0x33   : > { %v298_v6 = vrot.slane %v297_v53, 4  ;;  %v1060_v63 = vrot.slane %v1058_v57, 5  ;;  %v1072_v1 = vshll.u32 %v1738_v37, 16  ;;  %v1078_v2 = vshll.u32 %v1739_v43, 16  ;;  %1898 = vmatpush3.bf16.msra.mxu0 %v2085_v11  ;;  %v1773_v8 = vld [vmem:[%s2074_s29 + $0x3c] sm:$0x1] }
  0x34   : > { %v1048_v4 = vrot.slane %v1047_v59, 4  ;;  %v1659_v5 = vcombine.low %v2093_v15, %v2096_v16  ;;  %v1071_v9 = vrot.slane %v1069_v62, 4  ;;  %v1083_v12 = vshrl.u32 %v1740_v48, 16  ;;  %1980 = vmatprep.subr.msk.bf16.mxu0 %vm331_vm0, %v2195_v49  ;;  %v1775_v59 = vld [vmem:[%s2074_s29 + $0x4c] sm:$0x1] }
  0x35   : > { %v303_v13 = vsel %vm2119_vm4, %v298_v6, %v302_v46  ;;  %v1061_v11 = vor.u32 %v1060_v63, %v1057_v55  ;;  %v1066_v14 = vrot.slane %v1064_v60, 5  ;;  %v1074_v17 = vrot.slane %v1072_v1, 5 }
  0x36   : > { %v1654_v18 = vcombine.low %v289_v58, %v303_v13  ;;  %v1080_v20 = vrot.slane %v1078_v2, 5  ;;  %v1085_v21 = vrot.slane %v1083_v12, 4  ;;  %v1086_v22 = vshll.u32 %v1740_v48, 16  ;;  %v1772_v48 = vld [vmem:[%s2074_s29 + $0x38] sm:$0xf] }
  0x37   : > { %v1053_v15 = vsel %vm2119_vm4, %v1048_v4, %v1052_v54  ;;  %v1062_v16 = vrot.slane %v1061_v11, 4  ;;  %v1075_v23 = vor.u32 %v1074_v17, %v1071_v9  ;;  %v1092_v24 = vshll.u32 %v1741_v7, 16  ;;  %v1774_v58 = vld [vmem:[%s2074_s29 + $0x48] sm:$0xf] }
  0x38   : > { %1844 = vmatmul.mubr.msk.bf16.gmra.mrb[4].mxu1 %vm318_vm1, %v1654_v18  ;;  %v1088_v25 = vrot.slane %v1086_v22, 5  ;;  %v1660_v26 = vcombine.low %v2108_v32, %v2111_v33  ;;  %v2220_v27 = vsel %vm331_vm0, %v2204_v3, 0  ;;  %v1661_v35 = vcombine.low %v2135_v0, %v2142_v19  ;;  %v1771_v32 = vld [vmem:[%s2074_s29 + $0x2c] sm:$0x1]  ;;  %v1996_v0 = vld [vmem:[%s2074_s29 + $0x18] ss:$16 sps:$4 sm:$0xff]  }
  0x39   : > { %v1067_v30 = vsel %vm2119_vm4, %v1062_v16, %v1066_v14  ;;  %1849 = vmatprep.mubr.msk.bf16.mxu1 %vm318_vm1, %v1659_v5  ;;  %v1076_v31 = vrot.slane %v1075_v23, 4  ;;  %v1094_v34 = vrot.slane %v1092_v24, 5  ;;  %v1334_v38 = vshrl.u32 %v1768_v28, 16  ;;  %v1776_v14 = vld [vmem:[%s2074_s29 + $0x58] sm:$0xf] }
  0x3a   : > { %v1745_v33 = vcombine.low %v1053_v15, %v1067_v30  ;;  %v1089_v37 = vor.u32 %v1088_v25, %v1085_v21  ;;  %v1337_v40 = vshll.u32 %v1768_v28, 16  ;;  %v1343_v42 = vshll.u32 %v1769_v29, 16  ;;  %v1777_v21 = vld [vmem:[%s2074_s29 + $0x5c] sm:$0x1]  ;;  %v1778_v22 = vld [vmem:[%s2074_s29 + $0x68] sm:$0xf] }
  0x3b   : > { %v1081_v41 = vsel %vm2119_vm4, %v1076_v31, %v1080_v20  ;;  %v1348_v43 = vshrl.u32 %v1770_v36, 16  ;;  %v1351_v44 = vshll.u32 %v1770_v36, 16  ;;  %v1336_v19 = vrot.slane %v1334_v38, 4  ;;  %v1779_v23 = vld [vmem:[%s2074_s29 + $0x6c] sm:$0x1] }
  0x3c   : > { %1893 = vmatprep.mubr.msk.bf16.mxu0 %vm318_vm1, %v1745_v33  ;;  %v1090_v45 = vrot.slane %v1089_v37, 4  ;;  %v1339_v46 = vrot.slane %v1337_v40, 5  ;;  %v1357_v47 = vshll.u32 %v1771_v32, 16  ;;  %v1345_v50 = vrot.slane %v1343_v42, 5  ;;  %v1684_v29 = vld [vmem:[%s2074_s29 + $0x8] sm:$0xf] }
  0x3d   : > { %v1350_v51 = vrot.slane %v1348_v43, 4  ;;  %v1353_v52 = vrot.slane %v1351_v44, 5  ;;  %v1362_v53 = vshrl.u32 %v1772_v48, 16  ;;  %v1365_v60 = vshll.u32 %v1772_v48, 16  ;;  %v2001_v30 = vld [vmem:[%s2074_s29 + $0x8] ss:$16 sps:$4 sm:$0xff]  }
  0x3e   : > { %v1095_v54 = vsel %vm2119_vm4, %v1090_v45, %v1094_v34  ;;  %v1340_v55 = vor.u32 %v1339_v46, %v1336_v19  ;;  %v1359_v57 = vrot.slane %v1357_v47, 5  ;;  %v1371_v1 = vshll.u32 %v1773_v8, 16  ;;  %v2000_v36 = vld [vmem:[%s2074_s29 + $0x58] ss:$16 sps:$4 sm:$0xff]   ;;  %v1685_v38 = vld [vmem:[%s2074_s29 + $0xc] sm:$0x1] }
  0x3f   : > { %v1746_v62 = vcombine.low %v1081_v41, %v1095_v54  ;;  %v1354_v6 = vor.u32 %v1353_v52, %v1350_v51  ;;  %v1364_v63 = vrot.slane %v1362_v53, 4  ;;  %v1367_v4 = vrot.slane %v1365_v60, 5  ;;  %v1686_v43 = vld [vmem:[%s2074_s29 + $0x18] sm:$0xf]  ;;  %v1687_v46 = vld [vmem:[%s2074_s29 + $0x1c] sm:$0x1] }
  0x40   : > { %1850 = vmatmul.mubr.msk.bf16.vlgmr.msra.gmra.mrb[0].mxu1 %vm318_vm1, %v1660_v26  ;;  %v1341_v2 = vrot.slane %v1340_v55, 4  ;;  %v1376_v5 = vshrl.u32 %v1774_v58, 16  ;;  %v1379_v7 = vshll.u32 %v1774_v58, 16  ;;  %v1472_v9 = vsel %vm331_vm0, %v2195_v49, 0  ;;  %v1998_v49 = vld [vmem:[%s2074_s29 + $0x38] ss:$16 sps:$4 sm:$0xff]  }
  0x41   : > { %1894 = vmatmul.mubr.msk.bf16.gmra.mrb[4].mxu0 %vm318_vm1, %v1746_v62  ;;  %1858 = vmatpush3.bf16.msra.mxu1 %v2082_v10  ;;  %v1355_v12 = vrot.slane %v1354_v6, 4  ;;  %v1373_v13 = vrot.slane %v1371_v1, 5  ;;  %v1385_v11 = vshll.u32 %v1775_v59, 16  ;;  %v1662_v17 = vcombine.low %v2164_v56, %v2167_v61  ;;  %v1780_v48 = vld [vmem:[%s2074_s29 + $0x78] sm:$0xf] }
  0x42   : > { %1899 = vmatprep.mubr.msk.bf16.mxu0 %vm318_vm1, %v1996_v0  ;;  %1853 = vmatprep.mubr.msk.bf16.mxu1 %vm318_vm1, %v1661_v35  ;;  %v1368_v18 = vor.u32 %v1367_v4, %v1364_v63  ;;  %v1378_v20 = vrot.slane %v1376_v5, 4  ;;  %v1381_v10 = vrot.slane %v1379_v7, 5  ;;  %v1346_v15 = vsel %vm2119_vm4, %v1341_v2, %v1345_v50  ;;  %v2003_v53 = vld [vmem:[%s2074_s29 + $0x28] ss:$16 sps:$4 sm:$0xff]   ;;  %v1781_v59 = vld [vmem:[%s2074_s29 + $0x7c] sm:$0x1] }
  0x43   : > { %1976 = vmatprep.subr.msk.bf16.mxu1 %vm331_vm0, %v2204_v3  ;;  %v1360_v16 = vsel %vm2119_vm4, %v1355_v12, %v1359_v57  ;;  %v1390_v56 = vshrl.u32 %v1776_v14, 16  ;;  %v1393_v61 = vshll.u32 %v1776_v14, 16  ;;  %v1387_v26 = vrot.slane %v1385_v11, 5  ;;  %v2002_v60 = vld [vmem:[%s2074_s29 + $0x78] ss:$16 sps:$4 sm:$0xff]  }
  0x44   : > { %v1369_v24 = vrot.slane %v1368_v18, 4  ;;  %v1382_v25 = vor.u32 %v1381_v10, %v1378_v20  ;;  %v1399_v28 = vshll.u32 %v1777_v21, 16  ;;  %v1404_v34 = vshrl.u32 %v1778_v22, 16  ;;  %v1782_v1 = vld [vmem:[%s2074_s29 + $0x88] sm:$0xf] }
  0x45   : > { %v1392_v31 = vrot.slane %v1390_v56, 4  ;;  %v1395_v3 = vrot.slane %v1393_v61, 5  ;;  %v1407_v35 = vshll.u32 %v1778_v22, 16  ;;  %v2264_v32 = vcombine.low %v1346_v15, %v1360_v16  ;;  %v1783_v12 = vld [vmem:[%s2074_s29 + $0x8c] sm:$0x1] }
  0x46   : > { %v1383_v33 = vrot.slane %v1382_v25, 4  ;;  %v1413_v37 = vshll.u32 %v1779_v23, 16  ;;  %v1406_v41 = vrot.slane %v1404_v34, 4  ;;  %v636_v44 = vshrl.u32 %v1684_v29, 16  ;;  %v1688_v18 = vld [vmem:[%s2074_s29 + $0x28] sm:$0xf] }
  0x47   : > { %v1396_v40 = vor.u32 %v1395_v3, %v1392_v31  ;;  %v1409_v42 = vrot.slane %v1407_v35, 5  ;;  %v1374_v45 = vsel %vm2119_vm4, %v1369_v24, %v1373_v13  ;;  %v2273_v19 = vrot.slane %v1399_v28, 5  ;;  %v2004_v20 = vld [vmem:[%s2074_s29 + $0x48] ss:$16 sps:$4 sm:$0xff]   ;;  %v1689_v61 = vld [vmem:[%s2074_s29 + $0x2c] sm:$0x1] }
  0x48   : > { %1854 = vmatmul.mubr.msk.bf16.gmra.mrb[4].mxu1 %vm318_vm1, %v1662_v17  ;;  %v1388_v0 = vsel %vm2119_vm4, %v1383_v33, %v1387_v26  ;;  %v639_v47 = vshll.u32 %v1684_v29, 16  ;;  %v638_v52 = vrot.slane %v636_v44, 4  ;;  %v645_v8 = vshll.u32 %v1685_v38, 16  ;;  %v1690_v28 = vld [vmem:[%s2074_s29 + $0x38] sm:$0xf] }
  0x49   : > { %1900 = vmatmul.mubr.msk.bf16.vlgmr.msra.gmra.mrb[0].mxu0 %vm318_vm1, %v1998_v49  ;;  %1859 = vmatprep.mubr.msk.bf16.mxu1 %vm318_vm1, %v2001_v30  ;;  %v2279_v50 = vrot.slane %v1396_v40, 4  ;;  %v1410_v51 = vor.u32 %v1409_v42, %v1406_v41  ;;  %v2283_v54 = vrot.slane %v1413_v37, 5  ;;  %v650_v57 = vshrl.u32 %v1686_v43, 16  ;;  %v1691_v34 = vld [vmem:[%s2074_s29 + $0x3c] sm:$0x1] }
  0x4a   : > { %1903 = vmatprep.mubr.msk.bf16.mxu0 %vm318_vm1, %v2000_v36  ;;  %1908 = vmatpush3.bf16.msra.mxu0 %v1472_v9  ;;  %v641_v55 = vrot.slane %v639_v47, 5  ;;  %v653_v58 = vshll.u32 %v1686_v43, 16  ;;  %v2287_v62 = vcombine.low %v1374_v45, %v1388_v0  ;;  %v659_v63 = vshll.u32 %v1687_v46, 16  ;;  %v2005_v36 = vld [vmem:[%s2074_s29 + $0x68] ss:$16 sps:$4 sm:$0xff]  }
  0x4b   : > { %v1411_v6 = vrot.slane %v1410_v51, 4  ;;  %v1418_v2 = vshrl.u32 %v1780_v48, 16  ;;  %v652_v5 = vrot.slane %v650_v57, 4  ;;  %v1421_v9 = vshll.u32 %v1780_v48, 16  ;;  %v1692_v40 = vld [vmem:[%s2074_s29 + $0x48] sm:$0xf] }
  0x4c   : > { %v642_v4 = vor.u32 %v641_v55, %v638_v52  ;;  %v655_v7 = vrot.slane %v653_v58, 5  ;;  %v1402_v13 = vsel %vm2119_vm4, %v2279_v50, %v2273_v19  ;;  %v647_v11 = vrot.slane %v645_v8, 5  ;;  %v1693_v45 = vld [vmem:[%s2074_s29 + $0x4c] sm:$0x1]  ;;  %v1694_v47 = vld [vmem:[%s2074_s29 + $0x58] sm:$0xf] }
  0x4d   : > { %v1420_v14 = vrot.slane %v1418_v2, 4  ;;  %v1427_v17 = vshll.u32 %v1781_v59, 16  ;;  %v661_v22 = vrot.slane %v659_v63, 5  ;;  %v1423_v49 = vrot.slane %v1421_v9, 5  ;;  %v1695_v55 = vld [vmem:[%s2074_s29 + $0x5c] sm:$0x1] }
  0x4e   : > { %v643_v10 = vrot.slane %v642_v4, 4  ;;  %v656_v21 = vor.u32 %v655_v7, %v652_v5  ;;  %v1416_v15 = vsel %vm2119_vm4, %v1411_v6, %v2283_v54  ;;  %v1432_v16 = vshrl.u32 %v1782_v1, 16  ;;  %v1696_v63 = vld [vmem:[%s2074_s29 + $0x68] sm:$0xf]  ;;  %v1697_v7 = vld [vmem:[%s2074_s29 + $0x6c] sm:$0x1] }
  0x4f   : > { %v1435_v23 = vshll.u32 %v1782_v1, 16  ;;  %v1441_v56 = vshll.u32 %v1783_v12, 16  ;;  %v1424_v25 = vor.u32 %v1423_v49, %v1420_v14  ;;  %v2302_v26 = vrot.slane %v1427_v17, 5  ;;  %v1698_v12 = vld [vmem:[%s2074_s29 + $0x78] sm:$0xf] }
  0x50   : > { %1860 = vmatmul.mubr.msk.bf16.vlgmr.msra.gmra.mrb[0].mxu1 %vm318_vm1, %v2003_v53  ;;  %v657_v24 = vrot.slane %v656_v21, 4  ;;  %v664_v29 = vshrl.u32 %v1688_v18, 16  ;;  %v648_v30 = vsel %vm2119_vm4, %v643_v10, %v647_v11  ;;  %v1434_v31 = vrot.slane %v1432_v16, 4  ;;  %v1699_v49 = vld [vmem:[%s2074_s29 + $0x7c] sm:$0x1] }
  0x51   : > { %1904 = vmatmul.mubr.msk.bf16.gmra.mrb[4].mxu0 %vm318_vm1, %v2002_v60  ;;  %1868 = vmatpush3.bf16.msra.mxu1 %v2220_v27  ;;  %v1437_v3 = vrot.slane %v1435_v23, 5  ;;  %v667_v35 = vshll.u32 %v1688_v18, 16  ;;  %v1425_v37 = vrot.slane %v1424_v25, 4  ;;  %v673_v38 = vshll.u32 %v1689_v61, 16 }
  0x52   : > { %1909 = vmatprep.mubr.msk.bf16.mxu0 %vm318_vm1, %v2264_v32  ;;  %1863 = vmatprep.mubr.msk.bf16.mxu1 %vm318_vm1, %v2004_v20  ;;  %v662_v33 = vsel %vm2119_vm4, %v657_v24, %v661_v22  ;;  %v666_v27 = vrot.slane %v664_v29, 4  ;;  %v1443_v42 = vrot.slane %v1441_v56, 5  ;;  %v678_v44 = vshrl.u32 %v1690_v28, 16 }
  0x53   : > { %v1438_v41 = vor.u32 %v1437_v3, %v1434_v31  ;;  %v669_v43 = vrot.slane %v667_v35, 5  ;;  %v1701_v0 = vcombine.low %v648_v30, %v662_v33  ;;  %v675_v19 = vrot.slane %v673_v38, 5 }
  0x54   : > { %v681_v32 = vshll.u32 %v1690_v28, 16  ;;  %v687_v46 = vshll.u32 %v1691_v34, 16  ;;  %v680_v51 = vrot.slane %v678_v44, 4  ;;  %v692_v52 = vshrl.u32 %v1692_v40, 16 }
  0x55   : > { %v1439_v48 = vrot.slane %v1438_v41, 4  ;;  %v670_v50 = vor.u32 %v669_v43, %v666_v27  ;;  %v1787_v8 = vcombine.low %v1402_v13, %v1416_v15  ;;  %v1430_v53 = vsel %vm2119_vm4, %v1425_v37, %v2302_v26 }
  0x56   : > { %v683_v54 = vrot.slane %v681_v32, 5  ;;  %v695_v57 = vshll.u32 %v1692_v40, 16  ;;  %v694_v59 = vrot.slane %v692_v52, 4  ;;  %v701_v60 = vshll.u32 %v1693_v45, 16 }
  0x57   : > { %v671_v58 = vrot.slane %v670_v50, 4  ;;  %v706_v6 = vshrl.u32 %v1694_v47, 16  ;;  %v1444_v1 = vsel %vm2119_vm4, %v1439_v48, %v1443_v42  ;;  %v689_v4 = vrot.slane %v687_v46, 5  ;;  %v1793_v48 = vld [vmem:[%s2380_s2] ss:$0 sm:$0xff] }
  0x58   : > { %1864 = vmatmul.mubr.msk.bf16.gmra.mrb[4].mxu1 %vm318_vm1, %v2005_v36  ;;  %v684_v2 = vor.u32 %v683_v54, %v680_v51  ;;  %v697_v5 = vrot.slane %v695_v57, 5  ;;  %v709_v11 = vshll.u32 %v1694_v47, 16  ;;  %v715_v14 = vshll.u32 %v1695_v55, 16 }
  0x59   : > { %1910 = vmatmul.mubr.msk.bf16.vlgmr.msra.gmra.mrb[0].mxu0 %vm318_vm1, %v2287_v62  ;;  %1869 = vmatprep.mubr.msk.bf16.mxu1 %vm318_vm1, %v1701_v0  ;;  %v676_v9 = vsel %vm2119_vm4, %v671_v58, %v675_v19  ;;  %v708_v13 = vrot.slane %v706_v6, 4  ;;  %v720_v20 = vshrl.u32 %v1696_v63, 16  ;;  %v723_v10 = vshll.u32 %v1696_v63, 16 }
  0x5a   : > { %1913 = vmatprep.mubr.msk.bf16.mxu0 %vm318_vm1, %v1787_v8  ;;  %v685_v17 = vrot.slane %v684_v2, 4  ;;  %v698_v18 = vor.u32 %v697_v5, %v694_v59  ;;  %v703_v21 = vrot.slane %v701_v60, 5  ;;  %v711_v22 = vrot.slane %v709_v11, 5 }
  0x5b   : > { %v729_v15 = vshll.u32 %v1697_v7, 16  ;;  %v734_v16 = vshrl.u32 %v1698_v12, 16  ;;  %v722_v56 = vrot.slane %v720_v20, 4  ;;  %v725_v61 = vrot.slane %v723_v10, 5 }
  0x5c   : > { %v690_v62 = vsel %vm2119_vm4, %v685_v17, %v689_v4  ;;  %v699_v23 = vrot.slane %v698_v18, 4  ;;  %v1788_v24 = vcombine.low %v1430_v53, %v1444_v1  ;;  %v712_v26 = vor.u32 %v711_v22, %v708_v13 }
  0x5d   : > { %v1702_v25 = vcombine.low %v676_v9, %v690_v62  ;;  %v717_v28 = vrot.slane %v715_v14, 5  ;;  %v726_v29 = vor.u32 %v725_v61, %v722_v56  ;;  %v736_v30 = vrot.slane %v734_v16, 4 }
  0x5e   : > { %v737_v31 = vshll.u32 %v1698_v12, 16  ;;  %v743_v3 = vshll.u32 %v1699_v49, 16  ;;  %v704_v34 = vsel %vm2119_vm4, %v699_v23, %v703_v21  ;;  %v713_v35 = vrot.slane %v712_v26, 4 }
  0x5f   : > { %v727_v36 = vrot.slane %v726_v29, 4  ;;  %v731_v33 = vrot.slane %v729_v15, 5 }
  0x60   : > { %1870 = vmatmul.mubr.msk.bf16.vlgmr.msra.gmra.mrb[0].mxu1 %vm318_vm1, %v1702_v25  ;;  %v739_v37 = vrot.slane %v737_v31, 5  ;;  %v718_v27 = vsel %vm2119_vm4, %v713_v35, %v717_v28  ;;  %v745_v41 = vrot.slane %v743_v3, 5 }
  0x61   : > { %1914 = vmatmul.mubr.msk.bf16.gmra.mrb[4].mxu0 %vm318_vm1, %v1788_v24  ;;  %v1703_v38 = vcombine.low %v704_v34, %v718_v27  ;;  %v732_v42 = vsel %vm2119_vm4, %v727_v36, %v731_v33 }
  0x62   : > { %v740_v40 = vor.u32 %v739_v37, %v736_v30 }
  0x63   : > { %1873 = vmatprep.mubr.msk.bf16.mxu1 %vm318_vm1, %v1703_v38 }
  0x64   : > { %v741_v43 = vrot.slane %v740_v40, 4 }
  0x66   : > { %v746_v44 = vsel %vm2119_vm4, %v741_v43, %v745_v41 }
  0x67   : > { %v1704_v45 = vcombine.low %v732_v42, %v746_v44 }
  0x69   : > { %1874 = vmatmul.mubr.msk.bf16.gmra.mrb[4].mxu1 %vm318_vm1, %v1704_v45 }
 0x12c   : > { %v1911_v0 = vpop.f32.mrb[0].mxu0 }
 0x12d   : > { %v1508_v19 = vpop.f32.mrb[1].mxu0 }
 0x12e   : > { %v1912_v32 = vpop.f32.mrb[2].mxu0 }
 0x12f   : > { %v1511_v46 = vpop.f32.mrb[3].mxu0 }
 0x133   : > { %v1871_v47 = vpop.f32.mrb[0].mxu1 }
 0x134   : > { %v1915_v50 = vpop.f32.mrb[4].mxu0  ;;  %v1917_v51 = vadd.f32 %v1911_v0, %v1871_v47  ;;  %v810_v52 = vpop.f32.mrb[1].mxu1 }
 0x135   : > { %v1524_v8 = vpop.f32.mrb[5].mxu0  ;;  %v1918_v53 = vadd.f32 %v1508_v19, %v810_v52  ;;  %v1872_v39 = vpop.f32.mrb[2].mxu1 }
 0x136   : > { %v1556_v54 = vadd.f32 %v1917_v51, %v1793_v48  ;;  %v1916_v55 = vpop.f32.mrb[6].mxu0  ;;  %v1919_v57 = vadd.f32 %v1912_v32, %v1872_v39  ;;  %v813_v58 = vpop.f32.mrb[3].mxu1 }
 0x137   : > { %v1554_v59 = vadd.f32 %v1918_v53, %v1793_v48  ;;  %v1527_v60 = vpop.f32.mrb[7].mxu0  ;;  %v1920_v6 = vadd.f32 %v1511_v46, %v813_v58 }
 0x138   : > { %v1564_v63 = vmax.f32 %v1556_v54, 0.0  ;;  %v1557_v1 = vadd.f32 %v1919_v57, %v1793_v48 }
 0x139   : > { %v1562_v2 = vmax.f32 %v1554_v59, 0.0  ;;  %v1555_v4 = vadd.f32 %v1920_v6, %v1793_v48 }
 0x13a   : > { %v1572_v5 = vpack.c.bf16 %v1564_v63, %v1564_v63  ;;  %v1565_v7 = vmax.f32 %v1557_v1, 0.0 }
 0x13b   : > { %v1570_v12 = vpack.c.bf16 %v1562_v2, %v1562_v2  ;;  %v1563_v9 = vmax.f32 %v1555_v4, 0.0 }
 0x13c   : > { %1581 = vst.msk [vmem:[%s2357_s14 + $0x8] sm:$0xf] %vm1578_vm5, %v1572_v5  ;;  %v1573_v13 = vpack.c.bf16 %v1565_v7, %v1565_v7  ;;  %v1875_v11 = vpop.f32.mrb[4].mxu1 }
 0x13d   : > { %1579 = vst.msk [vmem:[%s2357_s14] sm:$0xf] %vm1578_vm5, %v1570_v12  ;;  %v1571_v14 = vpack.c.bf16 %v1563_v9, %v1563_v9  ;;  %v1921_v17 = vadd.f32 %v1915_v50, %v1875_v11  ;;  %v826_v18 = vpop.f32.mrb[5].mxu1 }
 0x13e   : > { %1582 = vst.msk [vmem:[%s2357_s14 + $0xc] sm:$0xf] %vm1578_vm5, %v1573_v13  ;;  %v1922_v20 = vadd.f32 %v1524_v8, %v826_v18  ;;  %v1876_v10 = vpop.f32.mrb[6].mxu1 }
 0x13f   : > { %1580 = vst.msk [vmem:[%s2357_s14 + $0x4] sm:$0xf] %vm1578_vm5, %v1571_v14  ;;  %v1560_v21 = vadd.f32 %v1921_v17, %v1793_v48  ;;  %v1923_v22 = vadd.f32 %v1916_v55, %v1876_v10  ;;  %v829_v49 = vpop.f32.mrb[7].mxu1 }
 0x140   : > { %v1558_v15 = vadd.f32 %v1922_v20, %v1793_v48  ;;  %v1924_v16 = vadd.f32 %v1527_v60, %v829_v49 }
 0x141   : > { %v1568_v62 = vmax.f32 %v1560_v21, 0.0  ;;  %v1561_v23 = vadd.f32 %v1923_v22, %v1793_v48 }
 0x142   : > { %v1566_v56 = vmax.f32 %v1558_v15, 0.0  ;;  %v1559_v61 = vadd.f32 %v1924_v16, %v1793_v48 }
 0x143   : > { %v1576_v24 = vpack.c.bf16 %v1568_v62, %v1568_v62  ;;  %v1569_v25 = vmax.f32 %v1561_v23, 0.0 }
 0x144   : > { %v1574_v26 = vpack.c.bf16 %v1566_v56, %v1566_v56  ;;  %v1567_v28 = vmax.f32 %v1559_v61, 0.0 }
 0x145   : > { %1585 = vst.msk [vmem:[%s2357_s14 + $0x18] sm:$0xf] %vm1578_vm5, %v1576_v24  ;;  %v1577_v29 = vpack.c.bf16 %v1569_v25, %v1569_v25 }
 0x146   : > { %1583 = vst.msk [vmem:[%s2357_s14 + $0x10] sm:$0xf] %vm1578_vm5, %v1574_v26  ;;  %v1575_v30 = vpack.c.bf16 %v1567_v28, %v1567_v28 }
 0x147   : > { %1586 = vst.msk [vmem:[%s2357_s14 + $0x1c] sm:$0xf] %vm1578_vm5, %v1577_v29 }
 0x148   : > { %1584 = vst.msk [vmem:[%s2357_s14 + $0x14] sm:$0xf] %vm1578_vm5, %v1575_v30 }
 0x149 PF: > { %s13_s12 = sadd.s32 1, %s2012_s12  }
 0x14a   : > { %p10_p4 = scmp.ge.s32.totalorder %s13_s12, 4  }
 0x14c   :  { %12 = sbr.rel (!%p10_p4) target bundleno = 1 (0x1), region = 72 }

// kernel: _lambda_.8
= control target key start
LH: loop header
LB: loop body
LE: loop exit
PB: predicated region body
PF: predicated region fallthrough
CT: control target
= control target key end

     0   :  { %s1987_s18 = smov 0   ;;  %s2261_s0 = inlined_call_operand.vmem [shape: bf16[2,4,4,32], index: 0, kind: input, shape index: {}]   ;;  %s2262_s1 = inlined_call_operand.vmem [shape: bf16[9,32,8], index: 1, kind: input, shape index: {}]   ;;  %s2263_s2 = inlined_call_operand.vmem [shape: f32[1,8], index: 2, kind: input, shape index: {}]   ;;  %s2264_s3 = inlined_call_operand.vmem [shape: bf16[8,32], index: 3, kind: input, shape index: {}]   ;;  %s2265_s4 = inlined_call_operand.vmem [shape: f32[1,32], index: 4, kind: input, shape index: {}]   ;;  %s2266_s5 = inlined_call_operand.vmem [shape: bf16[2,4,4,32], index: 5, kind: output, shape index: {}]  }
   0x1 LB: > { %s1685_s19 = sadd.s32 4294967295, %s1951_s18   ;;  %p1689_p0 = scmp.ge.s32.totalorder %s1951_s18, 1  ;;  %s1951_s18 = sphi %s1987_s18, %s15_s18  }
   0x2   : > { %p187_p1 = scmp.lt.s32.totalorder %s1951_s18, 3 }
   0x4   : > { %p188_p2 = pnand %p1689_p0, %p187_p1 }
   0x5   : > { %v1915_v0 = vld [vmem:[%s2262_s1 + $0x10] sm:$0xff] (!%p188_p2)   ;;  %v1953_v1 = vmov (!%p188_p2), 0.0   ;;  %v1916_v2 = vld [vmem:[%s2262_s1] sm:$0xff] (!%p188_p2)   ;;  %v248_v3 = vlaneseq (!%p188_p2)  ;;  %v1917_v4 = vld [vmem:[%s2262_s1 + $0x18] sm:$0xff] (!%p188_p2)   ;;  %vm1954_vm0 = vmmov (!%p188_p2), 0   ;;  %p215_p3 = scmp.lt.s32.totalorder (!%p188_p2), %s1685_s19, 1 }
   0x6   : > { %191 = sbr.rel (%p188_p2) target bundleno = 532 (0x214), region = 40  ;;  %1825 = vmatprep.subr.bf16.mxu0 (!%p188_p2), %v1953_v1  ;;  %1833 = vmatprep.subr.bf16.mxu1 (!%p188_p2), %v1953_v1  ;;  %v1918_v5 = vld [vmem:[%s2262_s1 + $0x8] sm:$0xff] (!%p188_p2)   ;;  %vm230_vm1 = vcmask (!%p188_p2), 256000   ;;  %v1955_v6 = vmov (!%p188_p2), 0   ;;  %v1956_v7 = vmov (!%p188_p2), 1983009808  }
   0x7   : > { %1826 = vmatpush3.bf16.msra.mxu0 (!%p188_p2), %v1915_v0  ;;  %1829 = vmatprep.mubr.msk.bf16.mxu0 (!%p188_p2), %vm1954_vm0, %v1953_v1  ;;  %231 = vst.msk [vmem:[#allocation2] sm:$0x7] (!%p188_p2), %vm230_vm1, %v1955_v6  ;;  %232 = vst.msk [vmem:[#allocation2 + $0x4] sm:$0x7] (!%p188_p2), %vm230_vm1, %v1955_v6  ;;  %v246_v8 = vunpack.c.l.s4 (!%p188_p2), %v1956_v7  ;;  %v249_v9 = vshrl.u32 (!%p188_p2), %v248_v3, 7  ;;  %vm628_vm5 = vcmask (!%p188_p2), 1040384  }
   0x8   : > { %1834 = vmatpush3.bf16.msra.mxu1 (!%p188_p2), %v1916_v2  ;;  %1827 = vmatprep.subr.bf16.mxu0 (!%p188_p2), %v1953_v1  ;;  %233 = vst.msk [vmem:[#allocation2 + $0x8] sm:$0x7] (!%p188_p2), %vm230_vm1, %v1955_v6  ;;  %234 = vst.msk [vmem:[#allocation2 + $0xc] sm:$0x7] (!%p188_p2), %vm230_vm1, %v1955_v6  ;;  %vm307_vm2 = vsmask.f32 (!%p188_p2), 2306 }
   0x9   : > { %1835 = vmatprep.subr.bf16.mxu1 (!%p188_p2), %v1953_v1  ;;  %1837 = vmatprep.mubr.msk.bf16.mxu1 (!%p188_p2), %vm1954_vm0, %v1953_v1  ;;  %235 = vst.msk [vmem:[#allocation2 + $0x10] sm:$0x7] (!%p188_p2), %vm230_vm1, %v1955_v6  ;;  %236 = vst.msk [vmem:[#allocation2 + $0x14] sm:$0x7] (!%p188_p2), %vm230_vm1, %v1955_v6  ;;  %v247_v10 = vunpack.c.0.s8 (!%p188_p2), %v246_v8  ;;  %vm369_vm3 = vsmask.f32 (!%p188_p2), 1280 }
   0xa   : > { %vm370_vm4 = vsmask.f32 (!%p188_p2), 3336  ;;  %vm2052_vm6 = vmand (!%p188_p2), %vm230_vm1, %vm307_vm2  ;;  %vm372_vm7 = vsmask.f32 (!%p188_p2), 5392  ;;  %vm629_vm8 = vcmask (!%p188_p2), 1042434   ;;  %vm631_vm10 = vcmask (!%p188_p2), 1044484  }
   0xb   : > { %1828 = vmatpush3.bf16.msra.mxu0 (!%p188_p2), %v1917_v4  ;;  %v2045_v17 = vsub.s32 (!%p188_p2), %v247_v10, %v249_v9  ;;  %vm374_vm9 = vsmask.f32 (!%p188_p2), 7448  ;;  %vm633_vm11 = vcmask (!%p188_p2), 1046534   ;;  %vm371_vm12 = vmor (!%p188_p2), %vm369_vm3, %vm370_vm4  ;;  %vm466_vm15 = vcmask (!%p188_p2), 261120  }
   0xc   : > { %1836 = vmatpush3.bf16.msra.mxu1 (!%p188_p2), %v1918_v5  ;;  %1841 = vmatprep.subr.bf16.mxu0 (!%p188_p2), %v1953_v1  ;;  %vm630_vm13 = vmor (!%p188_p2), %vm628_vm5, %vm629_vm8  ;;  %vm1556_vm4 = vcmask (!%p188_p2), 1043456   ;;  %vm1625_vm5 = vcmask (!%p188_p2), 254976  }
   0xd   : > { %s2278_s19 = smov (!%p215_p3, %s1685_s19), 1  ;;  %1849 = vmatprep.subr.bf16.mxu1 %v1953_v1  ;;  %vm2077_vm14 = vmor %vm371_vm12, %vm372_vm7 }
   0xe   : > { %s1794_s28 = sshll.u32 %s2278_s19, 3  ;;  %v1694_v27 = vld.sshfl [vmem:[#allocation2] sm:$0x13 pattern:$0x76325410]  ;;  %vm2082_vm1 = vmor %vm630_vm13, %vm631_vm10 }
   0xf   : > { %s2030_s6 = scalar_lea.vmem %s2261_s0, %s1794_s28  ;;  %v377_v30 = vshrl.u32 %v1694_v27, 16  ;;  %v309_v33 = vld [vmem:[#allocation2 + $0x4] sm:$0x7]  ;;  %v312_v34 = vld [vmem:[#allocation2 + $0x8] sm:$0x7]  ;;  %v344_v35 = vcombine.high %v1694_v27, %v1694_v27  ;;  %v380_v36 = vshll.u32 %v1694_v27, 16  ;;  %vm2091_vm2 = vmor %vm2077_vm14, %vm374_vm9  ;;  %s224_s23 = scalar_lea.vmem %s2266_s5, %s1794_s28 }
  0x10   : > { %v2033_v11 = vld [vmem:[%s2030_s6] sm:$0x3]  ;;  %v2036_v12 = vld [vmem:[%s2030_s6 + $0x2] sm:$0x3]  ;;  %v2039_v13 = vld [vmem:[%s2030_s6 + $0x4] sm:$0x3] }
  0x11   : > { %v237_v14 = vmax.bf16 %v1955_v6, %v2033_v11  ;;  %v238_v15 = vmax.bf16 %v1955_v6, %v2036_v12  ;;  %v239_v16 = vmax.bf16 %v1955_v6, %v2039_v13  ;;  %v315_v39 = vld [vmem:[#allocation2 + $0xc] sm:$0x7]  ;;  %v379_v41 = vrot.slane %v377_v30, 6  ;;  %v2057_v43 = vld [vmem:[%s2030_s6 + $0x6] sm:$0x3]  ;;  %vm2098_vm3 = vmor %vm2082_vm1, %vm633_vm11 }
  0x12   : > { %v382_v42 = vrot.slane %v380_v36, 7  ;;  %v2063_v46 = vld.sshfl [vmem:[#allocation2] sm:$0x12 pattern:$0x76325410]  ;;  %v240_v47 = vmax.bf16 %v1955_v6, %v2057_v43  ;;  %v386_v49 = vshll.u32 %v344_v35, 16 }
  0x13   : > { %v251_v18 = vrot.slane %v237_v14, %v2045_v17  ;;  %v258_v19 = vrot.slane %v238_v15, %v2045_v17  ;;  %v265_v20 = vrot.slane %v239_v16, %v2045_v17  ;;  %v603_v52 = vcombine.high %v2063_v46, %v2063_v46  ;;  %v318_v56 = vld [vmem:[#allocation2 + $0x10] sm:$0x7] }
  0x14   : > { %v272_v50 = vrot.slane %v240_v47, %v2045_v17  ;;  %v383_v51 = vor.u32 %v382_v42, %v379_v41  ;;  %v1712_v53 = vrot.slane %v2063_v46, 9  ;;  %v388_v57 = vrot.slane %v386_v49, 7 }
  0x15   : > { %v274_v21 = vshrl.u32 %v251_v18, 16  ;;  %v277_v22 = vshll.u32 %v251_v18, 16  ;;  %v281_v23 = vshrl.u32 %v258_v19, 16  ;;  %v284_v24 = vshll.u32 %v258_v19, 16 }
  0x16   : > { %v288_v25 = vshrl.u32 %v265_v20, 16  ;;  %v291_v26 = vshll.u32 %v265_v20, 16  ;;  %v295_v54 = vshrl.u32 %v272_v50, 16  ;;  %v298_v55 = vshll.u32 %v272_v50, 16 }
  0x17   : > { %v276_v28 = vrot.slane %v274_v21, 7  ;;  %v283_v29 = vrot.slane %v281_v23, 7  ;;  %v384_v59 = vrot.slane %v383_v51, 2  ;;  %v637_v60 = vrot.slane %v603_v52, 7 }
  0x18   : > { %v290_v31 = vrot.slane %v288_v25, 7  ;;  %v297_v58 = vrot.slane %v295_v54, 7 }
  0x19   : > { %v279_v37 = vor.u32 %v277_v22, %v276_v28  ;;  %v286_v38 = vor.u32 %v284_v24, %v283_v29 }
  0x1a   : > { %v293_v40 = vor.u32 %v291_v26, %v290_v31  ;;  %v300_v62 = vor.u32 %v298_v55, %v297_v58 }
  0x1b   : > { %v310_v44 = vsel %vm2052_vm6, %v279_v37, %v309_v33  ;;  %v313_v45 = vsel %vm2052_vm6, %v286_v38, %v312_v34  ;;  %v389_v34 = vsel %vm2091_vm2, %v384_v59, %v388_v57 }
  0x1c   : > { %311 = vst [vmem:[#allocation2 + $0x4] sm:$0x7] %v310_v44  ;;  %314 = vst [vmem:[#allocation2 + $0x8] sm:$0x7] %v313_v45  ;;  %v316_v48 = vsel %vm2052_vm6, %v293_v40, %v315_v39  ;;  %v319_v10 = vsel %vm2052_vm6, %v300_v62, %v318_v56  ;;  %v638_v40 = vsel %vm2098_vm3, %v1712_v53, %v637_v60  ;;  %v1922_v44 = vld [vmem:[%s2262_s1 + $0x30] sm:$0xff]  }
  0x1d   : > { %317 = vst [vmem:[#allocation2 + $0xc] sm:$0x7] %v316_v48  ;;  %320 = vst [vmem:[#allocation2 + $0x10] sm:$0x7] %v319_v10 }
  0x23   : > { %v1695_v61 = vld.sshfl [vmem:[#allocation2 + $0x4] sm:$0x13 pattern:$0x76325410] }
  0x24   : > { %v1696_v63 = vld.sshfl [vmem:[#allocation2 + $0x8] sm:$0x13 pattern:$0x76325410]  ;;  %v352_v0 = vcombine.high %v1695_v61, %v1695_v61  ;;  %v391_v3 = vshrl.u32 %v1695_v61, 16  ;;  %v394_v4 = vshll.u32 %v1695_v61, 16 }
  0x25   : > { %v1697_v5 = vld.sshfl [vmem:[#allocation2 + $0xc] sm:$0x13 pattern:$0x76325410]  ;;  %v360_v6 = vcombine.high %v1696_v63, %v1696_v63  ;;  %v405_v7 = vshrl.u32 %v1696_v63, 16  ;;  %v408_v8 = vshll.u32 %v1696_v63, 16 }
  0x26   : > { %v368_v14 = vcombine.high %v1697_v5, %v1697_v5  ;;  %v393_v15 = vrot.slane %v391_v3, 6  ;;  %v396_v16 = vrot.slane %v394_v4, 7  ;;  %v400_v18 = vshll.u32 %v352_v0, 16  ;;  %v1924_v63 = vld [vmem:[%s2262_s1 + $0x38] sm:$0xff]  }
  0x27   : > { %v407_v20 = vrot.slane %v405_v7, 6  ;;  %v410_v21 = vrot.slane %v408_v8, 7  ;;  %v414_v22 = vshll.u32 %v360_v6, 16  ;;  %v419_v23 = vshrl.u32 %v1697_v5, 16 }
  0x28   : > { %v397_v24 = vor.u32 %v396_v16, %v393_v15  ;;  %v402_v25 = vrot.slane %v400_v18, 7  ;;  %v422_v26 = vshll.u32 %v1697_v5, 16  ;;  %v428_v27 = vshll.u32 %v368_v14, 16  ;;  %v1921_v15 = vld [vmem:[%s2262_s1 + $0x20] sm:$0xff]  }
  0x29   : > { %v1939_v28 = vld.sshfl [vmem:[#allocation2] sm:$0xf pattern:$0x76325410]  ;;  %v411_v30 = vor.u32 %v410_v21, %v407_v20  ;;  %v416_v31 = vrot.slane %v414_v22, 7  ;;  %v421_v32 = vrot.slane %v419_v23, 6 }
  0x2a   : > { %v1940_v33 = vld.sshfl [vmem:[#allocation2 + $0x8] sm:$0xf pattern:$0x76325410]  ;;  %v398_v35 = vrot.slane %v397_v24, 2  ;;  %v424_v36 = vrot.slane %v422_v26, 7 }
  0x2b   : > { %v412_v37 = vrot.slane %v411_v30, 2  ;;  %v430_v38 = vrot.slane %v428_v27, 7  ;;  %v1709_v39 = vld.sshfl [vmem:[#allocation2 + $0x4] sm:$0x12 pattern:$0x76325410]  ;;  %v531_v50 = vcombine.low %v1939_v28, %v1940_v33 }
  0x2c   : > { %v2108_v41 = vsel %vm2091_vm2, %v398_v35, %v402_v25  ;;  %v425_v42 = vor.u32 %v424_v36, %v421_v32  ;;  %v1710_v45 = vld.sshfl [vmem:[#allocation2 + $0x8] sm:$0x12 pattern:$0x76325410]  ;;  %v611_v46 = vcombine.high %v1709_v39, %v1709_v39  ;;  %v1713_v47 = vrot.slane %v1709_v39, 9  ;;  %v1928_v24 = vld [vmem:[%s2262_s1 + $0x50] sm:$0xff]  }
  0x2d   : > { %v2115_v48 = vsel %vm2091_vm2, %v412_v37, %v416_v31  ;;  %v437_v49 = vcombine.low %v389_v34, %v2108_v41  ;;  %v1711_v51 = vld.sshfl [vmem:[#allocation2 + $0xc] sm:$0x12 pattern:$0x76325410]  ;;  %v619_v52 = vcombine.high %v1710_v45, %v1710_v45  ;;  %v1714_v56 = vrot.slane %v1710_v45, 9  ;;  %1838 = vmatmul.mubr.msk.bf16.vlgmr.msra.gmra.mrb[0].mxu1 %vm466_vm15, %v531_v50 }
  0x2e   : > { %v426_v53 = vrot.slane %v425_v42, 2  ;;  %v627_v54 = vcombine.high %v1711_v51, %v1711_v51  ;;  %v641_v55 = vrot.slane %v611_v46, 7  ;;  %v1715_v58 = vrot.slane %v1711_v51, 9  ;;  %1850 = vmatpush3.bf16.msra.mxu1 %v1922_v44  ;;  %1853 = vmatprep.mubr.msk.bf16.mxu1 %vm1954_vm0, %v1953_v1  ;;  %v1923_v36 = vld [vmem:[%s2262_s1 + $0x28] sm:$0xff]  }
  0x2f   : > { %v645_v57 = vrot.slane %v619_v52, 7  ;;  %v1941_v59 = vld.sshfl [vmem:[#allocation2 + $0x4] sm:$0xf pattern:$0x76325410]  ;;  %v445_v62 = vrot.slane %v437_v49, %v2045_v17  ;;  %1851 = vmatprep.subr.bf16.mxu1 %v1953_v1 }
  0x30   : > { %v1942_v60 = vld.sshfl [vmem:[#allocation2 + $0xc] sm:$0xf pattern:$0x76325410]  ;;  %v2121_v61 = vsel %vm2091_vm2, %v426_v53, %v430_v38  ;;  %v642_v0 = vsel %vm2098_vm3, %v1713_v47, %v641_v55  ;;  %v649_v2 = vrot.slane %v627_v54, 7  ;;  %v920_v53 = vcombine.low %v2108_v41, %v2115_v48  ;;  %v1925_v54 = vld [vmem:[%s2262_s1 + $0x40] sm:$0xff]  }
  0x31   : > { %v1733_v3 = vld.sshfl [vmem:[#allocation2 + $0x10] sm:$0x13 pattern:$0x76325410]  ;;  %v438_v4 = vcombine.low %v2115_v48, %v2121_v61  ;;  %v646_v5 = vsel %vm2098_vm3, %v1714_v56, %v645_v57  ;;  %v656_v6 = vcombine.low %v638_v40, %v642_v0  ;;  %v760_v20 = vcombine.low %v1941_v59, %v1942_v60  ;;  %v1930_v40 = vld [vmem:[%s2262_s1 + $0x58] sm:$0xff]  }
  0x32   : > { %v1744_v7 = vld.sshfl [vmem:[#allocation2 + $0x10] sm:$0x12 pattern:$0x76325410]  ;;  %v650_v8 = vsel %vm2098_vm3, %v1715_v58, %v649_v2  ;;  %v858_v9 = vcombine.high %v1733_v3, %v1733_v3  ;;  %v902_v10 = vshrl.u32 %v1733_v3, 16  ;;  %v905_v18 = vshll.u32 %v1733_v3, 16  ;;  %1852 = vmatpush3.bf16.msra.mxu1 %v1924_v63 }
  0x33   : > { %v2139_v14 = vrot.slane %v438_v4, %v2045_v17  ;;  %v657_v16 = vcombine.low %v646_v5, %v650_v8  ;;  %1865 = vmatprep.subr.bf16.mxu1 %v1953_v1  ;;  %v1034_v26 = vcombine.high %v1744_v7, %v1744_v7  ;;  %v1766_v27 = vld.sshfl [vmem:[#allocation2 + $0x14] sm:$0x13 pattern:$0x76325410]  ;;  %v664_v28 = vrot.slane %v656_v6, %v2045_v17  ;;  %v1929_v63 = vld [vmem:[%s2262_s1 + $0x48] sm:$0xff]   ;;  %v1934_v4 = vld [vmem:[%s2262_s1 + $0x78] sm:$0xff]  }
  0x34   : > { %v904_v21 = vrot.slane %v902_v10, 6  ;;  %v911_v22 = vshll.u32 %v858_v9, 16  ;;  %v907_v25 = vrot.slane %v905_v18, 7  ;;  %v1748_v30 = vrot.slane %v1744_v7, 9  ;;  %v1932_v41 = vld [vmem:[%s2262_s1 + $0x70] sm:$0xff]  }
  0x35   : > { %v453_v23 = vcombine.low %v445_v62, %v2139_v14  ;;  %v1056_v31 = vcombine.low %v642_v0, %v646_v5  ;;  %v2152_v32 = vrot.slane %v657_v16, %v2045_v17  ;;  %1854 = vmatmul.mubr.msk.bf16.vlgmr.msra.gmra.mrb[4].mxu1 %vm466_vm15, %v760_v20  ;;  %v1049_v35 = vrot.slane %v1034_v26, 7  ;;  %v1777_v59 = vld.sshfl [vmem:[#allocation2 + $0x14] sm:$0x12 pattern:$0x76325410]  ;;  %v1933_v16 = vld [vmem:[%s2262_s1 + $0x68] sm:$0xff]  }
  0x36   : > { %v908_v33 = vor.u32 %v907_v25, %v904_v21  ;;  %v913_v34 = vrot.slane %v911_v22, 7  ;;  %v1259_v37 = vcombine.high %v1766_v27, %v1766_v27  ;;  %v1303_v38 = vshrl.u32 %v1766_v27, 16  ;;  %1866 = vmatpush3.bf16.msra.mxu1 %v1928_v24  ;;  %1869 = vmatprep.mubr.msk.bf16.mxu1 %vm1954_vm0, %v1953_v1  ;;  %v1943_v6 = vld.sshfl [vmem:[#allocation2 + $0x8] sm:$0xf pattern:$0x76325410] }
  0x37   : > { %1830 = vmatmul.mubr.msk.bf16.vlgmr.msra.gmra.mrb[0].mxu0 %vm466_vm15, %v453_v23  ;;  %v1306_v39 = vshll.u32 %v1766_v27, 16  ;;  %v2166_v44 = vsel %vm2098_vm3, %v1748_v30, %v1049_v35  ;;  %v1064_v45 = vrot.slane %v1056_v31, %v2045_v17  ;;  %1867 = vmatprep.subr.bf16.mxu1 %v1953_v1  ;;  %v672_v51 = vcombine.low %v664_v28, %v2152_v32  ;;  %v1944_v19 = vld.sshfl [vmem:[#allocation2 + $0x10] sm:$0xf pattern:$0x76325410]  ;;  %v1937_v21 = vld [vmem:[%s2262_s1 + $0x80] sm:$0xff]  }
  0x38   : > { %1842 = vmatpush3.bf16.msra.mxu0 %v1921_v15  ;;  %1845 = vmatprep.mubr.msk.bf16.mxu0 %vm1954_vm0, %v1953_v1  ;;  %v909_v42 = vrot.slane %v908_v33, 2  ;;  %v1057_v46 = vcombine.low %v650_v8, %v2166_v44  ;;  %v1305_v47 = vrot.slane %v1303_v38, 6  ;;  %v1312_v50 = vshll.u32 %v1259_v37, 16  ;;  %v1931_v8 = vld [vmem:[%s2262_s1 + $0x60] sm:$0xff]   ;;  %v1938_v22 = vld [vmem:[%s2262_s1 + $0x88] sm:$0xff]  }
  0x39   : > { %1843 = vmatprep.subr.bf16.mxu0 %v1953_v1  ;;  %v1308_v49 = vrot.slane %v1306_v39, 7  ;;  %v1435_v2 = vcombine.high %v1777_v59, %v1777_v59  ;;  %v1781_v9 = vrot.slane %v1777_v59, 9  ;;  %v1544_v24 = vld [vmem:[%s2264_s3] sm:$0xf] }
  0x3a   : > { %v914_v52 = vsel %vm2091_vm2, %v909_v42, %v913_v34  ;;  %v1071_v56 = vrot.slane %v1057_v46, %v2045_v17  ;;  %v1314_v58 = vrot.slane %v1312_v50, 7  ;;  %1868 = vmatpush3.bf16.msra.mxu1 %v1930_v40 }
  0x3b   : > { %v921_v55 = vcombine.low %v2121_v61, %v914_v52  ;;  %v1309_v57 = vor.u32 %v1308_v49, %v1305_v47  ;;  %1881 = vmatprep.subr.bf16.mxu1 %v1953_v1  ;;  %v928_v61 = vrot.slane %v920_v53, %v2045_v17  ;;  %v1450_v10 = vrot.slane %v1435_v2, 7 }
  0x3c   : > { %1844 = vmatpush3.bf16.msra.mxu0 %v1923_v36  ;;  %v1072_v60 = vcombine.low %v1064_v45, %v1071_v56 }
  0x3d   : > { %1857 = vmatprep.subr.bf16.mxu0 %v1953_v1  ;;  %v1310_v48 = vrot.slane %v1309_v57, 2  ;;  %v935_v62 = vrot.slane %v921_v55, %v2045_v17  ;;  %v1451_v18 = vsel %vm2098_vm3, %v1781_v9, %v1450_v10  ;;  %v1789_v9 = vld [vmem:[%s2263_s2] ss:$0 sm:$0xff] }
  0x3e   : > { %1870 = vmatmul.mubr.msk.bf16.vlgmr.msra.gmra.mrb[8].mxu1 %vm466_vm15, %v1072_v60  ;;  %v1458_v20 = vcombine.low %v2166_v44, %v1451_v18 }
  0x3f   : > { %1846 = vmatmul.mubr.msk.bf16.vlgmr.msra.gmra.mrb[4].mxu0 %vm466_vm15, %v672_v51  ;;  %v1315_v0 = vsel %vm2091_vm2, %v1310_v48, %v1314_v58  ;;  %1882 = vmatpush3.bf16.msra.mxu1 %v1932_v41  ;;  %v936_v5 = vcombine.low %v928_v61, %v935_v62 }
  0x40   : > { %1858 = vmatpush3.bf16.msra.mxu0 %v1925_v54  ;;  %1861 = vmatprep.mubr.msk.bf16.mxu0 %vm1954_vm0, %v1953_v1  ;;  %v1322_v3 = vcombine.low %v914_v52, %v1315_v0  ;;  %v1472_v29 = vrot.slane %v1458_v20, %v2045_v17 }
  0x41   : > { %1859 = vmatprep.subr.bf16.mxu0 %v1953_v1  ;;  %1885 = vmatprep.mubr.msk.bf16.mxu1 %vm1954_vm0, %v1953_v1 }
  0x42   : > { %1883 = vmatprep.subr.bf16.mxu1 %v1953_v1  ;;  %v1336_v7 = vrot.slane %v1322_v3, %v2045_v17  ;;  %v1473_v23 = vcombine.low %v2152_v32, %v1472_v29  ;;  %v1558_v17 = vsel %vm1556_vm4, %v1544_v24, 0  ;;  %v1601_v24 = vunpack.c.l.bf16 %v2033_v11 }
  0x43   : > { %1884 = vmatpush3.bf16.msra.mxu1 %v1934_v4 }
  0x44   : > { %1860 = vmatpush3.bf16.msra.mxu0 %v1929_v63  ;;  %v1337_v15 = vcombine.low %v2139_v14, %v1336_v7  ;;  %1897 = vmatprep.subr.bf16.mxu1 %v1953_v1  ;;  %v1161_v14 = vcombine.low %v1943_v6, %v1944_v19 }
  0x45   : > { %1873 = vmatprep.subr.bf16.mxu0 %v1953_v1 }
  0x46   : > { %1886 = vmatmul.mubr.msk.bf16.vlgmr.msra.gmra.mrb[12].mxu1 %vm466_vm15, %v1337_v15 }
  0x47   : > { %1862 = vmatmul.mubr.msk.bf16.vlgmr.msra.gmra.mrb[8].mxu0 %vm466_vm15, %v936_v5  ;;  %1899 = vmatprep.mubr.msk.bf16.mxu1 %vm1954_vm0, %v1953_v1 }
  0x48   : > { %1874 = vmatpush3.bf16.msra.mxu0 %v1931_v8  ;;  %1877 = vmatprep.mubr.msk.bf16.mxu0 %vm1954_vm0, %v1953_v1 }
  0x49   : > { %1875 = vmatprep.subr.bf16.mxu0 %v1953_v1  ;;  %1898 = vmatpush3.bf16.msra.mxu1 %v1558_v17  ;;  %v1602_v17 = vunpack.c.l.bf16 %v2036_v12 }
  0x4c   : > { %1876 = vmatpush3.bf16.msra.mxu0 %v1933_v16 }
  0x4d   : > { %1889 = vmatprep.subr.bf16.mxu0 %v1953_v1 }
  0x4f   : > { %1878 = vmatmul.mubr.msk.bf16.vlgmr.msra.gmra.mrb[12].mxu0 %vm466_vm15, %v1161_v14 }
  0x50   : > { %1890 = vmatpush3.bf16.msra.mxu0 %v1937_v21  ;;  %1893 = vmatprep.mubr.msk.bf16.mxu0 %vm1954_vm0, %v1953_v1  ;;  %vm1552_vm0 = vcmask 64512  }
  0x51   : > { %1891 = vmatprep.subr.bf16.mxu0 %v1953_v1 }
  0x54   : > { %1892 = vmatpush3.bf16.msra.mxu0 %v1938_v22 }
  0x57   : > { %1894 = vmatmul.mubr.msk.bf16.vlgmr.msra.gmra.mrb[16].mxu0 %vm466_vm15, %v1473_v23 }
 0x100   : > { %v581_v25 = vpop.f32.mrb[0].mxu1 }
 0x101   : > { %v1839_v26 = vpop.f32.mrb[1].mxu1 }
 0x102   : > { %v584_v27 = vpop.f32.mrb[2].mxu1  ;;  %v1604_v26 = vunpack.c.l.bf16 %v2057_v43 }
 0x103   : > { %v1840_v28 = vpop.f32.mrb[3].mxu1 }
 0x104   : > { %v1609_v28 = vcombine.low %v1601_v24, %v1602_v17 }
 0x108   : > { %v810_v31 = vpop.f32.mrb[4].mxu1 }
 0x109   : > { %v1855_v34 = vpop.f32.mrb[5].mxu1 }
 0x10a   : > { %v504_v30 = vpop.f32.mrb[0].mxu0  ;;  %v813_v35 = vpop.f32.mrb[6].mxu1 }
 0x10b   : > { %v582_v33 = vadd.f32 %v581_v25, %v504_v30  ;;  %v1831_v1 = vpop.f32.mrb[1].mxu0  ;;  %v1856_v38 = vpop.f32.mrb[7].mxu1  ;;  %v1603_v25 = vunpack.c.l.bf16 %v2039_v13 }
 0x10c   : > { %v507_v32 = vpop.f32.mrb[2].mxu0 }
 0x10d   : > { %v585_v36 = vadd.f32 %v584_v27, %v507_v32  ;;  %v1832_v37 = vpop.f32.mrb[3].mxu0  ;;  %v1790_v27 = vld [vmem:[%s2265_s4] ss:$0 sm:$0xff]  ;;  %v1610_v1 = vcombine.low %v1603_v25, %v1604_v26 }
 0x111   : > { %v1122_v45 = vpop.f32.mrb[8].mxu1 }
 0x112   : > { %v722_v39 = vpop.f32.mrb[4].mxu0  ;;  %v1871_v50 = vpop.f32.mrb[9].mxu1 }
 0x113   : > { %v729_v40 = vadd.f32 %v722_v39, %v582_v33  ;;  %v1847_v42 = vpop.f32.mrb[5].mxu0  ;;  %v1125_v51 = vpop.f32.mrb[10].mxu1 }
 0x114   : > { %v725_v44 = vpop.f32.mrb[6].mxu0  ;;  %v1872_v53 = vpop.f32.mrb[11].mxu1 }
 0x115   : > { %v730_v46 = vadd.f32 %v725_v44, %v585_v36  ;;  %v817_v47 = vadd.f32 %v810_v31, %v729_v40  ;;  %v1848_v49 = vpop.f32.mrb[7].mxu0 }
 0x117   : > { %v818_v52 = vadd.f32 %v813_v35, %v730_v46 }
 0x119   : > { %v1387_v58 = vpop.f32.mrb[12].mxu1 }
 0x11a   : > { %v986_v54 = vpop.f32.mrb[8].mxu0  ;;  %v1887_v48 = vpop.f32.mrb[13].mxu1 }
 0x11b   : > { %v993_v55 = vadd.f32 %v986_v54, %v817_v47  ;;  %v1863_v56 = vpop.f32.mrb[9].mxu0  ;;  %v1390_v61 = vpop.f32.mrb[14].mxu1 }
 0x11c   : > { %v989_v57 = vpop.f32.mrb[10].mxu0  ;;  %v1888_v63 = vpop.f32.mrb[15].mxu1 }
 0x11d   : > { %v994_v59 = vadd.f32 %v989_v57, %v818_v52  ;;  %v1129_v60 = vadd.f32 %v1122_v45, %v993_v55  ;;  %v1864_v41 = vpop.f32.mrb[11].mxu0 }
 0x11f   : > { %v1130_v62 = vadd.f32 %v1125_v51, %v994_v59 }
 0x122   : > { %v1211_v0 = vpop.f32.mrb[12].mxu0 }
 0x123   : > { %v1218_v2 = vadd.f32 %v1211_v0, %v1129_v60  ;;  %v1879_v3 = vpop.f32.mrb[13].mxu0 }
 0x124   : > { %v1214_v4 = vpop.f32.mrb[14].mxu0 }
 0x125   : > { %v1219_v5 = vadd.f32 %v1214_v4, %v1130_v62  ;;  %v1394_v6 = vadd.f32 %v1387_v58, %v1218_v2  ;;  %v1880_v19 = vpop.f32.mrb[15].mxu0 }
 0x127   : > { %v1395_v7 = vadd.f32 %v1390_v61, %v1219_v5 }
 0x12a   : > { %v1523_v8 = vpop.f32.mrb[16].mxu0 }
 0x12b   : > { %v1530_v10 = vadd.f32 %v1523_v8, %v1394_v6  ;;  %v1895_v15 = vpop.f32.mrb[17].mxu0 }
 0x12c   : > { %v1526_v16 = vpop.f32.mrb[18].mxu0 }
 0x12d   : > { %v1539_v18 = vadd.f32 %v1789_v9, %v1530_v10  ;;  %v1531_v14 = vadd.f32 %v1526_v16, %v1395_v7  ;;  %v1896_v20 = vpop.f32.mrb[19].mxu0 }
 0x12f   : > { %v1540_v21 = vadd.f32 %v1789_v9, %v1531_v14  ;;  %v1541_v29 = vmax.f32 %v1539_v18, 0.0 }
 0x131   : > { %v1542_v22 = vmax.f32 %v1540_v21, 0.0 }
 0x133   : > { %v1543_v23 = vpack.c.bf16 %v1542_v22, %v1541_v29 }
 0x135   : > { %1900 = vmatmul.mubr.msk.bf16.vlgmr.msra.gmra.mrb[16].mxu1 %vm1552_vm0, %v1543_v23 }
 0x208   : > { %v1594_v30 = vpop.f32.mrb[16].mxu1 }
 0x209   : > { %v1595_v31 = vadd.f32 %v1790_v27, %v1594_v30  ;;  %v1901_v33 = vpop.f32.mrb[17].mxu1 }
 0x20a   : > { %v1597_v34 = vpop.f32.mrb[18].mxu1 }
 0x20b   : > { %v1613_v32 = vadd.f32 %v1609_v28, %v1595_v31  ;;  %v1598_v35 = vadd.f32 %v1790_v27, %v1597_v34  ;;  %v1902_v36 = vpop.f32.mrb[19].mxu1 }
 0x20d   : > { %v1617_v11 = vcombine.high %v1613_v32, %v1613_v32  ;;  %v1621_v12 = vpack.c.bf16 %v1613_v32, %v1613_v32  ;;  %v1614_v13 = vadd.f32 %v1610_v1, %v1598_v35 }
 0x20f   : > { %v1622_v43 = vpack.c.bf16 %v1617_v11, %v1617_v11  ;;  %1626 = vst.msk [vmem:[%s224_s23] sm:$0x3] %vm1625_vm5, %v1621_v12  ;;  %v1618_v37 = vcombine.high %v1614_v13, %v1614_v13  ;;  %v1623_v38 = vpack.c.bf16 %v1614_v13, %v1614_v13 }
 0x211   : > { %1627 = vst.msk [vmem:[%s224_s23 + $0x2] sm:$0x3] %vm1625_vm5, %v1622_v43  ;;  %v1624_v39 = vpack.c.bf16 %v1618_v37, %v1618_v37  ;;  %1628 = vst.msk [vmem:[%s224_s23 + $0x4] sm:$0x3] %vm1625_vm5, %v1623_v38 }
 0x213   : > { %1629 = vst.msk [vmem:[%s224_s23 + $0x6] sm:$0x3] %vm1625_vm5, %v1624_v39 }
 0x214 PF: > { %s15_s18 = sadd.s32 1, %s1951_s18  }
 0x215   : > { %p12_p4 = scmp.ge.s32.totalorder %s15_s18, 4  }
 0x217   :  { %14 = sbr.rel (!%p12_p4) target bundleno = 1 (0x1), region = 80 }

// kernel: _lambda_.9
= control target key start
LH: loop header
LB: loop body
LE: loop exit
PB: predicated region body
PF: predicated region fallthrough
CT: control target
= control target key end

     0   :  { %s1989_s18 = smov 0   ;;  %s2263_s0 = inlined_call_operand.vmem [shape: bf16[2,4,4,32], index: 0, kind: input, shape index: {}]   ;;  %s2264_s1 = inlined_call_operand.vmem [shape: bf16[9,32,8], index: 1, kind: input, shape index: {}]   ;;  %s2265_s2 = inlined_call_operand.vmem [shape: f32[1,8], index: 2, kind: input, shape index: {}]   ;;  %s2266_s3 = inlined_call_operand.vmem [shape: bf16[8,32], index: 3, kind: input, shape index: {}]   ;;  %s2267_s4 = inlined_call_operand.vmem [shape: f32[1,32], index: 4, kind: input, shape index: {}]   ;;  %s2268_s5 = inlined_call_operand.vmem [shape: bf16[2,4,4,32], index: 5, kind: output, shape index: {}]  }
   0x1 LB: > { %s1687_s19 = sadd.s32 4294967295, %s1953_s18   ;;  %p1691_p0 = scmp.ge.s32.totalorder %s1953_s18, 1  ;;  %s1953_s18 = sphi %s1989_s18, %s15_s18  }
   0x2   : > { %p187_p1 = scmp.lt.s32.totalorder %s1953_s18, 3 }
   0x4   : > { %p188_p2 = pnand %p1691_p0, %p187_p1 }
   0x5   : > { %v1917_v0 = vld [vmem:[%s2264_s1 + $0x10] sm:$0xff] (!%p188_p2)   ;;  %v1955_v1 = vmov (!%p188_p2), 0.0   ;;  %v1918_v2 = vld [vmem:[%s2264_s1] sm:$0xff] (!%p188_p2)   ;;  %v248_v3 = vlaneseq (!%p188_p2)  ;;  %v1919_v4 = vld [vmem:[%s2264_s1 + $0x18] sm:$0xff] (!%p188_p2)   ;;  %vm1956_vm0 = vmmov (!%p188_p2), 0   ;;  %p215_p3 = scmp.lt.s32.totalorder (!%p188_p2), %s1687_s19, 1 }
   0x6   : > { %191 = sbr.rel (%p188_p2) target bundleno = 534 (0x216), region = 40  ;;  %1827 = vmatprep.subr.bf16.mxu0 (!%p188_p2), %v1955_v1  ;;  %1835 = vmatprep.subr.bf16.mxu1 (!%p188_p2), %v1955_v1  ;;  %v1920_v5 = vld [vmem:[%s2264_s1 + $0x8] sm:$0xff] (!%p188_p2)   ;;  %vm230_vm1 = vcmask (!%p188_p2), 256000   ;;  %v1957_v6 = vmov (!%p188_p2), 0   ;;  %v1958_v7 = vmov (!%p188_p2), 1983009808  }
   0x7   : > { %1828 = vmatpush3.bf16.msra.mxu0 (!%p188_p2), %v1917_v0  ;;  %1831 = vmatprep.mubr.msk.bf16.mxu0 (!%p188_p2), %vm1956_vm0, %v1955_v1  ;;  %231 = vst.msk [vmem:[#allocation2] sm:$0x7] (!%p188_p2), %vm230_vm1, %v1957_v6  ;;  %232 = vst.msk [vmem:[#allocation2 + $0x4] sm:$0x7] (!%p188_p2), %vm230_vm1, %v1957_v6  ;;  %v246_v8 = vunpack.c.l.s4 (!%p188_p2), %v1958_v7  ;;  %v249_v9 = vshrl.u32 (!%p188_p2), %v248_v3, 7  ;;  %vm628_vm5 = vcmask (!%p188_p2), 1040384  }
   0x8   : > { %1836 = vmatpush3.bf16.msra.mxu1 (!%p188_p2), %v1918_v2  ;;  %1829 = vmatprep.subr.bf16.mxu0 (!%p188_p2), %v1955_v1  ;;  %233 = vst.msk [vmem:[#allocation2 + $0x8] sm:$0x7] (!%p188_p2), %vm230_vm1, %v1957_v6  ;;  %234 = vst.msk [vmem:[#allocation2 + $0xc] sm:$0x7] (!%p188_p2), %vm230_vm1, %v1957_v6  ;;  %vm307_vm2 = vsmask.f32 (!%p188_p2), 2306 }
   0x9   : > { %1837 = vmatprep.subr.bf16.mxu1 (!%p188_p2), %v1955_v1  ;;  %1839 = vmatprep.mubr.msk.bf16.mxu1 (!%p188_p2), %vm1956_vm0, %v1955_v1  ;;  %235 = vst.msk [vmem:[#allocation2 + $0x10] sm:$0x7] (!%p188_p2), %vm230_vm1, %v1957_v6  ;;  %236 = vst.msk [vmem:[#allocation2 + $0x14] sm:$0x7] (!%p188_p2), %vm230_vm1, %v1957_v6  ;;  %v247_v10 = vunpack.c.0.s8 (!%p188_p2), %v246_v8  ;;  %vm369_vm3 = vsmask.f32 (!%p188_p2), 1280 }
   0xa   : > { %vm370_vm4 = vsmask.f32 (!%p188_p2), 3336  ;;  %vm2054_vm6 = vmand (!%p188_p2), %vm230_vm1, %vm307_vm2  ;;  %vm372_vm7 = vsmask.f32 (!%p188_p2), 5392  ;;  %vm629_vm8 = vcmask (!%p188_p2), 1042434   ;;  %vm631_vm10 = vcmask (!%p188_p2), 1044484  }
   0xb   : > { %1830 = vmatpush3.bf16.msra.mxu0 (!%p188_p2), %v1919_v4  ;;  %v2047_v17 = vsub.s32 (!%p188_p2), %v247_v10, %v249_v9  ;;  %vm374_vm9 = vsmask.f32 (!%p188_p2), 7448  ;;  %vm633_vm11 = vcmask (!%p188_p2), 1046534   ;;  %vm371_vm12 = vmor (!%p188_p2), %vm369_vm3, %vm370_vm4  ;;  %vm466_vm15 = vcmask (!%p188_p2), 261120  }
   0xc   : > { %1838 = vmatpush3.bf16.msra.mxu1 (!%p188_p2), %v1920_v5  ;;  %1843 = vmatprep.subr.bf16.mxu0 (!%p188_p2), %v1955_v1  ;;  %vm630_vm13 = vmor (!%p188_p2), %vm628_vm5, %vm629_vm8  ;;  %vm1556_vm4 = vcmask (!%p188_p2), 1043456   ;;  %vm1627_vm5 = vcmask (!%p188_p2), 254976  }
   0xd   : > { %s2280_s19 = smov (!%p215_p3, %s1687_s19), 1  ;;  %1851 = vmatprep.subr.bf16.mxu1 %v1955_v1  ;;  %vm2079_vm14 = vmor %vm371_vm12, %vm372_vm7 }
   0xe   : > { %s1796_s28 = sshll.u32 %s2280_s19, 3  ;;  %v1696_v27 = vld.sshfl [vmem:[#allocation2] sm:$0x13 pattern:$0x76325410]  ;;  %vm2084_vm1 = vmor %vm630_vm13, %vm631_vm10 }
   0xf   : > { %s2032_s6 = scalar_lea.vmem %s2263_s0, %s1796_s28  ;;  %v377_v30 = vshrl.u32 %v1696_v27, 16  ;;  %v309_v33 = vld [vmem:[#allocation2 + $0x4] sm:$0x7]  ;;  %v312_v34 = vld [vmem:[#allocation2 + $0x8] sm:$0x7]  ;;  %v344_v35 = vcombine.high %v1696_v27, %v1696_v27  ;;  %v380_v36 = vshll.u32 %v1696_v27, 16  ;;  %vm2093_vm2 = vmor %vm2079_vm14, %vm374_vm9  ;;  %s224_s23 = scalar_lea.vmem %s2268_s5, %s1796_s28 }
  0x10   : > { %v2035_v11 = vld [vmem:[%s2032_s6] sm:$0x3]  ;;  %v2038_v12 = vld [vmem:[%s2032_s6 + $0x2] sm:$0x3]  ;;  %v2041_v13 = vld [vmem:[%s2032_s6 + $0x4] sm:$0x3] }
  0x11   : > { %v237_v14 = vmax.bf16 %v1957_v6, %v2035_v11  ;;  %v238_v15 = vmax.bf16 %v1957_v6, %v2038_v12  ;;  %v239_v16 = vmax.bf16 %v1957_v6, %v2041_v13  ;;  %v315_v39 = vld [vmem:[#allocation2 + $0xc] sm:$0x7]  ;;  %v379_v41 = vrot.slane %v377_v30, 6  ;;  %v2059_v43 = vld [vmem:[%s2032_s6 + $0x6] sm:$0x3]  ;;  %vm2100_vm3 = vmor %vm2084_vm1, %vm633_vm11 }
  0x12   : > { %v382_v42 = vrot.slane %v380_v36, 7  ;;  %v2065_v46 = vld.sshfl [vmem:[#allocation2] sm:$0x12 pattern:$0x76325410]  ;;  %v240_v47 = vmax.bf16 %v1957_v6, %v2059_v43  ;;  %v386_v49 = vshll.u32 %v344_v35, 16 }
  0x13   : > { %v251_v18 = vrot.slane %v237_v14, %v2047_v17  ;;  %v258_v19 = vrot.slane %v238_v15, %v2047_v17  ;;  %v265_v20 = vrot.slane %v239_v16, %v2047_v17  ;;  %v603_v52 = vcombine.high %v2065_v46, %v2065_v46  ;;  %v318_v56 = vld [vmem:[#allocation2 + $0x10] sm:$0x7] }
  0x14   : > { %v272_v50 = vrot.slane %v240_v47, %v2047_v17  ;;  %v383_v51 = vor.u32 %v382_v42, %v379_v41  ;;  %v1714_v53 = vrot.slane %v2065_v46, 9  ;;  %v388_v57 = vrot.slane %v386_v49, 7 }
  0x15   : > { %v274_v21 = vshrl.u32 %v251_v18, 16  ;;  %v277_v22 = vshll.u32 %v251_v18, 16  ;;  %v281_v23 = vshrl.u32 %v258_v19, 16  ;;  %v284_v24 = vshll.u32 %v258_v19, 16 }
  0x16   : > { %v288_v25 = vshrl.u32 %v265_v20, 16  ;;  %v291_v26 = vshll.u32 %v265_v20, 16  ;;  %v295_v54 = vshrl.u32 %v272_v50, 16  ;;  %v298_v55 = vshll.u32 %v272_v50, 16 }
  0x17   : > { %v276_v28 = vrot.slane %v274_v21, 7  ;;  %v283_v29 = vrot.slane %v281_v23, 7  ;;  %v384_v59 = vrot.slane %v383_v51, 2  ;;  %v637_v60 = vrot.slane %v603_v52, 7 }
  0x18   : > { %v290_v31 = vrot.slane %v288_v25, 7  ;;  %v297_v58 = vrot.slane %v295_v54, 7 }
  0x19   : > { %v279_v37 = vor.u32 %v277_v22, %v276_v28  ;;  %v286_v38 = vor.u32 %v284_v24, %v283_v29 }
  0x1a   : > { %v293_v40 = vor.u32 %v291_v26, %v290_v31  ;;  %v300_v62 = vor.u32 %v298_v55, %v297_v58 }
  0x1b   : > { %v310_v44 = vsel %vm2054_vm6, %v279_v37, %v309_v33  ;;  %v313_v45 = vsel %vm2054_vm6, %v286_v38, %v312_v34  ;;  %v389_v34 = vsel %vm2093_vm2, %v384_v59, %v388_v57 }
  0x1c   : > { %311 = vst [vmem:[#allocation2 + $0x4] sm:$0x7] %v310_v44  ;;  %314 = vst [vmem:[#allocation2 + $0x8] sm:$0x7] %v313_v45  ;;  %v316_v48 = vsel %vm2054_vm6, %v293_v40, %v315_v39  ;;  %v319_v10 = vsel %vm2054_vm6, %v300_v62, %v318_v56  ;;  %v638_v40 = vsel %vm2100_vm3, %v1714_v53, %v637_v60  ;;  %v1924_v44 = vld [vmem:[%s2264_s1 + $0x30] sm:$0xff]  }
  0x1d   : > { %317 = vst [vmem:[#allocation2 + $0xc] sm:$0x7] %v316_v48  ;;  %320 = vst [vmem:[#allocation2 + $0x10] sm:$0x7] %v319_v10 }
  0x23   : > { %v1697_v61 = vld.sshfl [vmem:[#allocation2 + $0x4] sm:$0x13 pattern:$0x76325410] }
  0x24   : > { %v1698_v63 = vld.sshfl [vmem:[#allocation2 + $0x8] sm:$0x13 pattern:$0x76325410]  ;;  %v352_v0 = vcombine.high %v1697_v61, %v1697_v61  ;;  %v391_v3 = vshrl.u32 %v1697_v61, 16  ;;  %v394_v4 = vshll.u32 %v1697_v61, 16 }
  0x25   : > { %v1699_v5 = vld.sshfl [vmem:[#allocation2 + $0xc] sm:$0x13 pattern:$0x76325410]  ;;  %v360_v6 = vcombine.high %v1698_v63, %v1698_v63  ;;  %v405_v7 = vshrl.u32 %v1698_v63, 16  ;;  %v408_v8 = vshll.u32 %v1698_v63, 16 }
  0x26   : > { %v368_v14 = vcombine.high %v1699_v5, %v1699_v5  ;;  %v393_v15 = vrot.slane %v391_v3, 6  ;;  %v396_v16 = vrot.slane %v394_v4, 7  ;;  %v400_v18 = vshll.u32 %v352_v0, 16  ;;  %v1926_v63 = vld [vmem:[%s2264_s1 + $0x38] sm:$0xff]  }
  0x27   : > { %v407_v20 = vrot.slane %v405_v7, 6  ;;  %v410_v21 = vrot.slane %v408_v8, 7  ;;  %v414_v22 = vshll.u32 %v360_v6, 16  ;;  %v419_v23 = vshrl.u32 %v1699_v5, 16 }
  0x28   : > { %v397_v24 = vor.u32 %v396_v16, %v393_v15  ;;  %v402_v25 = vrot.slane %v400_v18, 7  ;;  %v422_v26 = vshll.u32 %v1699_v5, 16  ;;  %v428_v27 = vshll.u32 %v368_v14, 16  ;;  %v1923_v15 = vld [vmem:[%s2264_s1 + $0x20] sm:$0xff]  }
  0x29   : > { %v1941_v28 = vld.sshfl [vmem:[#allocation2] sm:$0xf pattern:$0x76325410]  ;;  %v411_v30 = vor.u32 %v410_v21, %v407_v20  ;;  %v416_v31 = vrot.slane %v414_v22, 7  ;;  %v421_v32 = vrot.slane %v419_v23, 6 }
  0x2a   : > { %v1942_v33 = vld.sshfl [vmem:[#allocation2 + $0x8] sm:$0xf pattern:$0x76325410]  ;;  %v398_v35 = vrot.slane %v397_v24, 2  ;;  %v424_v36 = vrot.slane %v422_v26, 7 }
  0x2b   : > { %v412_v37 = vrot.slane %v411_v30, 2  ;;  %v430_v38 = vrot.slane %v428_v27, 7  ;;  %v1711_v39 = vld.sshfl [vmem:[#allocation2 + $0x4] sm:$0x12 pattern:$0x76325410]  ;;  %v531_v50 = vcombine.low %v1941_v28, %v1942_v33 }
  0x2c   : > { %v2110_v41 = vsel %vm2093_vm2, %v398_v35, %v402_v25  ;;  %v425_v42 = vor.u32 %v424_v36, %v421_v32  ;;  %v1712_v45 = vld.sshfl [vmem:[#allocation2 + $0x8] sm:$0x12 pattern:$0x76325410]  ;;  %v611_v46 = vcombine.high %v1711_v39, %v1711_v39  ;;  %v1715_v47 = vrot.slane %v1711_v39, 9  ;;  %v1930_v24 = vld [vmem:[%s2264_s1 + $0x50] sm:$0xff]  }
  0x2d   : > { %v2117_v48 = vsel %vm2093_vm2, %v412_v37, %v416_v31  ;;  %v437_v49 = vcombine.low %v389_v34, %v2110_v41  ;;  %v1713_v51 = vld.sshfl [vmem:[#allocation2 + $0xc] sm:$0x12 pattern:$0x76325410]  ;;  %v619_v52 = vcombine.high %v1712_v45, %v1712_v45  ;;  %v1716_v56 = vrot.slane %v1712_v45, 9  ;;  %1840 = vmatmul.mubr.msk.bf16.vlgmr.msra.gmra.mrb[0].mxu1 %vm466_vm15, %v531_v50 }
  0x2e   : > { %v426_v53 = vrot.slane %v425_v42, 2  ;;  %v627_v54 = vcombine.high %v1713_v51, %v1713_v51  ;;  %v641_v55 = vrot.slane %v611_v46, 7  ;;  %v1717_v58 = vrot.slane %v1713_v51, 9  ;;  %1852 = vmatpush3.bf16.msra.mxu1 %v1924_v44  ;;  %1855 = vmatprep.mubr.msk.bf16.mxu1 %vm1956_vm0, %v1955_v1  ;;  %v1925_v36 = vld [vmem:[%s2264_s1 + $0x28] sm:$0xff]  }
  0x2f   : > { %v645_v57 = vrot.slane %v619_v52, 7  ;;  %v1943_v59 = vld.sshfl [vmem:[#allocation2 + $0x4] sm:$0xf pattern:$0x76325410]  ;;  %v445_v62 = vrot.slane %v437_v49, %v2047_v17  ;;  %1853 = vmatprep.subr.bf16.mxu1 %v1955_v1 }
  0x30   : > { %v1944_v60 = vld.sshfl [vmem:[#allocation2 + $0xc] sm:$0xf pattern:$0x76325410]  ;;  %v2123_v61 = vsel %vm2093_vm2, %v426_v53, %v430_v38  ;;  %v642_v0 = vsel %vm2100_vm3, %v1715_v47, %v641_v55  ;;  %v649_v2 = vrot.slane %v627_v54, 7  ;;  %v920_v53 = vcombine.low %v2110_v41, %v2117_v48  ;;  %v1927_v54 = vld [vmem:[%s2264_s1 + $0x40] sm:$0xff]  }
  0x31   : > { %v1735_v3 = vld.sshfl [vmem:[#allocation2 + $0x10] sm:$0x13 pattern:$0x76325410]  ;;  %v438_v4 = vcombine.low %v2117_v48, %v2123_v61  ;;  %v646_v5 = vsel %vm2100_vm3, %v1716_v56, %v645_v57  ;;  %v656_v6 = vcombine.low %v638_v40, %v642_v0  ;;  %v760_v20 = vcombine.low %v1943_v59, %v1944_v60  ;;  %v1932_v40 = vld [vmem:[%s2264_s1 + $0x58] sm:$0xff]  }
  0x32   : > { %v1746_v7 = vld.sshfl [vmem:[#allocation2 + $0x10] sm:$0x12 pattern:$0x76325410]  ;;  %v650_v8 = vsel %vm2100_vm3, %v1717_v58, %v649_v2  ;;  %v858_v9 = vcombine.high %v1735_v3, %v1735_v3  ;;  %v902_v10 = vshrl.u32 %v1735_v3, 16  ;;  %v905_v18 = vshll.u32 %v1735_v3, 16  ;;  %1854 = vmatpush3.bf16.msra.mxu1 %v1926_v63 }
  0x33   : > { %v2141_v14 = vrot.slane %v438_v4, %v2047_v17  ;;  %v657_v16 = vcombine.low %v646_v5, %v650_v8  ;;  %1867 = vmatprep.subr.bf16.mxu1 %v1955_v1  ;;  %v1034_v26 = vcombine.high %v1746_v7, %v1746_v7  ;;  %v1768_v27 = vld.sshfl [vmem:[#allocation2 + $0x14] sm:$0x13 pattern:$0x76325410]  ;;  %v664_v28 = vrot.slane %v656_v6, %v2047_v17  ;;  %v1931_v63 = vld [vmem:[%s2264_s1 + $0x48] sm:$0xff]   ;;  %v1936_v4 = vld [vmem:[%s2264_s1 + $0x78] sm:$0xff]  }
  0x34   : > { %v904_v21 = vrot.slane %v902_v10, 6  ;;  %v911_v22 = vshll.u32 %v858_v9, 16  ;;  %v907_v25 = vrot.slane %v905_v18, 7  ;;  %v1750_v30 = vrot.slane %v1746_v7, 9  ;;  %v1934_v41 = vld [vmem:[%s2264_s1 + $0x70] sm:$0xff]  }
  0x35   : > { %v453_v23 = vcombine.low %v445_v62, %v2141_v14  ;;  %v1056_v31 = vcombine.low %v642_v0, %v646_v5  ;;  %v2154_v32 = vrot.slane %v657_v16, %v2047_v17  ;;  %1856 = vmatmul.mubr.msk.bf16.vlgmr.msra.gmra.mrb[4].mxu1 %vm466_vm15, %v760_v20  ;;  %v1049_v35 = vrot.slane %v1034_v26, 7  ;;  %v1779_v59 = vld.sshfl [vmem:[#allocation2 + $0x14] sm:$0x12 pattern:$0x76325410]  ;;  %v1935_v16 = vld [vmem:[%s2264_s1 + $0x68] sm:$0xff]  }
  0x36   : > { %v908_v33 = vor.u32 %v907_v25, %v904_v21  ;;  %v913_v34 = vrot.slane %v911_v22, 7  ;;  %v1259_v37 = vcombine.high %v1768_v27, %v1768_v27  ;;  %v1303_v38 = vshrl.u32 %v1768_v27, 16  ;;  %1868 = vmatpush3.bf16.msra.mxu1 %v1930_v24  ;;  %1871 = vmatprep.mubr.msk.bf16.mxu1 %vm1956_vm0, %v1955_v1  ;;  %v1945_v6 = vld.sshfl [vmem:[#allocation2 + $0x8] sm:$0xf pattern:$0x76325410] }
  0x37   : > { %1832 = vmatmul.mubr.msk.bf16.vlgmr.msra.gmra.mrb[0].mxu0 %vm466_vm15, %v453_v23  ;;  %v1306_v39 = vshll.u32 %v1768_v27, 16  ;;  %v2168_v44 = vsel %vm2100_vm3, %v1750_v30, %v1049_v35  ;;  %v1064_v45 = vrot.slane %v1056_v31, %v2047_v17  ;;  %1869 = vmatprep.subr.bf16.mxu1 %v1955_v1  ;;  %v672_v51 = vcombine.low %v664_v28, %v2154_v32  ;;  %v1946_v19 = vld.sshfl [vmem:[#allocation2 + $0x10] sm:$0xf pattern:$0x76325410]  ;;  %v1939_v21 = vld [vmem:[%s2264_s1 + $0x80] sm:$0xff]  }
  0x38   : > { %1844 = vmatpush3.bf16.msra.mxu0 %v1923_v15  ;;  %1847 = vmatprep.mubr.msk.bf16.mxu0 %vm1956_vm0, %v1955_v1  ;;  %v909_v42 = vrot.slane %v908_v33, 2  ;;  %v1057_v46 = vcombine.low %v650_v8, %v2168_v44  ;;  %v1305_v47 = vrot.slane %v1303_v38, 6  ;;  %v1312_v50 = vshll.u32 %v1259_v37, 16  ;;  %v1933_v8 = vld [vmem:[%s2264_s1 + $0x60] sm:$0xff]   ;;  %v1940_v22 = vld [vmem:[%s2264_s1 + $0x88] sm:$0xff]  }
  0x39   : > { %1845 = vmatprep.subr.bf16.mxu0 %v1955_v1  ;;  %v1308_v49 = vrot.slane %v1306_v39, 7  ;;  %v1435_v2 = vcombine.high %v1779_v59, %v1779_v59  ;;  %v1783_v9 = vrot.slane %v1779_v59, 9  ;;  %v1544_v24 = vld [vmem:[%s2266_s3] sm:$0xf] }
  0x3a   : > { %v914_v52 = vsel %vm2093_vm2, %v909_v42, %v913_v34  ;;  %v1071_v56 = vrot.slane %v1057_v46, %v2047_v17  ;;  %v1314_v58 = vrot.slane %v1312_v50, 7  ;;  %1870 = vmatpush3.bf16.msra.mxu1 %v1932_v40 }
  0x3b   : > { %v921_v55 = vcombine.low %v2123_v61, %v914_v52  ;;  %v1309_v57 = vor.u32 %v1308_v49, %v1305_v47  ;;  %1883 = vmatprep.subr.bf16.mxu1 %v1955_v1  ;;  %v928_v61 = vrot.slane %v920_v53, %v2047_v17  ;;  %v1450_v10 = vrot.slane %v1435_v2, 7 }
  0x3c   : > { %1846 = vmatpush3.bf16.msra.mxu0 %v1925_v36  ;;  %v1072_v60 = vcombine.low %v1064_v45, %v1071_v56 }
  0x3d   : > { %1859 = vmatprep.subr.bf16.mxu0 %v1955_v1  ;;  %v1310_v48 = vrot.slane %v1309_v57, 2  ;;  %v935_v62 = vrot.slane %v921_v55, %v2047_v17  ;;  %v1451_v18 = vsel %vm2100_vm3, %v1783_v9, %v1450_v10  ;;  %v1791_v9 = vld [vmem:[%s2265_s2] ss:$0 sm:$0xff] }
  0x3e   : > { %1872 = vmatmul.mubr.msk.bf16.vlgmr.msra.gmra.mrb[8].mxu1 %vm466_vm15, %v1072_v60  ;;  %v1458_v20 = vcombine.low %v2168_v44, %v1451_v18 }
  0x3f   : > { %1848 = vmatmul.mubr.msk.bf16.vlgmr.msra.gmra.mrb[4].mxu0 %vm466_vm15, %v672_v51  ;;  %v1315_v0 = vsel %vm2093_vm2, %v1310_v48, %v1314_v58  ;;  %1884 = vmatpush3.bf16.msra.mxu1 %v1934_v41  ;;  %v936_v5 = vcombine.low %v928_v61, %v935_v62 }
  0x40   : > { %1860 = vmatpush3.bf16.msra.mxu0 %v1927_v54  ;;  %1863 = vmatprep.mubr.msk.bf16.mxu0 %vm1956_vm0, %v1955_v1  ;;  %v1322_v3 = vcombine.low %v914_v52, %v1315_v0  ;;  %v1472_v29 = vrot.slane %v1458_v20, %v2047_v17 }
  0x41   : > { %1861 = vmatprep.subr.bf16.mxu0 %v1955_v1  ;;  %1887 = vmatprep.mubr.msk.bf16.mxu1 %vm1956_vm0, %v1955_v1 }
  0x42   : > { %1885 = vmatprep.subr.bf16.mxu1 %v1955_v1  ;;  %v1336_v7 = vrot.slane %v1322_v3, %v2047_v17  ;;  %v1473_v23 = vcombine.low %v2154_v32, %v1472_v29  ;;  %v1558_v17 = vsel %vm1556_vm4, %v1544_v24, 0  ;;  %v1601_v24 = vunpack.c.l.bf16 %v2035_v11 }
  0x43   : > { %1886 = vmatpush3.bf16.msra.mxu1 %v1936_v4 }
  0x44   : > { %1862 = vmatpush3.bf16.msra.mxu0 %v1931_v63  ;;  %v1337_v15 = vcombine.low %v2141_v14, %v1336_v7  ;;  %1899 = vmatprep.subr.bf16.mxu1 %v1955_v1  ;;  %v1161_v14 = vcombine.low %v1945_v6, %v1946_v19 }
  0x45   : > { %1875 = vmatprep.subr.bf16.mxu0 %v1955_v1 }
  0x46   : > { %1888 = vmatmul.mubr.msk.bf16.vlgmr.msra.gmra.mrb[12].mxu1 %vm466_vm15, %v1337_v15 }
  0x47   : > { %1864 = vmatmul.mubr.msk.bf16.vlgmr.msra.gmra.mrb[8].mxu0 %vm466_vm15, %v936_v5  ;;  %1901 = vmatprep.mubr.msk.bf16.mxu1 %vm1956_vm0, %v1955_v1 }
  0x48   : > { %1876 = vmatpush3.bf16.msra.mxu0 %v1933_v8  ;;  %1879 = vmatprep.mubr.msk.bf16.mxu0 %vm1956_vm0, %v1955_v1 }
  0x49   : > { %1877 = vmatprep.subr.bf16.mxu0 %v1955_v1  ;;  %1900 = vmatpush3.bf16.msra.mxu1 %v1558_v17  ;;  %v1602_v17 = vunpack.c.l.bf16 %v2038_v12 }
  0x4c   : > { %1878 = vmatpush3.bf16.msra.mxu0 %v1935_v16 }
  0x4d   : > { %1891 = vmatprep.subr.bf16.mxu0 %v1955_v1 }
  0x4f   : > { %1880 = vmatmul.mubr.msk.bf16.vlgmr.msra.gmra.mrb[12].mxu0 %vm466_vm15, %v1161_v14 }
  0x50   : > { %1892 = vmatpush3.bf16.msra.mxu0 %v1939_v21  ;;  %1895 = vmatprep.mubr.msk.bf16.mxu0 %vm1956_vm0, %v1955_v1  ;;  %vm1552_vm0 = vcmask 64512  }
  0x51   : > { %1893 = vmatprep.subr.bf16.mxu0 %v1955_v1 }
  0x54   : > { %1894 = vmatpush3.bf16.msra.mxu0 %v1940_v22 }
  0x57   : > { %1896 = vmatmul.mubr.msk.bf16.vlgmr.msra.gmra.mrb[16].mxu0 %vm466_vm15, %v1473_v23 }
 0x100   : > { %v581_v25 = vpop.f32.mrb[0].mxu1 }
 0x101   : > { %v1841_v26 = vpop.f32.mrb[1].mxu1 }
 0x102   : > { %v584_v27 = vpop.f32.mrb[2].mxu1  ;;  %v1604_v26 = vunpack.c.l.bf16 %v2059_v43 }
 0x103   : > { %v1842_v28 = vpop.f32.mrb[3].mxu1 }
 0x104   : > { %v1609_v28 = vcombine.low %v1601_v24, %v1602_v17 }
 0x108   : > { %v810_v31 = vpop.f32.mrb[4].mxu1 }
 0x109   : > { %v1857_v34 = vpop.f32.mrb[5].mxu1 }
 0x10a   : > { %v504_v30 = vpop.f32.mrb[0].mxu0  ;;  %v813_v35 = vpop.f32.mrb[6].mxu1 }
 0x10b   : > { %v582_v33 = vadd.f32 %v581_v25, %v504_v30  ;;  %v1833_v1 = vpop.f32.mrb[1].mxu0  ;;  %v1858_v38 = vpop.f32.mrb[7].mxu1  ;;  %v1603_v25 = vunpack.c.l.bf16 %v2041_v13 }
 0x10c   : > { %v507_v32 = vpop.f32.mrb[2].mxu0 }
 0x10d   : > { %v585_v36 = vadd.f32 %v584_v27, %v507_v32  ;;  %v1834_v37 = vpop.f32.mrb[3].mxu0  ;;  %v1792_v27 = vld [vmem:[%s2267_s4] ss:$0 sm:$0xff]  ;;  %v1610_v1 = vcombine.low %v1603_v25, %v1604_v26 }
 0x111   : > { %v1122_v45 = vpop.f32.mrb[8].mxu1 }
 0x112   : > { %v722_v39 = vpop.f32.mrb[4].mxu0  ;;  %v1873_v50 = vpop.f32.mrb[9].mxu1 }
 0x113   : > { %v729_v40 = vadd.f32 %v722_v39, %v582_v33  ;;  %v1849_v42 = vpop.f32.mrb[5].mxu0  ;;  %v1125_v51 = vpop.f32.mrb[10].mxu1 }
 0x114   : > { %v725_v44 = vpop.f32.mrb[6].mxu0  ;;  %v1874_v53 = vpop.f32.mrb[11].mxu1 }
 0x115   : > { %v730_v46 = vadd.f32 %v725_v44, %v585_v36  ;;  %v817_v47 = vadd.f32 %v810_v31, %v729_v40  ;;  %v1850_v49 = vpop.f32.mrb[7].mxu0 }
 0x117   : > { %v818_v52 = vadd.f32 %v813_v35, %v730_v46 }
 0x119   : > { %v1387_v58 = vpop.f32.mrb[12].mxu1 }
 0x11a   : > { %v986_v54 = vpop.f32.mrb[8].mxu0  ;;  %v1889_v48 = vpop.f32.mrb[13].mxu1 }
 0x11b   : > { %v993_v55 = vadd.f32 %v986_v54, %v817_v47  ;;  %v1865_v56 = vpop.f32.mrb[9].mxu0  ;;  %v1390_v61 = vpop.f32.mrb[14].mxu1 }
 0x11c   : > { %v989_v57 = vpop.f32.mrb[10].mxu0  ;;  %v1890_v63 = vpop.f32.mrb[15].mxu1 }
 0x11d   : > { %v994_v59 = vadd.f32 %v989_v57, %v818_v52  ;;  %v1129_v60 = vadd.f32 %v1122_v45, %v993_v55  ;;  %v1866_v41 = vpop.f32.mrb[11].mxu0 }
 0x11f   : > { %v1130_v62 = vadd.f32 %v1125_v51, %v994_v59 }
 0x122   : > { %v1211_v0 = vpop.f32.mrb[12].mxu0 }
 0x123   : > { %v1218_v2 = vadd.f32 %v1211_v0, %v1129_v60  ;;  %v1881_v3 = vpop.f32.mrb[13].mxu0 }
 0x124   : > { %v1214_v4 = vpop.f32.mrb[14].mxu0 }
 0x125   : > { %v1219_v5 = vadd.f32 %v1214_v4, %v1130_v62  ;;  %v1394_v6 = vadd.f32 %v1387_v58, %v1218_v2  ;;  %v1882_v19 = vpop.f32.mrb[15].mxu0 }
 0x127   : > { %v1395_v7 = vadd.f32 %v1390_v61, %v1219_v5 }
 0x12a   : > { %v1523_v8 = vpop.f32.mrb[16].mxu0 }
 0x12b   : > { %v1530_v10 = vadd.f32 %v1523_v8, %v1394_v6  ;;  %v1897_v15 = vpop.f32.mrb[17].mxu0 }
 0x12c   : > { %v1526_v16 = vpop.f32.mrb[18].mxu0 }
 0x12d   : > { %v1539_v18 = vadd.f32 %v1791_v9, %v1530_v10  ;;  %v1531_v14 = vadd.f32 %v1526_v16, %v1395_v7  ;;  %v1898_v20 = vpop.f32.mrb[19].mxu0 }
 0x12f   : > { %v1540_v21 = vadd.f32 %v1791_v9, %v1531_v14  ;;  %v1541_v29 = vmax.f32 %v1539_v18, 0.0 }
 0x131   : > { %v1542_v22 = vmax.f32 %v1540_v21, 0.0 }
 0x133   : > { %v1543_v23 = vpack.c.bf16 %v1542_v22, %v1541_v29 }
 0x135   : > { %1902 = vmatmul.mubr.msk.bf16.vlgmr.msra.gmra.mrb[16].mxu1 %vm1552_vm0, %v1543_v23 }
 0x208   : > { %v1594_v30 = vpop.f32.mrb[16].mxu1 }
 0x209   : > { %v1595_v31 = vadd.f32 %v1792_v27, %v1594_v30  ;;  %v1903_v33 = vpop.f32.mrb[17].mxu1 }
 0x20a   : > { %v1597_v34 = vpop.f32.mrb[18].mxu1 }
 0x20b   : > { %v1613_v32 = vadd.f32 %v1609_v28, %v1595_v31  ;;  %v1598_v35 = vadd.f32 %v1792_v27, %v1597_v34  ;;  %v1904_v11 = vpop.f32.mrb[19].mxu1 }
 0x20d   : > { %v1615_v36 = vmax.f32 %v1613_v32, 0.0  ;;  %v1614_v37 = vadd.f32 %v1610_v1, %v1598_v35 }
 0x20f   : > { %v1619_v12 = vcombine.high %v1615_v36, %v1615_v36  ;;  %v1623_v13 = vpack.c.bf16 %v1615_v36, %v1615_v36  ;;  %v1616_v43 = vmax.f32 %v1614_v37, 0.0 }
 0x211   : > { %v1624_v38 = vpack.c.bf16 %v1619_v12, %v1619_v12  ;;  %1628 = vst.msk [vmem:[%s224_s23] sm:$0x3] %vm1627_vm5, %v1623_v13  ;;  %v1620_v39 = vcombine.high %v1616_v43, %v1616_v43  ;;  %v1625_v40 = vpack.c.bf16 %v1616_v43, %v1616_v43 }
 0x213   : > { %1629 = vst.msk [vmem:[%s224_s23 + $0x2] sm:$0x3] %vm1627_vm5, %v1624_v38  ;;  %v1626_v42 = vpack.c.bf16 %v1620_v39, %v1620_v39  ;;  %1630 = vst.msk [vmem:[%s224_s23 + $0x4] sm:$0x3] %vm1627_vm5, %v1625_v40 }
 0x215   : > { %1631 = vst.msk [vmem:[%s224_s23 + $0x6] sm:$0x3] %vm1627_vm5, %v1626_v42 }
 0x216 PF: > { %s15_s18 = sadd.s32 1, %s1953_s18  }
 0x217   : > { %p12_p4 = scmp.ge.s32.totalorder %s15_s18, 4  }
 0x219   :  { %14 = sbr.rel (!%p12_p4) target bundleno = 1 (0x1), region = 80 }

</bundles_post_ra>
